<compile_context>
chip_gen: v6e
topology: v6e:2x2x1
jax: 0.10.0
libtpu: 0.0.40
codegen_flags: <defaults>
</compile_context>

<pallas_src>
import functools

import jax
import jax.numpy as jnp
import numpy as np
from jax.experimental import pallas as pl
from jax.experimental.pallas import tpu as pltpu

BN_EPS = 1e-05

# Row-tile targets.  TM_MM feeds the MXU passes; TM_ELEM feeds the purely mem-bound
# elementwise passes (bigger tiles amortize the ~0.35us per-grid-step overhead).
TM_MM = 256
TM_ELEM = 512
TH_TARGET = 8


# --------------------------------- helpers ---------------------------------- #

def _round_up(c, m=128):
    return ((c + m - 1) // m) * m


def _pick_tile(m, target):
    """Largest divisor of m <= target, preferring sublane-friendly multiples of 8.
    (Real deployments would pad M so this never degenerates.)"""
    best = 0
    for cand in range(min(target, m), 0, -1):
        if m % cand == 0:
            if cand % 8 == 0 or cand == m:
                return cand
            if best == 0:
                best = cand
    return max(best, 1)


def _vmem_limit(block_bytes):
    """Explicit scoped-VMEM budget: ~2x (double buffering) + headroom, with a floor
    above v5e's 16 MiB default and a cap under v7x's 64 MiB physical."""
    return int(min(max(2 * block_bytes + (8 << 20), 32 << 20), 64 << 20))


def _pad2(w, r, c):
    return jnp.pad(w, ((0, r - w.shape[0]), (0, c - w.shape[1])))


def _pad_vec(v, c):
    return jnp.pad(v, (0, c - v.shape[0])).reshape(1, c).astype(jnp.float32)


def _fold_bn(st, g, b, m):
    """Reduce the per-tile [sum, sumsq] table once (tiny XLA op) into folded
    per-channel scale = g*rstd and shift = b - mean*scale, each (1, C_p) f32."""
    st = st.reshape(-1, 2, st.shape[-1]).astype(jnp.float32)
    s1 = jnp.sum(st[:, 0, :], axis=0, keepdims=True)
    s2 = jnp.sum(st[:, 1, :], axis=0, keepdims=True)
    mean = s1 / m
    var = jnp.maximum(s2 / m - mean * mean, 0.0)      # guard E[x^2]-E[x]^2 cancellation
    scale = g * jax.lax.rsqrt(var + BN_EPS)
    shift = b - mean * scale
    return scale.astype(jnp.float32), shift.astype(jnp.float32)


def _col_stats(y32):
    """Per-tile column [sum, sumsq] via sublane reductions (XLU slot, free under an
    MXU-bound pass) on the bf16-rounded values that are actually stored."""
    s1 = jnp.sum(y32, axis=0, keepdims=True)
    s2 = jnp.sum(y32 * y32, axis=0, keepdims=True)
    return jnp.concatenate([s1, s2], axis=0)          # (2, C)


def _pad_phase_split(x_img, k, s):
    """Zero-pad by (k-1)//2 and split into s*s stride-phase planes so every 3x3 tap
    becomes a unit-stride in-kernel slice (for s=1 this is just the pad).
    Returns (N*s*s, Hq, Wq, C), Ho, Wo."""
    p = (k - 1) // 2
    n, h, w, c = x_img.shape
    ho = (h + 2 * p - k) // s + 1
    wo = (w + 2 * p - k) // s + 1
    hq = ho + (k - 1) // s
    wq = wo + (k - 1) // s
    xq = jnp.pad(x_img, ((0, 0), (p, p), (p, p), (0, 0)))
    planes = []
    for ph in range(s):
        for pw in range(s):
            pp = xq[:, ph::s, pw::s, :][:, :hq, :wq, :]
            pp = jnp.pad(pp, ((0, 0), (0, hq - pp.shape[1]),
                              (0, wq - pp.shape[2]), (0, 0)))
            planes.append(pp)
    stacked = jnp.stack(planes, axis=1)               # (N, s*s, Hq, Wq, C)
    return stacked.reshape(n * s * s, hq, wq, c), ho, wo


# ----------------------------- Pallas kernels ------------------------------- #

def _matmul_stats_kernel(x_ref, w_ref, y_ref, st_ref):
    """1x1 conv as a row-tiled matmul; emits bf16 tile + per-tile BN [sum, sumsq]."""
    y = jnp.dot(x_ref[...], w_ref[...], preferred_element_type=jnp.float32)
    yb = y.astype(jnp.bfloat16)
    y_ref[...] = yb
    y32 = yb.astype(jnp.float32)
    st_ref[...] = _col_stats(y32)[None]


def _scale_shift_act_kernel(y_ref, sc_ref, sh_ref, o_ref, *, relu):
    """Folded training-mode BN (single FMA) + optional ReLU over a row tile."""
    out = y_ref[...].astype(jnp.float32) * sc_ref[...] + sh_ref[...]
    if relu:
        out = jnp.maximum(out, 0.0)
    o_ref[...] = out.astype(o_ref.dtype)


def _conv3x3_stats_kernel(xpl_ref, w_ref, y_ref, st_ref, *, s, th, wo):
    """Implicit-im2col 3x3 conv: the 9 shifted patches are lane-concatenated into a
    single (th*wo, 9*Cin_p) bf16 tile and fed to ONE MXU dot (K-accumulation on the
    MXU, no f32 VPU accumulator).

    xpl_ref: (s*s, Hq, Wq, Cin_p) stride-phase planes of one padded image (resident
             across the row-tile axis), w_ref: (9*Cin_p, Cout_p) bf16,
    y_ref:   (1, TH*Wo, Cout_p) bf16, st_ref: (1, 1, 2, Cout_p) BN [sum, sumsq]."""
    cin_p = xpl_ref.shape[-1]
    cout_p = w_ref.shape[1]
    h0 = pl.multiple_of(pl.program_id(1) * th, th)
    patches = []
    for dy in range(3):
        for dx in range(3):
            plane = (dy % s) * s + (dx % s)
            patches.append(
                xpl_ref[plane, pl.ds(h0 + dy // s, th), pl.ds(dx // s, wo), :])
    x2 = jnp.concatenate(patches, axis=-1).reshape(th * wo, 9 * cin_p)
    y = jnp.dot(x2, w_ref[...], preferred_element_type=jnp.float32)
    yb = y.astype(jnp.bfloat16)
    y_ref[...] = yb.reshape(1, th * wo, cout_p)
    y32 = yb.astype(jnp.float32)
    st_ref[...] = _col_stats(y32).reshape(1, 1, 2, cout_p)


def _bnb_matmul2_stats_kernel(yb_ref, scb_ref, shb_ref, wc_ref, xs_ref, wp_ref,
                              yc_ref, yp_ref, stc_ref, stp_ref):
    """Folded BN_b + ReLU fused into the bottleneck's last 1x1 conv, plus the fused
    projection 1x1 conv; emits both conv results (bf16) and both BN stat tables."""
    hb = jnp.maximum(yb_ref[...].astype(jnp.float32) * scb_ref[...] + shb_ref[...],
                     0.0)
    yc = jnp.dot(hb.astype(jnp.bfloat16), wc_ref[...],
                 preferred_element_type=jnp.float32)
    yp = jnp.dot(xs_ref[...], wp_ref[...], preferred_element_type=jnp.float32)
    ycb = yc.astype(jnp.bfloat16)
    ypb = yp.astype(jnp.bfloat16)
    yc_ref[...] = ycb
    yp_ref[...] = ypb
    stc_ref[...] = _col_stats(ycb.astype(jnp.float32))[None]
    stp_ref[...] = _col_stats(ypb.astype(jnp.float32))[None]


def _bn2_add_relu_kernel(yc_ref, scc_ref, shc_ref, yp_ref, scp_ref, shp_ref, o_ref):
    """Final pass of ResBlock.forward: bn_c(f) + bn_p(proj) -> add -> ReLU (bf16)."""
    fc = yc_ref[...].astype(jnp.float32) * scc_ref[...] + shc_ref[...]
    pr = yp_ref[...].astype(jnp.float32) * scp_ref[...] + shp_ref[...]
    o_ref[...] = jnp.maximum(fc + pr, 0.0).astype(o_ref.dtype)


# --------------------------- pallas_call wrappers ---------------------------- #

def matmul_stats(x2d, w):
    m, kp = x2d.shape
    cp = w.shape[1]
    tm = _pick_tile(m, TM_MM)
    nt = m // tm
    blk = 2 * (tm * kp + kp * cp + tm * cp) + 4 * 2 * cp
    return pl.pallas_call(
        _matmul_stats_kernel,
        grid=(nt,),
        in_specs=[pl.BlockSpec((tm, kp), lambda i: (i, 0)),
                  pl.BlockSpec((kp, cp), lambda i: (0, 0))],
        out_specs=[pl.BlockSpec((tm, cp), lambda i: (i, 0)),
                   pl.BlockSpec((1, 2, cp), lambda i: (i, 0, 0))],
        out_shape=[jax.ShapeDtypeStruct((m, cp), jnp.bfloat16),
                   jax.ShapeDtypeStruct((nt, 2, cp), jnp.float32)],
        compiler_params=pltpu.CompilerParams(
            dimension_semantics=("parallel",),
            vmem_limit_bytes=_vmem_limit(blk)),
        cost_estimate=pl.CostEstimate(
            flops=2 * m * kp * cp, transcendentals=0,
            bytes_accessed=2 * (m * kp + kp * cp + m * cp)),
    )(x2d, w)


def scale_shift_act(y, scale, shift, *, relu):
    mm, cp = y.shape
    tm = _pick_tile(mm, TM_ELEM)
    nt = mm // tm
    kern = functools.partial(_scale_shift_act_kernel, relu=relu)
    blk = 2 * 2 * tm * cp + 4 * 2 * cp
    # NOTE: once stats are pre-folded (done) a deeper pipeline (pl.Buffered(3)) on the
    # y input can be swept; left at the default depth here.
    return pl.pallas_call(
        kern,
        grid=(nt,),
        in_specs=[pl.BlockSpec((tm, cp), lambda i: (i, 0)),
                  pl.BlockSpec((1, cp), lambda i: (0, 0)),
                  pl.BlockSpec((1, cp), lambda i: (0, 0))],
        out_specs=pl.BlockSpec((tm, cp), lambda i: (i, 0)),
        out_shape=jax.ShapeDtypeStruct((mm, cp), jnp.bfloat16),
        compiler_params=pltpu.CompilerParams(
            dimension_semantics=("parallel",),
            vmem_limit_bytes=_vmem_limit(blk)),
        cost_estimate=pl.CostEstimate(
            flops=3 * mm * cp, transcendentals=0,
            bytes_accessed=4 * mm * cp),
    )(y, scale, shift)


def conv3x3_stats(planes, w9, *, s, n, ho, wo):
    ss = s * s
    _, hq, wq, cin_p = planes.shape
    cout_p = w9.shape[1]
    th = _pick_tile(ho, TH_TARGET)
    nh = ho // th
    assert (th * wo) % 8 == 0 or th * wo == ho * wo, (th, wo)
    kern = functools.partial(_conv3x3_stats_kernel, s=s, th=th, wo=wo)
    blk = (2 * ss * hq * wq * cin_p + 2 * 9 * cin_p * cout_p
           + 2 * th * wo * (cout_p + 9 * cin_p) + 4 * 2 * cout_p)
    return pl.pallas_call(
        kern,
        grid=(n, nh),
        in_specs=[pl.BlockSpec((ss, hq, wq, cin_p), lambda i, j: (i, 0, 0, 0)),
                  pl.BlockSpec((9 * cin_p, cout_p), lambda i, j: (0, 0))],
        out_specs=[pl.BlockSpec((1, th * wo, cout_p), lambda i, j: (i, j, 0)),
                   pl.BlockSpec((1, 1, 2, cout_p), lambda i, j: (i, j, 0, 0))],
        out_shape=[jax.ShapeDtypeStruct((n, ho * wo, cout_p), jnp.bfloat16),
                   jax.ShapeDtypeStruct((n, nh, 2, cout_p), jnp.float32)],
        compiler_params=pltpu.CompilerParams(
            dimension_semantics=("parallel", "parallel"),
            vmem_limit_bytes=_vmem_limit(blk)),
        cost_estimate=pl.CostEstimate(
            flops=2 * n * ho * wo * 9 * cin_p * cout_p, transcendentals=0,
            bytes_accessed=2 * (planes.size + w9.size + n * ho * wo * cout_p)),
    )(planes, w9)


def bnb_matmul2_stats(yb2d, scb, shb, wc, xs, wp):
    mm, cb_p = yb2d.shape
    cin_p = xs.shape[1]
    co_p = wc.shape[1]
    tm = _pick_tile(mm, TM_MM)
    nt = mm // tm
    blk = (2 * tm * cb_p + 4 * 2 * cb_p + 2 * cb_p * co_p + 2 * tm * cin_p
           + 2 * cin_p * co_p + 2 * 2 * tm * co_p + 4 * 4 * co_p)
    return pl.pallas_call(
        _bnb_matmul2_stats_kernel,
        grid=(nt,),
        in_specs=[pl.BlockSpec((tm, cb_p), lambda i: (i, 0)),
                  pl.BlockSpec((1, cb_p), lambda i: (0, 0)),
                  pl.BlockSpec((1, cb_p), lambda i: (0, 0)),
                  pl.BlockSpec((cb_p, co_p), lambda i: (0, 0)),
                  pl.BlockSpec((tm, cin_p), lambda i: (i, 0)),
                  pl.BlockSpec((cin_p, co_p), lambda i: (0, 0))],
        out_specs=[pl.BlockSpec((tm, co_p), lambda i: (i, 0)),
                   pl.BlockSpec((tm, co_p), lambda i: (i, 0)),
                   pl.BlockSpec((1, 2, co_p), lambda i: (i, 0, 0)),
                   pl.BlockSpec((1, 2, co_p), lambda i: (i, 0, 0))],
        out_shape=[jax.ShapeDtypeStruct((mm, co_p), jnp.bfloat16),
                   jax.ShapeDtypeStruct((mm, co_p), jnp.bfloat16),
                   jax.ShapeDtypeStruct((nt, 2, co_p), jnp.float32),
                   jax.ShapeDtypeStruct((nt, 2, co_p), jnp.float32)],
        compiler_params=pltpu.CompilerParams(
            dimension_semantics=("parallel",),
            vmem_limit_bytes=_vmem_limit(blk)),
        cost_estimate=pl.CostEstimate(
            flops=2 * mm * (cb_p + cin_p) * co_p, transcendentals=0,
            bytes_accessed=2 * (mm * cb_p + mm * cin_p + cb_p * co_p
                                + cin_p * co_p + 2 * mm * co_p)),
    )(yb2d, scb, shb, wc, xs, wp)


def bn2_add_relu(yc, scc, shc, yp, scp, shp):
    mm, co_p = yc.shape
    tm = _pick_tile(mm, TM_ELEM)
    nt = mm // tm
    blk = 2 * 3 * tm * co_p + 4 * 4 * co_p
    return pl.pallas_call(
        _bn2_add_relu_kernel,
        grid=(nt,),
        in_specs=[pl.BlockSpec((tm, co_p), lambda i: (i, 0)),
                  pl.BlockSpec((1, co_p), lambda i: (0, 0)),
                  pl.BlockSpec((1, co_p), lambda i: (0, 0)),
                  pl.BlockSpec((tm, co_p), lambda i: (i, 0)),
                  pl.BlockSpec((1, co_p), lambda i: (0, 0)),
                  pl.BlockSpec((1, co_p), lambda i: (0, 0))],
        out_specs=pl.BlockSpec((tm, co_p), lambda i: (i, 0)),
        out_shape=jax.ShapeDtypeStruct((mm, co_p), jnp.bfloat16),
        compiler_params=pltpu.CompilerParams(
            dimension_semantics=("parallel",),
            vmem_limit_bytes=_vmem_limit(blk)),
        cost_estimate=pl.CostEstimate(
            flops=6 * mm * co_p, transcendentals=0,
            bytes_accessed=6 * mm * co_p),
    )(yc, scc, shc, yp, scp, shp)


# ------------------------------- forward pass -------------------------------- #

def res_block_forward(x_nchw, params, stride):
    """ResBlock.forward with proj_block=True and bottleneck_transform (STRIDE_1X1=False)."""
    x = jnp.transpose(x_nchw, (0, 2, 3, 1))                       # NCHW -> NHWC
    N, H, W, Cin = x.shape
    Cb = params["wa"].shape[1]
    Cout = params["wc"].shape[1]
    Cin_p, Cb_p, Co_p = _round_up(Cin), _round_up(Cb), _round_up(Cout)

    # channel-pad to 128 lanes, bf16 MXU operands (zero-padded channels stay zero).
    xp = jnp.pad(x, ((0, 0), (0, 0), (0, 0), (0, Cin_p - Cin))).astype(jnp.bfloat16)
    wa = _pad2(params["wa"], Cin_p, Cb_p).astype(jnp.bfloat16)
    wc = _pad2(params["wc"], Cb_p, Co_p).astype(jnp.bfloat16)
    wp = _pad2(params["wp"], Cin_p, Co_p).astype(jnp.bfloat16)
    wb = jnp.pad(params["wb"], ((0, 0), (0, 0), (0, Cb_p - Cb), (0, Cb_p - Cb)))
    wb = wb.reshape(9 * Cb_p, Cb_p).astype(jnp.bfloat16)          # K = 9*Cin taps-major
    ga, ba = _pad_vec(params["ga"], Cb_p), _pad_vec(params["ba"], Cb_p)
    gb, bb = _pad_vec(params["gb"], Cb_p), _pad_vec(params["bb"], Cb_p)
    gc, bc = _pad_vec(params["gc"], Co_p), _pad_vec(params["bc"], Co_p)
    gp, bp = _pad_vec(params["gp"], Co_p), _pad_vec(params["bp"], Co_p)

    # a: 1x1 conv (stride 1) -> fold BN_a -> BN_a + ReLU
    M1 = N * H * W
    ya, sta = matmul_stats(xp.reshape(M1, Cin_p), wa)
    sca, sha = _fold_bn(sta, ga, ba, M1)
    ha = scale_shift_act(ya, sca, sha, relu=True)

    # b: 3x3 conv (stride) ; its BN+ReLU is folded into the next pass
    planes, Ho, Wo = _pad_phase_split(ha.reshape(N, H, W, Cb_p), k=3, s=stride)
    yb, stb = conv3x3_stats(planes, wb, s=stride, n=N, ho=Ho, wo=Wo)

    # BN_b + ReLU -> c: 1x1 conv, fused with the projection 1x1 conv (stride)
    M2 = N * Ho * Wo
    scb, shb = _fold_bn(stb, gb, bb, M2)
    # TODO(synk): move this strided gather into the fused kernel (strided pl.ds reads
    #             of xp) to remove one XLA-side activation copy.
    xs = xp[:, ::stride, ::stride, :].reshape(M2, Cin_p)
    yc, yp, stc, stp = bnb_matmul2_stats(yb.reshape(M2, Cb_p), scb, shb, wc, xs, wp)

    # BN_c + BN_proj + residual add + final ReLU (bf16 store)
    scc, shc = _fold_bn(stc, gc, bc, M2)
    scp, shp = _fold_bn(stp, gp, bp, M2)
    out2d = bn2_add_relu(yc, scc, shc, yp, scp, shp)
    out = out2d.reshape(N, Ho, Wo, Co_p)[..., :Cout]
    return jnp.transpose(out, (0, 3, 1, 2)).astype(jnp.float32)   # NHWC -> NCHW


# ----------------------------- pure-JAX reference ---------------------------- #

def ref_res_block(x_nchw, params, stride):
    x = jnp.transpose(x_nchw, (0, 2, 3, 1))

    def conv(inp, w_hwio, s, pad):
        return jax.lax.conv_general_dilated(
            inp, w_hwio, (s, s), [(pad, pad), (pad, pad)],
            dimension_numbers=("NHWC", "HWIO", "NHWC"))

    def bn(y, g, b):
        mean = y.mean(axis=(0, 1, 2), keepdims=True)
        var = ((y - mean) ** 2).mean(axis=(0, 1, 2), keepdims=True)
        return ((y - mean) * jax.lax.rsqrt(var + BN_EPS)
                * g.reshape(1, 1, 1, -1) + b.reshape(1, 1, 1, -1))

    ha = jnp.maximum(bn(conv(x, params["wa"][None, None], 1, 0),
                        params["ga"], params["ba"]), 0.0)
    hb = jnp.maximum(bn(conv(ha, params["wb"], stride, 1),
                        params["gb"], params["bb"]), 0.0)
    fc = bn(conv(hb, params["wc"][None, None], 1, 0), params["gc"], params["bc"])
    pr = bn(conv(x, params["wp"][None, None], stride, 0), params["gp"], params["bp"])
    out = jnp.maximum(fc + pr, 0.0)
    return jnp.transpose(out, (0, 3, 1, 2))


# ----------------------------------- main ------------------------------------ #

if __name__ == "__main__":
    key = jax.random.PRNGKey(0)
    N, Cin, H, W = 2, 4, 16, 16          # PyTorch-style NCHW input shape
    Cb, Cout, stride = 4, 8, 2           # w_in != w_out and stride != 1 -> proj_block

    ks = jax.random.split(key, 13)

    def q(a):  # quantize operands to bf16-representable f32 so both paths share them
        return a.astype(jnp.bfloat16).astype(jnp.float32)

    params = {
        "wa": q(0.2 * jax.random.normal(ks[0], (Cin, Cb), jnp.float32)),
        "ga": 1.0 + 0.1 * jax.random.normal(ks[1], (Cb,), jnp.float32),
        "ba": 0.1 * jax.random.normal(ks[2], (Cb,), jnp.float32),
        "wb": q(0.2 * jax.random.normal(ks[3], (3, 3, Cb, Cb), jnp.float32)),
        "gb": 1.0 + 0.1 * jax.random.normal(ks[4], (Cb,), jnp.float32),
        "bb": 0.1 * jax.random.normal(ks[5], (Cb,), jnp.float32),
        "wc": q(0.2 * jax.random.normal(ks[6], (Cb, Cout), jnp.float32)),
        "gc": 1.0 + 0.1 * jax.random.normal(ks[7], (Cout,), jnp.float32),
        "bc": 0.1 * jax.random.normal(ks[8], (Cout,), jnp.float32),
        "wp": q(0.2 * jax.random.normal(ks[9], (Cin, Cout), jnp.float32)),
        "gp": 1.0 + 0.1 * jax.random.normal(ks[10], (Cout,), jnp.float32),
        "bp": 0.1 * jax.random.normal(ks[11], (Cout,), jnp.float32),
    }
    x = q(jax.random.normal(ks[12], (N, Cin, H, W), jnp.float32))

    fwd = jax.jit(res_block_forward, static_argnums=2)
    ref_fn = jax.jit(ref_res_block, static_argnums=2)

    out = jax.block_until_ready(fwd(x, params, stride))
    ref = jax.block_until_ready(ref_fn(x, params, stride))

    assert out.shape == (N, Cout, H // stride, W // stride), out.shape
    # tolerance covers bf16 storage of intermediate and final activations
    np.testing.assert_allclose(np.asarray(out), np.asarray(ref),
                               atol=5e-2, rtol=5e-2)
    print("KERNEL_OK")
</pallas_src>

<mosaic_0001>
module attributes {stable_mosaic.version = 11 : i64} {
  func.func @_matmul_stats_kernel(%arg0: i32, %arg1: memref<256x128xbf16, #tpu.memory_space<vmem>>, %arg2: memref<128x128xbf16, #tpu.memory_space<vmem>>, %arg3: memref<256x128xbf16, #tpu.memory_space<vmem>>, %arg4: memref<1x2x128xf32, #tpu.memory_space<vmem>>) attributes {dimension_semantics = [#tpu.dimension_semantics<parallel>], iteration_bounds = array<i64: 2>, scalar_prefetch = 0 : i64, scratch_operands = 0 : i64, tpu.core_type = #tpu.core_type<tc>, window_params = [{transform_indices = @transform_0, window_bounds = array<i64: 256, 128>}, {pipeline_mode = #tpu.pipeline_mode<synchronous>, transform_indices = @transform_1, window_bounds = array<i64: 128, 128>}, {transform_indices = @transform_2, window_bounds = array<i64: 256, 128>}, {transform_indices = @transform_3, window_bounds = array<i64: 1, 2, 128>}]} {
    %c0 = arith.constant 0 : index
    %c0_0 = arith.constant 0 : index
    %0 = vector.load %arg1[%c0, %c0_0] : memref<256x128xbf16, #tpu.memory_space<vmem>>, vector<256x128xbf16>
    %c0_1 = arith.constant 0 : index
    %c0_2 = arith.constant 0 : index
    %1 = vector.load %arg2[%c0_1, %c0_2] : memref<128x128xbf16, #tpu.memory_space<vmem>>, vector<128x128xbf16>
    %cst = arith.constant dense<0.000000e+00> : vector<256x128xf32>
    %2 = tpu.matmul %0, %1, %cst {dimension_numbers = #tpu.dot_dimension_numbers<[1], [0], [0], [1], [0, 0, 1, 1], [], []>} : vector<256x128xbf16>, vector<128x128xbf16>, vector<256x128xf32> -> vector<256x128xf32>
    %3 = arith.truncf %2 : vector<256x128xf32> to vector<256x128xbf16>
    %c0_3 = arith.constant 0 : index
    %c0_4 = arith.constant 0 : index
    %4 = vector.load %arg3[%c0_3, %c0_4] : memref<256x128xbf16, #tpu.memory_space<vmem>>, vector<256x128xbf16>
    tpu.vector_store %arg3[%c0_3, %c0_4], %3 {strides = array<i32>} : memref<256x128xbf16, #tpu.memory_space<vmem>>, vector<256x128xbf16>,
    %5 = arith.extf %3 : vector<256x128xbf16> to vector<256x128xf32>
    %cst_5 = arith.constant dense<0.000000e+00> : vector<128xf32>
    %6 = vector.multi_reduction <add>, %5, %cst_5 [0] : vector<256x128xf32> to vector<128xf32>
    %7 = vector.shape_cast %6 : vector<128xf32> to vector<1x128xf32>
    %8 = arith.mulf %5, %5 : vector<256x128xf32>
    %cst_6 = arith.constant dense<0.000000e+00> : vector<128xf32>
    %9 = vector.multi_reduction <add>, %8, %cst_6 [0] : vector<256x128xf32> to vector<128xf32>
    %10 = vector.shape_cast %9 : vector<128xf32> to vector<1x128xf32>
    %11 = tpu.concatenate %7, %10 in 0 : vector<1x128xf32>, vector<1x128xf32> -> vector<2x128xf32>
    %12 = vector.shape_cast %11 : vector<2x128xf32> to vector<1x2x128xf32>
    %c0_7 = arith.constant 0 : index
    %c0_8 = arith.constant 0 : index
    %c0_9 = arith.constant 0 : index
    %13 = vector.load %arg4[%c0_7, %c0_8, %c0_9] : memref<1x2x128xf32, #tpu.memory_space<vmem>>, vector<1x2x128xf32>
    tpu.vector_store %arg4[%c0_7, %c0_8, %c0_9], %12 {strides = array<i32>} : memref<1x2x128xf32, #tpu.memory_space<vmem>>, vector<1x2x128xf32>,
    return
  }
  func.func @transform_0(%arg0: i32) -> (i32, i32) {
    %c0_i32 = arith.constant 0 : i32
    %c0_i32_0 = arith.constant 0 : i32
    return %arg0, %c0_i32 : i32, i32
  }
  func.func @transform_1(%arg0: i32) -> (i32, i32) {
    %c0_i32 = arith.constant 0 : i32
    %c0_i32_0 = arith.constant 0 : i32
    %c0_i32_1 = arith.constant 0 : i32
    return %c0_i32, %c0_i32_0 : i32, i32
  }
  func.func @transform_2(%arg0: i32) -> (i32, i32) {
    %c0_i32 = arith.constant 0 : i32
    %c0_i32_0 = arith.constant 0 : i32
    return %arg0, %c0_i32 : i32, i32
  }
  func.func @transform_3(%arg0: i32) -> (i32, i32, i32) {
    %c0_i32 = arith.constant 0 : i32
    %c0_i32_0 = arith.constant 0 : i32
    %c0_i32_1 = arith.constant 0 : i32
    return %arg0, %c0_i32, %c0_i32_0 : i32, i32, i32
  }
}

module attributes {stable_mosaic.version = 11 : i64} {
  func.func @_scale_shift_act_kernel(%arg0: i32, %arg1: memref<512x128xbf16, #tpu.memory_space<vmem>>, %arg2: memref<1x128xf32, #tpu.memory_space<vmem>>, %arg3: memref<1x128xf32, #tpu.memory_space<vmem>>, %arg4: memref<512x128xbf16, #tpu.memory_space<vmem>>) attributes {dimension_semantics = [#tpu.dimension_semantics<parallel>], iteration_bounds = array<i64: 1>, scalar_prefetch = 0 : i64, scratch_operands = 0 : i64, tpu.core_type = #tpu.core_type<tc>, window_params = [{transform_indices = @transform_0, window_bounds = array<i64: 512, 128>}, {pipeline_mode = #tpu.pipeline_mode<synchronous>, transform_indices = @transform_1, window_bounds = array<i64: 1, 128>}, {pipeline_mode = #tpu.pipeline_mode<synchronous>, transform_indices = @transform_2, window_bounds = array<i64: 1, 128>}, {transform_indices = @transform_3, window_bounds = array<i64: 512, 128>}]} {
    %c0 = arith.constant 0 : index
    %c0_0 = arith.constant 0 : index
    %0 = vector.load %arg1[%c0, %c0_0] : memref<512x128xbf16, #tpu.memory_space<vmem>>, vector<512x128xbf16>
    %1 = arith.extf %0 : vector<512x128xbf16> to vector<512x128xf32>
    %c0_1 = arith.constant 0 : index
    %c0_2 = arith.constant 0 : index
    %2 = vector.load %arg2[%c0_1, %c0_2] : memref<1x128xf32, #tpu.memory_space<vmem>>, vector<1x128xf32>
    %3 = vector.broadcast %2 : vector<1x128xf32> to vector<512x128xf32>
    %4 = arith.mulf %1, %3 : vector<512x128xf32>
    %c0_3 = arith.constant 0 : index
    %c0_4 = arith.constant 0 : index
    %5 = vector.load %arg3[%c0_3, %c0_4] : memref<1x128xf32, #tpu.memory_space<vmem>>, vector<1x128xf32>
    %6 = vector.broadcast %5 : vector<1x128xf32> to vector<512x128xf32>
    %7 = arith.addf %4, %6 : vector<512x128xf32>
    %cst = arith.constant 0.000000e+00 : f32
    %8 = vector.broadcast %cst : f32 to vector<512x128xf32>
    %9 = arith.maximumf %7, %8 : vector<512x128xf32>
    %10 = arith.truncf %9 : vector<512x128xf32> to vector<512x128xbf16>
    %c0_5 = arith.constant 0 : index
    %c0_6 = arith.constant 0 : index
    %11 = vector.load %arg4[%c0_5, %c0_6] : memref<512x128xbf16, #tpu.memory_space<vmem>>, vector<512x128xbf16>
    tpu.vector_store %arg4[%c0_5, %c0_6], %10 {strides = array<i32>} : memref<512x128xbf16, #tpu.memory_space<vmem>>, vector<512x128xbf16>,
    return
  }
  func.func @transform_0(%arg0: i32) -> (i32, i32) {
    %c0_i32 = arith.constant 0 : i32
    %c0_i32_0 = arith.constant 0 : i32
    return %arg0, %c0_i32 : i32, i32
  }
  func.func @transform_1(%arg0: i32) -> (i32, i32) {
    %c0_i32 = arith.constant 0 : i32
    %c0_i32_0 = arith.constant 0 : i32
    %c0_i32_1 = arith.constant 0 : i32
    return %c0_i32, %c0_i32_0 : i32, i32
  }
  func.func @transform_2(%arg0: i32) -> (i32, i32) {
    %c0_i32 = arith.constant 0 : i32
    %c0_i32_0 = arith.constant 0 : i32
    %c0_i32_1 = arith.constant 0 : i32
    return %c0_i32, %c0_i32_0 : i32, i32
  }
  func.func @transform_3(%arg0: i32) -> (i32, i32) {
    %c0_i32 = arith.constant 0 : i32
    %c0_i32_0 = arith.constant 0 : i32
    return %arg0, %c0_i32 : i32, i32
  }
}

module attributes {stable_mosaic.version = 11 : i64} {
  func.func @_conv3x3_stats_kernel(%arg0: i32, %arg1: i32, %arg2: memref<4x9x9x128xbf16, #tpu.memory_space<vmem>>, %arg3: memref<1152x128xbf16, #tpu.memory_space<vmem>>, %arg4: memref<1x64x128xbf16, #tpu.memory_space<vmem>>, %arg5: memref<1x1x2x128xf32, #tpu.memory_space<vmem>>) attributes {dimension_semantics = [#tpu.dimension_semantics<parallel>, #tpu.dimension_semantics<parallel>], iteration_bounds = array<i64: 2, 1>, scalar_prefetch = 0 : i64, scratch_operands = 0 : i64, tpu.core_type = #tpu.core_type<tc>, window_params = [{transform_indices = @transform_0, window_bounds = array<i64: 4, 9, 9, 128>}, {pipeline_mode = #tpu.pipeline_mode<synchronous>, transform_indices = @transform_1, window_bounds = array<i64: 1152, 128>}, {transform_indices = @transform_2, window_bounds = array<i64: 1, 64, 128>}, {transform_indices = @transform_3, window_bounds = array<i64: 1, 1, 2, 128>}]} {
    %c8_i32 = arith.constant 8 : i32
    %0 = arith.muli %arg1, %c8_i32 : i32
    %1 = tpu.assume_multiple %0, 8 : i32
    %c0_i32 = arith.constant 0 : i32
    %2 = arith.addi %1, %c0_i32 : i32
    %c0 = arith.constant 0 : index
    %3 = arith.index_cast %2 : i32 to index
    %c0_0 = arith.constant 0 : index
    %c0_1 = arith.constant 0 : index
    %4 = vector.load %arg2[%c0, %3, %c0_0, %c0_1] : memref<4x9x9x128xbf16, #tpu.memory_space<vmem>>, vector<1x8x8x128xbf16>
    %5 = vector.shape_cast %4 : vector<1x8x8x128xbf16> to vector<8x8x128xbf16>
    %c0_i32_2 = arith.constant 0 : i32
    %6 = arith.addi %1, %c0_i32_2 : i32
    %c1 = arith.constant 1 : index
    %7 = arith.index_cast %6 : i32 to index
    %c0_3 = arith.constant 0 : index
    %c0_4 = arith.constant 0 : index
    %8 = vector.load %arg2[%c1, %7, %c0_3, %c0_4] : memref<4x9x9x128xbf16, #tpu.memory_space<vmem>>, vector<1x8x8x128xbf16>
    %9 = vector.shape_cast %8 : vector<1x8x8x128xbf16> to vector<8x8x128xbf16>
    %c0_i32_5 = arith.constant 0 : i32
    %10 = arith.addi %1, %c0_i32_5 : i32
    %c0_6 = arith.constant 0 : index
    %11 = arith.index_cast %10 : i32 to index
    %c1_7 = arith.constant 1 : index
    %c0_8 = arith.constant 0 : index
    %12 = vector.load %arg2[%c0_6, %11, %c1_7, %c0_8] : memref<4x9x9x128xbf16, #tpu.memory_space<vmem>>, vector<1x8x8x128xbf16>
    %13 = vector.shape_cast %12 : vector<1x8x8x128xbf16> to vector<8x8x128xbf16>
    %c0_i32_9 = arith.constant 0 : i32
    %14 = arith.addi %1, %c0_i32_9 : i32
    %c2 = arith.constant 2 : index
    %15 = arith.index_cast %14 : i32 to index
    %c0_10 = arith.constant 0 : index
    %c0_11 = arith.constant 0 : index
    %16 = vector.load %arg2[%c2, %15, %c0_10, %c0_11] : memref<4x9x9x128xbf16, #tpu.memory_space<vmem>>, vector<1x8x8x128xbf16>
    %17 = vector.shape_cast %16 : vector<1x8x8x128xbf16> to vector<8x8x128xbf16>
    %c0_i32_12 = arith.constant 0 : i32
    %18 = arith.addi %1, %c0_i32_12 : i32
    %c3 = arith.constant 3 : index
    %19 = arith.index_cast %18 : i32 to index
    %c0_13 = arith.constant 0 : index
    %c0_14 = arith.constant 0 : index
    %20 = vector.load %arg2[%c3, %19, %c0_13, %c0_14] : memref<4x9x9x128xbf16, #tpu.memory_space<vmem>>, vector<1x8x8x128xbf16>
    %21 = vector.shape_cast %20 : vector<1x8x8x128xbf16> to vector<8x8x128xbf16>
    %c0_i32_15 = arith.constant 0 : i32
    %22 = arith.addi %1, %c0_i32_15 : i32
    %c2_16 = arith.constant 2 : index
    %23 = arith.index_cast %22 : i32 to index
    %c1_17 = arith.constant 1 : index
    %c0_18 = arith.constant 0 : index
    %24 = vector.load %arg2[%c2_16, %23, %c1_17, %c0_18] : memref<4x9x9x128xbf16, #tpu.memory_space<vmem>>, vector<1x8x8x128xbf16>
    %25 = vector.shape_cast %24 : vector<1x8x8x128xbf16> to vector<8x8x128xbf16>
    %c1_i32 = arith.constant 1 : i32
    %26 = arith.addi %1, %c1_i32 : i32
    %c0_19 = arith.constant 0 : index
    %27 = arith.index_cast %26 : i32 to index
    %c0_20 = arith.constant 0 : index
    %c0_21 = arith.constant 0 : index
    %28 = vector.load %arg2[%c0_19, %27, %c0_20, %c0_21] : memref<4x9x9x128xbf16, #tpu.memory_space<vmem>>, vector<1x8x8x128xbf16>
    %29 = vector.shape_cast %28 : vector<1x8x8x128xbf16> to vector<8x8x128xbf16>
    %c1_i32_22 = arith.constant 1 : i32
    %30 = arith.addi %1, %c1_i32_22 : i32
    %c1_23 = arith.constant 1 : index
    %31 = arith.index_cast %30 : i32 to index
    %c0_24 = arith.constant 0 : index
    %c0_25 = arith.constant 0 : index
    %32 = vector.load %arg2[%c1_23, %31, %c0_24, %c0_25] : memref<4x9x9x128xbf16, #tpu.memory_space<vmem>>, vector<1x8x8x128xbf16>
    %33 = vector.shape_cast %32 : vector<1x8x8x128xbf16> to vector<8x8x128xbf16>
    %c1_i32_26 = arith.constant 1 : i32
    %34 = arith.addi %1, %c1_i32_26 : i32
    %c0_27 = arith.constant 0 : index
    %35 = arith.index_cast %34 : i32 to index
    %c1_28 = arith.constant 1 : index
    %c0_29 = arith.constant 0 : index
    %36 = vector.load %arg2[%c0_27, %35, %c1_28, %c0_29] : memref<4x9x9x128xbf16, #tpu.memory_space<vmem>>, vector<1x8x8x128xbf16>
    %37 = vector.shape_cast %36 : vector<1x8x8x128xbf16> to vector<8x8x128xbf16>
    %38 = tpu.concatenate %5, %9, %13, %17, %21, %25, %29, %33, %37 in 2 : vector<8x8x128xbf16>, vector<8x8x128xbf16>, vector<8x8x128xbf16>, vector<8x8x128xbf16>, vector<8x8x128xbf16>, vector<8x8x128xbf16>, vector<8x8x128xbf16>, vector<8x8x128xbf16>, vector<8x8x128xbf16> -> vector<8x8x1152xbf16>
    %39 = vector.shape_cast %38 : vector<8x8x1152xbf16> to vector<64x1152xbf16>
    %c0_30 = arith.constant 0 : index
    %c0_31 = arith.constant 0 : index
    %40 = vector.load %arg3[%c0_30, %c0_31] : memref<1152x128xbf16, #tpu.memory_space<vmem>>, vector<1152x128xbf16>
    %cst = arith.constant dense<0.000000e+00> : vector<64x128xf32>
    %41 = tpu.matmul %39, %40, %cst {dimension_numbers = #tpu.dot_dimension_numbers<[1], [0], [0], [1], [0, 0, 1, 1], [], []>} : vector<64x1152xbf16>, vector<1152x128xbf16>, vector<64x128xf32> -> vector<64x128xf32>
    %42 = arith.truncf %41 : vector<64x128xf32> to vector<64x128xbf16>
    %43 = vector.shape_cast %42 : vector<64x128xbf16> to vector<1x64x128xbf16>
    %c0_32 = arith.constant 0 : index
    %c0_33 = arith.constant 0 : index
    %c0_34 = arith.constant 0 : index
    %44 = vector.load %arg4[%c0_32, %c0_33, %c0_34] : memref<1x64x128xbf16, #tpu.memory_space<vmem>>, vector<1x64x128xbf16>
    tpu.vector_store %arg4[%c0_32, %c0_33, %c0_34], %43 {strides = array<i32>} : memref<1x64x128xbf16, #tpu.memory_space<vmem>>, vector<1x64x128xbf16>,
    %45 = arith.extf %42 : vector<64x128xbf16> to vector<64x128xf32>
    %cst_35 = arith.constant dense<0.000000e+00> : vector<128xf32>
    %46 = vector.multi_reduction <add>, %45, %cst_35 [0] : vector<64x128xf32> to vector<128xf32>
    %47 = vector.shape_cast %46 : vector<128xf32> to vector<1x128xf32>
    %48 = arith.mulf %45, %45 : vector<64x128xf32>
    %cst_36 = arith.constant dense<0.000000e+00> : vector<128xf32>
    %49 = vector.multi_reduction <add>, %48, %cst_36 [0] : vector<64x128xf32> to vector<128xf32>
    %50 = vector.shape_cast %49 : vector<128xf32> to vector<1x128xf32>
    %51 = tpu.concatenate %47, %50 in 0 : vector<1x128xf32>, vector<1x128xf32> -> vector<2x128xf32>
    %52 = vector.shape_cast %51 : vector<2x128xf32> to vector<1x1x2x128xf32>
    %c0_37 = arith.constant 0 : index
    %c0_38 = arith.constant 0 : index
    %c0_39 = arith.constant 0 : index
    %c0_40 = arith.constant 0 : index
    %53 = vector.load %arg5[%c0_37, %c0_38, %c0_39, %c0_40] : memref<1x1x2x128xf32, #tpu.memory_space<vmem>>, vector<1x1x2x128xf32>
    tpu.vector_store %arg5[%c0_37, %c0_38, %c0_39, %c0_40], %52 {strides = array<i32>} : memref<1x1x2x128xf32, #tpu.memory_space<vmem>>, vector<1x1x2x128xf32>,
    return
  }
  func.func @transform_0(%arg0: i32, %arg1: i32) -> (i32, i32, i32, i32) {
    %c0_i32 = arith.constant 0 : i32
    %c0_i32_0 = arith.constant 0 : i32
    %c0_i32_1 = arith.constant 0 : i32
    %c0_i32_2 = arith.constant 0 : i32
    return %arg0, %c0_i32, %c0_i32_0, %c0_i32_1 : i32, i32, i32, i32
  }
  func.func @transform_1(%arg0: i32, %arg1: i32) -> (i32, i32) {
    %c0_i32 = arith.constant 0 : i32
    %c0_i32_0 = arith.constant 0 : i32
    %c0_i32_1 = arith.constant 0 : i32
    return %c0_i32, %c0_i32_0 : i32, i32
  }
  func.func @transform_2(%arg0: i32, %arg1: i32) -> (i32, i32, i32) {
    %c0_i32 = arith.constant 0 : i32
    %c0_i32_0 = arith.constant 0 : i32
    return %arg0, %arg1, %c0_i32 : i32, i32, i32
  }
  func.func @transform_3(%arg0: i32, %arg1: i32) -> (i32, i32, i32, i32) {
    %c0_i32 = arith.constant 0 : i32
    %c0_i32_0 = arith.constant 0 : i32
    %c0_i32_1 = arith.constant 0 : i32
    return %arg0, %arg1, %c0_i32, %c0_i32_0 : i32, i32, i32, i32
  }
}

module attributes {stable_mosaic.version = 11 : i64} {
  func.func @_bn2_add_relu_kernel(%arg0: i32, %arg1: memref<128x128xbf16, #tpu.memory_space<vmem>>, %arg2: memref<1x128xf32, #tpu.memory_space<vmem>>, %arg3: memref<1x128xf32, #tpu.memory_space<vmem>>, %arg4: memref<128x128xbf16, #tpu.memory_space<vmem>>, %arg5: memref<1x128xf32, #tpu.memory_space<vmem>>, %arg6: memref<1x128xf32, #tpu.memory_space<vmem>>, %arg7: memref<128x128xbf16, #tpu.memory_space<vmem>>) attributes {dimension_semantics = [#tpu.dimension_semantics<parallel>], iteration_bounds = array<i64: 1>, scalar_prefetch = 0 : i64, scratch_operands = 0 : i64, tpu.core_type = #tpu.core_type<tc>, window_params = [{transform_indices = @transform_0, window_bounds = array<i64: 128, 128>}, {pipeline_mode = #tpu.pipeline_mode<synchronous>, transform_indices = @transform_1, window_bounds = array<i64: 1, 128>}, {pipeline_mode = #tpu.pipeline_mode<synchronous>, transform_indices = @transform_2, window_bounds = array<i64: 1, 128>}, {transform_indices = @transform_3, window_bounds = array<i64: 128, 128>}, {pipeline_mode = #tpu.pipeline_mode<synchronous>, transform_indices = @transform_4, window_bounds = array<i64: 1, 128>}, {pipeline_mode = #tpu.pipeline_mode<synchronous>, transform_indices = @transform_5, window_bounds = array<i64: 1, 128>}, {transform_indices = @transform_6, window_bounds = array<i64: 128, 128>}]} {
    %c0 = arith.constant 0 : index
    %c0_0 = arith.constant 0 : index
    %0 = vector.load %arg1[%c0, %c0_0] : memref<128x128xbf16, #tpu.memory_space<vmem>>, vector<128x128xbf16>
    %1 = arith.extf %0 : vector<128x128xbf16> to vector<128x128xf32>
    %c0_1 = arith.constant 0 : index
    %c0_2 = arith.constant 0 : index
    %2 = vector.load %arg2[%c0_1, %c0_2] : memref<1x128xf32, #tpu.memory_space<vmem>>, vector<1x128xf32>
    %3 = vector.broadcast %2 : vector<1x128xf32> to vector<128x128xf32>
    %4 = arith.mulf %1, %3 : vector<128x128xf32>
    %c0_3 = arith.constant 0 : index
    %c0_4 = arith.constant 0 : index
    %5 = vector.load %arg3[%c0_3, %c0_4] : memref<1x128xf32, #tpu.memory_space<vmem>>, vector<1x128xf32>
    %6 = vector.broadcast %5 : vector<1x128xf32> to vector<128x128xf32>
    %7 = arith.addf %4, %6 : vector<128x128xf32>
    %c0_5 = arith.constant 0 : index
    %c0_6 = arith.constant 0 : index
    %8 = vector.load %arg4[%c0_5, %c0_6] : memref<128x128xbf16, #tpu.memory_space<vmem>>, vector<128x128xbf16>
    %9 = arith.extf %8 : vector<128x128xbf16> to vector<128x128xf32>
    %c0_7 = arith.constant 0 : index
    %c0_8 = arith.constant 0 : index
    %10 = vector.load %arg5[%c0_7, %c0_8] : memref<1x128xf32, #tpu.memory_space<vmem>>, vector<1x128xf32>
    %11 = vector.broadcast %10 : vector<1x128xf32> to vector<128x128xf32>
    %12 = arith.mulf %9, %11 : vector<128x128xf32>
    %c0_9 = arith.constant 0 : index
    %c0_10 = arith.constant 0 : index
    %13 = vector.load %arg6[%c0_9, %c0_10] : memref<1x128xf32, #tpu.memory_space<vmem>>, vector<1x128xf32>
    %14 = vector.broadcast %13 : vector<1x128xf32> to vector<128x128xf32>
    %15 = arith.addf %12, %14 : vector<128x128xf32>
    %16 = arith.addf %7, %15 : vector<128x128xf32>
    %cst = arith.constant 0.000000e+00 : f32
    %17 = vector.broadcast %cst : f32 to vector<128x128xf32>
    %18 = arith.maximumf %16, %17 : vector<128x128xf32>
    %19 = arith.truncf %18 : vector<128x128xf32> to vector<128x128xbf16>
    %c0_11 = arith.constant 0 : index
    %c0_12 = arith.constant 0 : index
    %20 = vector.load %arg7[%c0_11, %c0_12] : memref<128x128xbf16, #tpu.memory_space<vmem>>, vector<128x128xbf16>
    tpu.vector_store %arg7[%c0_11, %c0_12], %19 {strides = array<i32>} : memref<128x128xbf16, #tpu.memory_space<vmem>>, vector<128x128xbf16>,
    return
  }
  func.func @transform_0(%arg0: i32) -> (i32, i32) {
    %c0_i32 = arith.constant 0 : i32
    %c0_i32_0 = arith.constant 0 : i32
    return %arg0, %c0_i32 : i32, i32
  }
  func.func @transform_1(%arg0: i32) -> (i32, i32) {
    %c0_i32 = arith.constant 0 : i32
    %c0_i32_0 = arith.constant 0 : i32
    %c0_i32_1 = arith.constant 0 : i32
    return %c0_i32, %c0_i32_0 : i32, i32
  }
  func.func @transform_2(%arg0: i32) -> (i32, i32) {
    %c0_i32 = arith.constant 0 : i32
    %c0_i32_0 = arith.constant 0 : i32
    %c0_i32_1 = arith.constant 0 : i32
    return %c0_i32, %c0_i32_0 : i32, i32
  }
  func.func @transform_3(%arg0: i32) -> (i32, i32) {
    %c0_i32 = arith.constant 0 : i32
    %c0_i32_0 = arith.constant 0 : i32
    return %arg0, %c0_i32 : i32, i32
  }
  func.func @transform_4(%arg0: i32) -> (i32, i32) {
    %c0_i32 = arith.constant 0 : i32
    %c0_i32_0 = arith.constant 0 : i32
    %c0_i32_1 = arith.constant 0 : i32
    return %c0_i32, %c0_i32_0 : i32, i32
  }
  func.func @transform_5(%arg0: i32) -> (i32, i32) {
    %c0_i32 = arith.constant 0 : i32
    %c0_i32_0 = arith.constant 0 : i32
    %c0_i32_1 = arith.constant 0 : i32
    return %c0_i32, %c0_i32_0 : i32, i32
  }
  func.func @transform_6(%arg0: i32) -> (i32, i32) {
    %c0_i32 = arith.constant 0 : i32
    %c0_i32_0 = arith.constant 0 : i32
    return %arg0, %c0_i32 : i32, i32
  }
}

module attributes {stable_mosaic.version = 11 : i64} {
  func.func @_bnb_matmul2_stats_kernel(%arg0: i32, %arg1: memref<128x128xbf16, #tpu.memory_space<vmem>>, %arg2: memref<1x128xf32, #tpu.memory_space<vmem>>, %arg3: memref<1x128xf32, #tpu.memory_space<vmem>>, %arg4: memref<128x128xbf16, #tpu.memory_space<vmem>>, %arg5: memref<128x128xbf16, #tpu.memory_space<vmem>>, %arg6: memref<128x128xbf16, #tpu.memory_space<vmem>>, %arg7: memref<128x128xbf16, #tpu.memory_space<vmem>>, %arg8: memref<128x128xbf16, #tpu.memory_space<vmem>>, %arg9: memref<1x2x128xf32, #tpu.memory_space<vmem>>, %arg10: memref<1x2x128xf32, #tpu.memory_space<vmem>>) attributes {dimension_semantics = [#tpu.dimension_semantics<parallel>], iteration_bounds = array<i64: 1>, scalar_prefetch = 0 : i64, scratch_operands = 0 : i64, tpu.core_type = #tpu.core_type<tc>, window_params = [{transform_indices = @transform_0, window_bounds = array<i64: 128, 128>}, {pipeline_mode = #tpu.pipeline_mode<synchronous>, transform_indices = @transform_1, window_bounds = array<i64: 1, 128>}, {pipeline_mode = #tpu.pipeline_mode<synchronous>, transform_indices = @transform_2, window_bounds = array<i64: 1, 128>}, {pipeline_mode = #tpu.pipeline_mode<synchronous>, transform_indices = @transform_3, window_bounds = array<i64: 128, 128>}, {transform_indices = @transform_4, window_bounds = array<i64: 128, 128>}, {pipeline_mode = #tpu.pipeline_mode<synchronous>, transform_indices = @transform_5, window_bounds = array<i64: 128, 128>}, {transform_indices = @transform_6, window_bounds = array<i64: 128, 128>}, {transform_indices = @transform_7, window_bounds = array<i64: 128, 128>}, {transform_indices = @transform_8, window_bounds = array<i64: 1, 2, 128>}, {transform_indices = @transform_9, window_bounds = array<i64: 1, 2, 128>}]} {
    %c0 = arith.constant 0 : index
    %c0_0 = arith.constant 0 : index
    %0 = vector.load %arg1[%c0, %c0_0] : memref<128x128xbf16, #tpu.memory_space<vmem>>, vector<128x128xbf16>
    %1 = arith.extf %0 : vector<128x128xbf16> to vector<128x128xf32>
    %c0_1 = arith.constant 0 : index
    %c0_2 = arith.constant 0 : index
    %2 = vector.load %arg2[%c0_1, %c0_2] : memref<1x128xf32, #tpu.memory_space<vmem>>, vector<1x128xf32>
    %3 = vector.broadcast %2 : vector<1x128xf32> to vector<128x128xf32>
    %4 = arith.mulf %1, %3 : vector<128x128xf32>
    %c0_3 = arith.constant 0 : index
    %c0_4 = arith.constant 0 : index
    %5 = vector.load %arg3[%c0_3, %c0_4] : memref<1x128xf32, #tpu.memory_space<vmem>>, vector<1x128xf32>
    %6 = vector.broadcast %5 : vector<1x128xf32> to vector<128x128xf32>
    %7 = arith.addf %4, %6 : vector<128x128xf32>
    %cst = arith.constant 0.000000e+00 : f32
    %8 = vector.broadcast %cst : f32 to vector<128x128xf32>
    %9 = arith.maximumf %7, %8 : vector<128x128xf32>
    %10 = arith.truncf %9 : vector<128x128xf32> to vector<128x128xbf16>
    %c0_5 = arith.constant 0 : index
    %c0_6 = arith.constant 0 : index
    %11 = vector.load %arg4[%c0_5, %c0_6] : memref<128x128xbf16, #tpu.memory_space<vmem>>, vector<128x128xbf16>
    %cst_7 = arith.constant dense<0.000000e+00> : vector<128x128xf32>
    %12 = tpu.matmul %10, %11, %cst_7 {dimension_numbers = #tpu.dot_dimension_numbers<[1], [0], [0], [1], [0, 0, 1, 1], [], []>} : vector<128x128xbf16>, vector<128x128xbf16>, vector<128x128xf32> -> vector<128x128xf32>
    %c0_8 = arith.constant 0 : index
    %c0_9 = arith.constant 0 : index
    %13 = vector.load %arg5[%c0_8, %c0_9] : memref<128x128xbf16, #tpu.memory_space<vmem>>, vector<128x128xbf16>
    %c0_10 = arith.constant 0 : index
    %c0_11 = arith.constant 0 : index
    %14 = vector.load %arg6[%c0_10, %c0_11] : memref<128x128xbf16, #tpu.memory_space<vmem>>, vector<128x128xbf16>
    %cst_12 = arith.constant dense<0.000000e+00> : vector<128x128xf32>
    %15 = tpu.matmul %13, %14, %cst_12 {dimension_numbers = #tpu.dot_dimension_numbers<[1], [0], [0], [1], [0, 0, 1, 1], [], []>} : vector<128x128xbf16>, vector<128x128xbf16>, vector<128x128xf32> -> vector<128x128xf32>
    %16 = arith.truncf %12 : vector<128x128xf32> to vector<128x128xbf16>
    %17 = arith.truncf %15 : vector<128x128xf32> to vector<128x128xbf16>
    %c0_13 = arith.constant 0 : index
    %c0_14 = arith.constant 0 : index
    %18 = vector.load %arg7[%c0_13, %c0_14] : memref<128x128xbf16, #tpu.memory_space<vmem>>, vector<128x128xbf16>
    tpu.vector_store %arg7[%c0_13, %c0_14], %16 {strides = array<i32>} : memref<128x128xbf16, #tpu.memory_space<vmem>>, vector<128x128xbf16>,
    %c0_15 = arith.constant 0 : index
    %c0_16 = arith.constant 0 : index
    %19 = vector.load %arg8[%c0_15, %c0_16] : memref<128x128xbf16, #tpu.memory_space<vmem>>, vector<128x128xbf16>
    tpu.vector_store %arg8[%c0_15, %c0_16], %17 {strides = array<i32>} : memref<128x128xbf16, #tpu.memory_space<vmem>>, vector<128x128xbf16>,
    %20 = arith.extf %16 : vector<128x128xbf16> to vector<128x128xf32>
    %cst_17 = arith.constant dense<0.000000e+00> : vector<128xf32>
    %21 = vector.multi_reduction <add>, %20, %cst_17 [0] : vector<128x128xf32> to vector<128xf32>
    %22 = vector.shape_cast %21 : vector<128xf32> to vector<1x128xf32>
    %23 = arith.mulf %20, %20 : vector<128x128xf32>
    %cst_18 = arith.constant dense<0.000000e+00> : vector<128xf32>
    %24 = vector.multi_reduction <add>, %23, %cst_18 [0] : vector<128x128xf32> to vector<128xf32>
    %25 = vector.shape_cast %24 : vector<128xf32> to vector<1x128xf32>
    %26 = tpu.concatenate %22, %25 in 0 : vector<1x128xf32>, vector<1x128xf32> -> vector<2x128xf32>
    %27 = vector.shape_cast %26 : vector<2x128xf32> to vector<1x2x128xf32>
    %c0_19 = arith.constant 0 : index
    %c0_20 = arith.constant 0 : index
    %c0_21 = arith.constant 0 : index
    %28 = vector.load %arg9[%c0_19, %c0_20, %c0_21] : memref<1x2x128xf32, #tpu.memory_space<vmem>>, vector<1x2x128xf32>
    tpu.vector_store %arg9[%c0_19, %c0_20, %c0_21], %27 {strides = array<i32>} : memref<1x2x128xf32, #tpu.memory_space<vmem>>, vector<1x2x128xf32>,
    %29 = arith.extf %17 : vector<128x128xbf16> to vector<128x128xf32>
    %cst_22 = arith.constant dense<0.000000e+00> : vector<128xf32>
    %30 = vector.multi_reduction <add>, %29, %cst_22 [0] : vector<128x128xf32> to vector<128xf32>
    %31 = vector.shape_cast %30 : vector<128xf32> to vector<1x128xf32>
    %32 = arith.mulf %29, %29 : vector<128x128xf32>
    %cst_23 = arith.constant dense<0.000000e+00> : vector<128xf32>
    %33 = vector.multi_reduction <add>, %32, %cst_23 [0] : vector<128x128xf32> to vector<128xf32>
    %34 = vector.shape_cast %33 : vector<128xf32> to vector<1x128xf32>
    %35 = tpu.concatenate %31, %34 in 0 : vector<1x128xf32>, vector<1x128xf32> -> vector<2x128xf32>
    %36 = vector.shape_cast %35 : vector<2x128xf32> to vector<1x2x128xf32>
    %c0_24 = arith.constant 0 : index
    %c0_25 = arith.constant 0 : index
    %c0_26 = arith.constant 0 : index
    %37 = vector.load %arg10[%c0_24, %c0_25, %c0_26] : memref<1x2x128xf32, #tpu.memory_space<vmem>>, vector<1x2x128xf32>
    tpu.vector_store %arg10[%c0_24, %c0_25, %c0_26], %36 {strides = array<i32>} : memref<1x2x128xf32, #tpu.memory_space<vmem>>, vector<1x2x128xf32>,
    return
  }
  func.func @transform_0(%arg0: i32) -> (i32, i32) {
    %c0_i32 = arith.constant 0 : i32
    %c0_i32_0 = arith.constant 0 : i32
    return %arg0, %c0_i32 : i32, i32
  }
  func.func @transform_1(%arg0: i32) -> (i32, i32) {
    %c0_i32 = arith.constant 0 : i32
    %c0_i32_0 = arith.constant 0 : i32
    %c0_i32_1 = arith.constant 0 : i32
    return %c0_i32, %c0_i32_0 : i32, i32
  }
  func.func @transform_2(%arg0: i32) -> (i32, i32) {
    %c0_i32 = arith.constant 0 : i32
    %c0_i32_0 = arith.constant 0 : i32
    %c0_i32_1 = arith.constant 0 : i32
    return %c0_i32, %c0_i32_0 : i32, i32
  }
  func.func @transform_3(%arg0: i32) -> (i32, i32) {
    %c0_i32 = arith.constant 0 : i32
    %c0_i32_0 = arith.constant 0 : i32
    %c0_i32_1 = arith.constant 0 : i32
    return %c0_i32, %c0_i32_0 : i32, i32
  }
  func.func @transform_4(%arg0: i32) -> (i32, i32) {
    %c0_i32 = arith.constant 0 : i32
    %c0_i32_0 = arith.constant 0 : i32
    return %arg0, %c0_i32 : i32, i32
  }
  func.func @transform_5(%arg0: i32) -> (i32, i32) {
    %c0_i32 = arith.constant 0 : i32
    %c0_i32_0 = arith.constant 0 : i32
    %c0_i32_1 = arith.constant 0 : i32
    return %c0_i32, %c0_i32_0 : i32, i32
  }
  func.func @transform_6(%arg0: i32) -> (i32, i32) {
    %c0_i32 = arith.constant 0 : i32
    %c0_i32_0 = arith.constant 0 : i32
    return %arg0, %c0_i32 : i32, i32
  }
  func.func @transform_7(%arg0: i32) -> (i32, i32) {
    %c0_i32 = arith.constant 0 : i32
    %c0_i32_0 = arith.constant 0 : i32
    return %arg0, %c0_i32 : i32, i32
  }
  func.func @transform_8(%arg0: i32) -> (i32, i32, i32) {
    %c0_i32 = arith.constant 0 : i32
    %c0_i32_0 = arith.constant 0 : i32
    %c0_i32_1 = arith.constant 0 : i32
    return %arg0, %c0_i32, %c0_i32_0 : i32, i32, i32
  }
  func.func @transform_9(%arg0: i32) -> (i32, i32, i32) {
    %c0_i32 = arith.constant 0 : i32
    %c0_i32_0 = arith.constant 0 : i32
    %c0_i32_1 = arith.constant 0 : i32
    return %arg0, %c0_i32, %c0_i32_0 : i32, i32, i32
  }
}

</mosaic_0001>

<bundles_post_ra>
// kernel: res_block_forward.6
= control target key start
LH: loop header
LB: loop body
LE: loop exit
PB: predicated region body
PF: predicated region fallthrough
CT: control target
= control target key end

     0   :  { %s1502_s0 = inlined_call_operand.vmem [shape: bf16[512,128], index: 0, kind: input, shape index: {}]   ;;  %s1503_s1 = inlined_call_operand.vmem [shape: f32[1,128], index: 1, kind: input, shape index: {}]   ;;  %s1504_s2 = inlined_call_operand.vmem [shape: f32[1,128], index: 2, kind: input, shape index: {}]   ;;  %s1505_s3 = inlined_call_operand.vmem [shape: bf16[512,128], index: 3, kind: output, shape index: {}]  }
   0x1   :  { %v803_v0 = vld [vmem:[%s1502_s0] sm:$0xff]   ;;  %v1090_v4 = vld [vmem:[%s1502_s0 + $0x8] sm:$0xff]   ;;  %v1091_v5 = vld [vmem:[%s1502_s0 + $0x10] sm:$0xff]  }
   0x2   :  { %v1178_v1 = vld [vmem:[%s1503_s1] ss:$0 sm:$0xff]  ;;  %v804_v2 = vunpack.c.l.bf16 %v803_v0  ;;  %v805_v3 = vunpack.c.h.bf16 %v803_v0  ;;  %v1092_v6 = vld [vmem:[%s1502_s0 + $0x18] sm:$0xff]   ;;  %v808_v8 = vunpack.c.l.bf16 %v1090_v4  ;;  %v809_v9 = vunpack.c.h.bf16 %v1090_v4  ;;  %v1094_v33 = vld [vmem:[%s1502_s0 + $0x28] sm:$0xff]  }
   0x3   :  { %v1192_v7 = vld [vmem:[%s1504_s2] ss:$0 sm:$0xff]  ;;  %v812_v10 = vunpack.c.l.bf16 %v1091_v5  ;;  %v813_v11 = vunpack.c.h.bf16 %v1091_v5  ;;  %v816_v14 = vunpack.c.l.bf16 %v1092_v6  ;;  %v817_v15 = vunpack.c.h.bf16 %v1092_v6  ;;  %v1095_v38 = vld [vmem:[%s1502_s0 + $0x30] sm:$0xff]   ;;  %v1096_v43 = vld [vmem:[%s1502_s0 + $0x38] sm:$0xff]  }
   0x4   :  { %v149_v12 = vmul.f32 %v804_v2, %v1178_v1  ;;  %v150_v13 = vmul.f32 %v805_v3, %v1178_v1  ;;  %v151_v16 = vmul.f32 %v808_v8, %v1178_v1  ;;  %v152_v17 = vmul.f32 %v809_v9, %v1178_v1  ;;  %v1093_v28 = vld [vmem:[%s1502_s0 + $0x20] sm:$0xff]  }
   0x5   :  { %v153_v18 = vmul.f32 %v812_v10, %v1178_v1  ;;  %v154_v19 = vmul.f32 %v813_v11, %v1178_v1  ;;  %v155_v22 = vmul.f32 %v816_v14, %v1178_v1  ;;  %v156_v23 = vmul.f32 %v817_v15, %v1178_v1  ;;  %v1097_v0 = vld [vmem:[%s1502_s0 + $0x40] sm:$0xff]   ;;  %v1098_v11 = vld [vmem:[%s1502_s0 + $0x48] sm:$0xff]  }
   0x6   :  { %v220_v20 = vadd.f32 %v1192_v7, %v149_v12  ;;  %v221_v21 = vadd.f32 %v1192_v7, %v150_v13  ;;  %v222_v24 = vadd.f32 %v1192_v7, %v151_v16  ;;  %v223_v25 = vadd.f32 %v1192_v7, %v152_v17  ;;  %v1099_v16 = vld [vmem:[%s1502_s0 + $0x50] sm:$0xff]  }
   0x7   :  { %v224_v26 = vadd.f32 %v1192_v7, %v153_v18  ;;  %v225_v27 = vadd.f32 %v1192_v7, %v154_v19  ;;  %v226_v31 = vadd.f32 %v1192_v7, %v155_v22  ;;  %v227_v32 = vadd.f32 %v1192_v7, %v156_v23 }
   0x8   :  { %v284_v29 = vmax.f32 %v220_v20, 0.0  ;;  %v285_v30 = vmax.f32 %v221_v21, 0.0  ;;  %v286_v34 = vmax.f32 %v222_v24, 0.0  ;;  %v287_v35 = vmax.f32 %v223_v25, 0.0  ;;  %v1100_v25 = vld [vmem:[%s1502_s0 + $0x58] sm:$0xff]  }
   0x9   :  { %v288_v36 = vmax.f32 %v224_v26, 0.0  ;;  %v289_v37 = vmax.f32 %v225_v27, 0.0  ;;  %v290_v40 = vmax.f32 %v226_v31, 0.0  ;;  %v291_v41 = vmax.f32 %v227_v32, 0.0 }
   0xa   :  { %v933_v39 = vpack.c.bf16 %v285_v30, %v284_v29  ;;  %v820_v42 = vunpack.c.l.bf16 %v1093_v28  ;;  %v938_v44 = vpack.c.bf16 %v287_v35, %v286_v34  ;;  %v821_v46 = vunpack.c.h.bf16 %v1093_v28 }
   0xb   :  { %v943_v45 = vpack.c.bf16 %v289_v37, %v288_v36  ;;  %v824_v47 = vunpack.c.l.bf16 %v1094_v33  ;;  %v948_v48 = vpack.c.bf16 %v291_v41, %v290_v40  ;;  %v825_v50 = vunpack.c.h.bf16 %v1094_v33 }
   0xc   :  { %934 = vst [vmem:[%s1505_s3] sm:$0xff] %v933_v39   ;;  %v157_v49 = vmul.f32 %v820_v42, %v1178_v1  ;;  %v828_v51 = vunpack.c.l.bf16 %v1095_v38  ;;  %1121 = vst [vmem:[%s1505_s3 + $0x8] sm:$0xff] %v938_v44   ;;  %v158_v52 = vmul.f32 %v821_v46, %v1178_v1  ;;  %v829_v54 = vunpack.c.h.bf16 %v1095_v38  ;;  %v1101_v38 = vld [vmem:[%s1502_s0 + $0x60] sm:$0xff]  }
   0xd   :  { %1122 = vst [vmem:[%s1505_s3 + $0x10] sm:$0xff] %v943_v45   ;;  %v159_v53 = vmul.f32 %v824_v47, %v1178_v1  ;;  %v832_v55 = vunpack.c.l.bf16 %v1096_v43  ;;  %1123 = vst [vmem:[%s1505_s3 + $0x18] sm:$0xff] %v948_v48   ;;  %v160_v57 = vmul.f32 %v825_v50, %v1178_v1  ;;  %v833_v59 = vunpack.c.h.bf16 %v1096_v43 }
   0xe   :  { %v228_v56 = vadd.f32 %v1192_v7, %v157_v49  ;;  %v161_v58 = vmul.f32 %v828_v51, %v1178_v1  ;;  %v229_v60 = vadd.f32 %v1192_v7, %v158_v52  ;;  %v162_v62 = vmul.f32 %v829_v54, %v1178_v1  ;;  %v1102_v51 = vld [vmem:[%s1502_s0 + $0x68] sm:$0xff]  }
   0xf   :  { %v230_v61 = vadd.f32 %v1192_v7, %v159_v53  ;;  %v163_v63 = vmul.f32 %v832_v55, %v1178_v1  ;;  %v231_v3 = vadd.f32 %v1192_v7, %v160_v57  ;;  %v164_v5 = vmul.f32 %v833_v59, %v1178_v1 }
  0x10   :  { %v292_v2 = vmax.f32 %v228_v56, 0.0  ;;  %v232_v4 = vadd.f32 %v1192_v7, %v161_v58  ;;  %v293_v6 = vmax.f32 %v229_v60, 0.0  ;;  %v233_v9 = vadd.f32 %v1192_v7, %v162_v62  ;;  %v1103_v60 = vld [vmem:[%s1502_s0 + $0x70] sm:$0xff]  }
  0x11   :  { %v294_v8 = vmax.f32 %v230_v61, 0.0  ;;  %v234_v10 = vadd.f32 %v1192_v7, %v163_v63  ;;  %v295_v12 = vmax.f32 %v231_v3, 0.0  ;;  %v235_v14 = vadd.f32 %v1192_v7, %v164_v5 }
  0x12   :  { %v296_v13 = vmax.f32 %v232_v4, 0.0  ;;  %v836_v15 = vunpack.c.l.bf16 %v1097_v0  ;;  %v953_v17 = vpack.c.bf16 %v293_v6, %v292_v2  ;;  %v297_v18 = vmax.f32 %v233_v9, 0.0  ;;  %v1104_v2 = vld [vmem:[%s1502_s0 + $0x78] sm:$0xff]  }
  0x13   :  { %v298_v19 = vmax.f32 %v234_v10, 0.0  ;;  %v837_v20 = vunpack.c.h.bf16 %v1097_v0  ;;  %v958_v21 = vpack.c.bf16 %v295_v12, %v294_v8  ;;  %v299_v22 = vmax.f32 %v235_v14, 0.0  ;;  %v1105_v12 = vld [vmem:[%s1502_s0 + $0x80] sm:$0xff]  }
  0x14   :  { %v165_v23 = vmul.f32 %v836_v15, %v1178_v1  ;;  %v840_v24 = vunpack.c.l.bf16 %v1098_v11  ;;  %1124 = vst [vmem:[%s1505_s3 + $0x20] sm:$0xff] %v953_v17   ;;  %v963_v26 = vpack.c.bf16 %v297_v18, %v296_v13  ;;  %v841_v28 = vunpack.c.h.bf16 %v1098_v11 }
  0x15   :  { %v166_v27 = vmul.f32 %v837_v20, %v1178_v1  ;;  %v844_v29 = vunpack.c.l.bf16 %v1099_v16  ;;  %1125 = vst [vmem:[%s1505_s3 + $0x28] sm:$0xff] %v958_v21   ;;  %v968_v30 = vpack.c.bf16 %v299_v22, %v298_v19  ;;  %v845_v33 = vunpack.c.h.bf16 %v1099_v16 }
  0x16   :  { %v236_v31 = vadd.f32 %v1192_v7, %v165_v23  ;;  %v167_v32 = vmul.f32 %v840_v24, %v1178_v1  ;;  %1126 = vst [vmem:[%s1505_s3 + $0x30] sm:$0xff] %v963_v26   ;;  %v168_v35 = vmul.f32 %v841_v28, %v1178_v1  ;;  %v848_v37 = vunpack.c.l.bf16 %v1100_v25 }
  0x17   :  { %v237_v34 = vadd.f32 %v1192_v7, %v166_v27  ;;  %v169_v36 = vmul.f32 %v844_v29, %v1178_v1  ;;  %1127 = vst [vmem:[%s1505_s3 + $0x38] sm:$0xff] %v968_v30   ;;  %v170_v41 = vmul.f32 %v845_v33, %v1178_v1  ;;  %v849_v42 = vunpack.c.h.bf16 %v1100_v25  ;;  %v1106_v29 = vld [vmem:[%s1502_s0 + $0x88] sm:$0xff]  }
  0x18   :  { %v300_v39 = vmax.f32 %v236_v31, 0.0  ;;  %v238_v40 = vadd.f32 %v1192_v7, %v167_v32  ;;  %v239_v44 = vadd.f32 %v1192_v7, %v168_v35  ;;  %v171_v46 = vmul.f32 %v848_v37, %v1178_v1 }
  0x19   :  { %v301_v43 = vmax.f32 %v237_v34, 0.0  ;;  %v240_v45 = vadd.f32 %v1192_v7, %v169_v36  ;;  %v241_v48 = vadd.f32 %v1192_v7, %v170_v41  ;;  %v172_v49 = vmul.f32 %v849_v42, %v1178_v1  ;;  %v1107_v34 = vld [vmem:[%s1502_s0 + $0x90] sm:$0xff]  }
  0x1a   :  { %v302_v47 = vmax.f32 %v238_v40, 0.0  ;;  %v852_v50 = vunpack.c.l.bf16 %v1101_v38  ;;  %v303_v53 = vmax.f32 %v239_v44, 0.0  ;;  %v242_v55 = vadd.f32 %v1192_v7, %v171_v46 }
  0x1b   :  { %v973_v52 = vpack.c.bf16 %v301_v43, %v300_v39  ;;  %v304_v54 = vmax.f32 %v240_v45, 0.0  ;;  %v305_v56 = vmax.f32 %v241_v48, 0.0  ;;  %v243_v57 = vadd.f32 %v1192_v7, %v172_v49  ;;  %v1108_v43 = vld [vmem:[%s1502_s0 + $0x98] sm:$0xff]  }
  0x1c   :  { %v853_v58 = vunpack.c.h.bf16 %v1101_v38  ;;  %v173_v59 = vmul.f32 %v852_v50, %v1178_v1  ;;  %v978_v61 = vpack.c.bf16 %v303_v53, %v302_v47  ;;  %v306_v62 = vmax.f32 %v242_v55, 0.0 }
  0x1d   :  { %1128 = vst [vmem:[%s1505_s3 + $0x40] sm:$0xff] %v973_v52   ;;  %v856_v63 = vunpack.c.l.bf16 %v1102_v51  ;;  %v857_v0 = vunpack.c.h.bf16 %v1102_v51  ;;  %v983_v3 = vpack.c.bf16 %v305_v56, %v304_v54  ;;  %v307_v4 = vmax.f32 %v243_v57, 0.0  ;;  %v1109_v56 = vld [vmem:[%s1502_s0 + $0xa0] sm:$0xff]  }
  0x1e   :  { %v174_v5 = vmul.f32 %v853_v58, %v1178_v1  ;;  %v244_v6 = vadd.f32 %v1192_v7, %v173_v59  ;;  %1129 = vst [vmem:[%s1505_s3 + $0x48] sm:$0xff] %v978_v61   ;;  %v860_v10 = vunpack.c.l.bf16 %v1103_v60  ;;  %v861_v11 = vunpack.c.h.bf16 %v1103_v60 }
  0x1f   :  { %v175_v8 = vmul.f32 %v856_v63, %v1178_v1  ;;  %v176_v9 = vmul.f32 %v857_v0, %v1178_v1  ;;  %1130 = vst [vmem:[%s1505_s3 + $0x50] sm:$0xff] %v983_v3   ;;  %v988_v13 = vpack.c.bf16 %v307_v4, %v306_v62  ;;  %v864_v16 = vunpack.c.l.bf16 %v1104_v2 }
  0x20   :  { %v245_v14 = vadd.f32 %v1192_v7, %v174_v5  ;;  %v308_v15 = vmax.f32 %v244_v6, 0.0  ;;  %v177_v19 = vmul.f32 %v860_v10, %v1178_v1  ;;  %v178_v20 = vmul.f32 %v861_v11, %v1178_v1 }
  0x21   :  { %v246_v17 = vadd.f32 %v1192_v7, %v175_v8  ;;  %v247_v18 = vadd.f32 %v1192_v7, %v176_v9  ;;  %1131 = vst [vmem:[%s1505_s3 + $0x58] sm:$0xff] %v988_v13   ;;  %v865_v22 = vunpack.c.h.bf16 %v1104_v2  ;;  %v179_v23 = vmul.f32 %v864_v16, %v1178_v1  ;;  %v1110_v2 = vld [vmem:[%s1502_s0 + $0xa8] sm:$0xff]   ;;  %v1111_v16 = vld [vmem:[%s1502_s0 + $0xb0] sm:$0xff]  }
  0x22   :  { %v309_v21 = vmax.f32 %v245_v14, 0.0  ;;  %v868_v24 = vunpack.c.l.bf16 %v1105_v12  ;;  %v248_v27 = vadd.f32 %v1192_v7, %v177_v19  ;;  %v249_v28 = vadd.f32 %v1192_v7, %v178_v20 }
  0x23   :  { %v310_v25 = vmax.f32 %v246_v17, 0.0  ;;  %v311_v26 = vmax.f32 %v247_v18, 0.0  ;;  %v180_v31 = vmul.f32 %v865_v22, %v1178_v1  ;;  %v250_v32 = vadd.f32 %v1192_v7, %v179_v23 }
  0x24   :  { %v993_v30 = vpack.c.bf16 %v309_v21, %v308_v15  ;;  %v869_v33 = vunpack.c.h.bf16 %v1105_v12  ;;  %v312_v36 = vmax.f32 %v248_v27, 0.0  ;;  %v313_v37 = vmax.f32 %v249_v28, 0.0  ;;  %v1112_v21 = vld [vmem:[%s1502_s0 + $0xb8] sm:$0xff]  }
  0x25   :  { %v998_v35 = vpack.c.bf16 %v311_v26, %v310_v25  ;;  %v181_v38 = vmul.f32 %v868_v24, %v1178_v1  ;;  %v251_v39 = vadd.f32 %v1192_v7, %v180_v31  ;;  %v314_v40 = vmax.f32 %v250_v32, 0.0 }
  0x26   :  { %1132 = vst [vmem:[%s1505_s3 + $0x60] sm:$0xff] %v993_v30   ;;  %v182_v41 = vmul.f32 %v869_v33, %v1178_v1  ;;  %v872_v42 = vunpack.c.l.bf16 %v1106_v29  ;;  %v1003_v44 = vpack.c.bf16 %v313_v37, %v312_v36  ;;  %v873_v46 = vunpack.c.h.bf16 %v1106_v29 }
  0x27   :  { %1133 = vst [vmem:[%s1505_s3 + $0x68] sm:$0xff] %v998_v35   ;;  %v252_v45 = vadd.f32 %v1192_v7, %v181_v38  ;;  %v876_v47 = vunpack.c.l.bf16 %v1107_v34  ;;  %v315_v48 = vmax.f32 %v251_v39, 0.0  ;;  %v877_v51 = vunpack.c.h.bf16 %v1107_v34  ;;  %v1113_v34 = vld [vmem:[%s1502_s0 + $0xc0] sm:$0xff]  }
  0x28   :  { %v253_v49 = vadd.f32 %v1192_v7, %v182_v41  ;;  %v183_v50 = vmul.f32 %v872_v42, %v1178_v1  ;;  %1134 = vst [vmem:[%s1505_s3 + $0x70] sm:$0xff] %v1003_v44   ;;  %v184_v53 = vmul.f32 %v873_v46, %v1178_v1  ;;  %v880_v55 = vunpack.c.l.bf16 %v1108_v43 }
  0x29   :  { %v316_v52 = vmax.f32 %v252_v45, 0.0  ;;  %v185_v54 = vmul.f32 %v876_v47, %v1178_v1  ;;  %v1008_v57 = vpack.c.bf16 %v315_v48, %v314_v40  ;;  %v186_v60 = vmul.f32 %v877_v51, %v1178_v1  ;;  %v1114_v47 = vld [vmem:[%s1502_s0 + $0xc8] sm:$0xff]  }
  0x2a   :  { %v317_v58 = vmax.f32 %v253_v49, 0.0  ;;  %v254_v59 = vadd.f32 %v1192_v7, %v183_v50  ;;  %v255_v61 = vadd.f32 %v1192_v7, %v184_v53  ;;  %v881_v63 = vunpack.c.h.bf16 %v1108_v43 }
  0x2b   :  { %v256_v62 = vadd.f32 %v1192_v7, %v185_v54  ;;  %v187_v0 = vmul.f32 %v880_v55, %v1178_v1  ;;  %1135 = vst [vmem:[%s1505_s3 + $0x78] sm:$0xff] %v1008_v57   ;;  %v257_v5 = vadd.f32 %v1192_v7, %v186_v60  ;;  %v884_v6 = vunpack.c.l.bf16 %v1109_v56 }
  0x2c   :  { %v1013_v3 = vpack.c.bf16 %v317_v58, %v316_v52  ;;  %v318_v4 = vmax.f32 %v254_v59, 0.0  ;;  %v319_v8 = vmax.f32 %v255_v61, 0.0  ;;  %v188_v10 = vmul.f32 %v881_v63, %v1178_v1  ;;  %v1115_v52 = vld [vmem:[%s1502_s0 + $0xd0] sm:$0xff]   ;;  %v1116_v61 = vld [vmem:[%s1502_s0 + $0xd8] sm:$0xff]  }
  0x2d   :  { %v320_v9 = vmax.f32 %v256_v62, 0.0  ;;  %v258_v11 = vadd.f32 %v1192_v7, %v187_v0  ;;  %v321_v12 = vmax.f32 %v257_v5, 0.0  ;;  %v885_v13 = vunpack.c.h.bf16 %v1109_v56 }
  0x2e   :  { %1136 = vst [vmem:[%s1505_s3 + $0x80] sm:$0xff] %v1013_v3   ;;  %v189_v14 = vmul.f32 %v884_v6, %v1178_v1  ;;  %v888_v15 = vunpack.c.l.bf16 %v1110_v2  ;;  %v1018_v17 = vpack.c.bf16 %v319_v8, %v318_v4  ;;  %v259_v18 = vadd.f32 %v1192_v7, %v188_v10 }
  0x2f   :  { %v322_v19 = vmax.f32 %v258_v11, 0.0  ;;  %v889_v20 = vunpack.c.h.bf16 %v1110_v2  ;;  %v1023_v22 = vpack.c.bf16 %v321_v12, %v320_v9  ;;  %v190_v23 = vmul.f32 %v885_v13, %v1178_v1  ;;  %v1117_v12 = vld [vmem:[%s1502_s0 + $0xe0] sm:$0xff]  }
  0x30   :  { %v260_v24 = vadd.f32 %v1192_v7, %v189_v14  ;;  %v191_v25 = vmul.f32 %v888_v15, %v1178_v1  ;;  %1137 = vst [vmem:[%s1505_s3 + $0x88] sm:$0xff] %v1018_v17   ;;  %v323_v26 = vmax.f32 %v259_v18, 0.0  ;;  %v892_v28 = vunpack.c.l.bf16 %v1111_v16 }
  0x31   :  { %v192_v27 = vmul.f32 %v889_v20, %v1178_v1  ;;  %v893_v29 = vunpack.c.h.bf16 %v1111_v16  ;;  %1138 = vst [vmem:[%s1505_s3 + $0x90] sm:$0xff] %v1023_v22   ;;  %v261_v30 = vadd.f32 %v1192_v7, %v190_v23  ;;  %v896_v33 = vunpack.c.l.bf16 %v1112_v21 }
  0x32   :  { %v324_v31 = vmax.f32 %v260_v24, 0.0  ;;  %v262_v32 = vadd.f32 %v1192_v7, %v191_v25  ;;  %v1028_v35 = vpack.c.bf16 %v323_v26, %v322_v19  ;;  %v193_v37 = vmul.f32 %v892_v28, %v1178_v1 }
  0x33   :  { %v263_v36 = vadd.f32 %v1192_v7, %v192_v27  ;;  %v194_v38 = vmul.f32 %v893_v29, %v1178_v1  ;;  %v325_v39 = vmax.f32 %v261_v30, 0.0  ;;  %v897_v41 = vunpack.c.h.bf16 %v1112_v21  ;;  %v1118_v21 = vld [vmem:[%s1502_s0 + $0xe8] sm:$0xff]  }
  0x34   :  { %v326_v40 = vmax.f32 %v262_v32, 0.0  ;;  %v195_v42 = vmul.f32 %v896_v33, %v1178_v1  ;;  %1139 = vst [vmem:[%s1505_s3 + $0x98] sm:$0xff] %v1028_v35   ;;  %v264_v44 = vadd.f32 %v1192_v7, %v193_v37  ;;  %v900_v46 = vunpack.c.l.bf16 %v1113_v34 }
  0x35   :  { %v327_v43 = vmax.f32 %v263_v36, 0.0  ;;  %v265_v45 = vadd.f32 %v1192_v7, %v194_v38  ;;  %v1033_v48 = vpack.c.bf16 %v325_v39, %v324_v31  ;;  %v196_v49 = vmul.f32 %v897_v41, %v1178_v1  ;;  %v1120_v39 = vld [vmem:[%s1502_s0 + $0xf8] sm:$0xff]  }
  0x36   :  { %v266_v50 = vadd.f32 %v1192_v7, %v195_v42  ;;  %v901_v51 = vunpack.c.h.bf16 %v1113_v34  ;;  %v328_v54 = vmax.f32 %v264_v44, 0.0  ;;  %v197_v56 = vmul.f32 %v900_v46, %v1178_v1  ;;  %v1119_v34 = vld [vmem:[%s1502_s0 + $0xf0] sm:$0xff]  }
  0x37   :  { %v1038_v53 = vpack.c.bf16 %v327_v43, %v326_v40  ;;  %v329_v55 = vmax.f32 %v265_v45, 0.0  ;;  %1140 = vst [vmem:[%s1505_s3 + $0xa0] sm:$0xff] %v1033_v48   ;;  %v267_v57 = vadd.f32 %v1192_v7, %v196_v49  ;;  %v904_v60 = vunpack.c.l.bf16 %v1114_v47 }
  0x38   :  { %v330_v58 = vmax.f32 %v266_v50, 0.0  ;;  %v198_v59 = vmul.f32 %v901_v51, %v1178_v1  ;;  %v268_v63 = vadd.f32 %v1192_v7, %v197_v56  ;;  %v905_v0 = vunpack.c.h.bf16 %v1114_v47 }
  0x39   :  { %1141 = vst [vmem:[%s1505_s3 + $0xa8] sm:$0xff] %v1038_v53   ;;  %v1043_v62 = vpack.c.bf16 %v329_v55, %v328_v54  ;;  %v908_v2 = vunpack.c.l.bf16 %v1115_v52  ;;  %v331_v3 = vmax.f32 %v267_v57, 0.0  ;;  %v199_v5 = vmul.f32 %v904_v60, %v1178_v1 }
  0x3a   :  { %v269_v4 = vadd.f32 %v1192_v7, %v198_v59  ;;  %v909_v6 = vunpack.c.h.bf16 %v1115_v52  ;;  %v332_v8 = vmax.f32 %v268_v63, 0.0  ;;  %v200_v9 = vmul.f32 %v905_v0, %v1178_v1 }
  0x3b   :  { %1142 = vst [vmem:[%s1505_s3 + $0xb0] sm:$0xff] %v1043_v62   ;;  %v201_v10 = vmul.f32 %v908_v2, %v1178_v1  ;;  %v912_v11 = vunpack.c.l.bf16 %v1116_v61  ;;  %v1048_v13 = vpack.c.bf16 %v331_v3, %v330_v58  ;;  %v270_v15 = vadd.f32 %v1192_v7, %v199_v5 }
  0x3c   :  { %v333_v14 = vmax.f32 %v269_v4, 0.0  ;;  %v202_v16 = vmul.f32 %v909_v6, %v1178_v1  ;;  %v271_v17 = vadd.f32 %v1192_v7, %v200_v9  ;;  %v913_v19 = vunpack.c.h.bf16 %v1116_v61 }
  0x3d   :  { %v272_v18 = vadd.f32 %v1192_v7, %v201_v10  ;;  %v203_v20 = vmul.f32 %v912_v11, %v1178_v1  ;;  %1143 = vst [vmem:[%s1505_s3 + $0xb8] sm:$0xff] %v1048_v13   ;;  %v334_v23 = vmax.f32 %v270_v15, 0.0  ;;  %v916_v25 = vunpack.c.l.bf16 %v1117_v12 }
  0x3e   :  { %v1053_v22 = vpack.c.bf16 %v333_v14, %v332_v8  ;;  %v273_v24 = vadd.f32 %v1192_v7, %v202_v16  ;;  %v335_v26 = vmax.f32 %v271_v17, 0.0  ;;  %v204_v28 = vmul.f32 %v913_v19, %v1178_v1 }
  0x3f   :  { %v336_v27 = vmax.f32 %v272_v18, 0.0  ;;  %v274_v29 = vadd.f32 %v1192_v7, %v203_v20  ;;  %v917_v31 = vunpack.c.h.bf16 %v1117_v12  ;;  %v205_v32 = vmul.f32 %v916_v25, %v1178_v1 }
  0x40   :  { %1144 = vst [vmem:[%s1505_s3 + $0xc0] sm:$0xff] %v1053_v22   ;;  %v337_v30 = vmax.f32 %v273_v24, 0.0  ;;  %v920_v33 = vunpack.c.l.bf16 %v1118_v21  ;;  %v1058_v35 = vpack.c.bf16 %v335_v26, %v334_v23  ;;  %v275_v36 = vadd.f32 %v1192_v7, %v204_v28 }
  0x41   :  { %v338_v37 = vmax.f32 %v274_v29, 0.0  ;;  %v921_v38 = vunpack.c.h.bf16 %v1118_v21  ;;  %v206_v41 = vmul.f32 %v917_v31, %v1178_v1  ;;  %v276_v42 = vadd.f32 %v1192_v7, %v205_v32 }
  0x42   :  { %v1063_v40 = vpack.c.bf16 %v337_v30, %v336_v27  ;;  %v207_v43 = vmul.f32 %v920_v33, %v1178_v1  ;;  %1145 = vst [vmem:[%s1505_s3 + $0xc8] sm:$0xff] %v1058_v35   ;;  %v339_v44 = vmax.f32 %v275_v36, 0.0  ;;  %v924_v46 = vunpack.c.l.bf16 %v1119_v34 }
  0x43   :  { %v208_v45 = vmul.f32 %v921_v38, %v1178_v1  ;;  %v925_v47 = vunpack.c.h.bf16 %v1119_v34  ;;  %v277_v48 = vadd.f32 %v1192_v7, %v206_v41  ;;  %v340_v49 = vmax.f32 %v276_v42, 0.0 }
  0x44   :  { %1146 = vst [vmem:[%s1505_s3 + $0xd0] sm:$0xff] %v1063_v40   ;;  %v278_v50 = vadd.f32 %v1192_v7, %v207_v43  ;;  %v928_v51 = vunpack.c.l.bf16 %v1120_v39  ;;  %v1068_v52 = vpack.c.bf16 %v339_v44, %v338_v37  ;;  %v209_v54 = vmul.f32 %v924_v46, %v1178_v1 }
  0x45   :  { %v279_v53 = vadd.f32 %v1192_v7, %v208_v45  ;;  %v210_v55 = vmul.f32 %v925_v47, %v1178_v1  ;;  %v341_v56 = vmax.f32 %v277_v48, 0.0  ;;  %v929_v58 = vunpack.c.h.bf16 %v1120_v39 }
  0x46   :  { %v342_v57 = vmax.f32 %v278_v50, 0.0  ;;  %v211_v59 = vmul.f32 %v928_v51, %v1178_v1  ;;  %1147 = vst [vmem:[%s1505_s3 + $0xd8] sm:$0xff] %v1068_v52   ;;  %v280_v61 = vadd.f32 %v1192_v7, %v209_v54 }
  0x47   :  { %v343_v60 = vmax.f32 %v279_v53, 0.0  ;;  %v281_v62 = vadd.f32 %v1192_v7, %v210_v55  ;;  %v1073_v63 = vpack.c.bf16 %v341_v56, %v340_v49  ;;  %v212_v0 = vmul.f32 %v929_v58, %v1178_v1 }
  0x48   :  { %v282_v2 = vadd.f32 %v1192_v7, %v211_v59  ;;  %v344_v4 = vmax.f32 %v280_v61, 0.0 }
  0x49   :  { %v1078_v3 = vpack.c.bf16 %v343_v60, %v342_v57  ;;  %v345_v5 = vmax.f32 %v281_v62, 0.0  ;;  %1148 = vst [vmem:[%s1505_s3 + $0xe0] sm:$0xff] %v1073_v63   ;;  %v283_v6 = vadd.f32 %v1192_v7, %v212_v0 }
  0x4a   :  { %v346_v8 = vmax.f32 %v282_v2, 0.0 }
  0x4b   :  { %1149 = vst [vmem:[%s1505_s3 + $0xe8] sm:$0xff] %v1078_v3   ;;  %v1083_v9 = vpack.c.bf16 %v345_v5, %v344_v4  ;;  %v347_v10 = vmax.f32 %v283_v6, 0.0 }
  0x4d   :  { %1150 = vst [vmem:[%s1505_s3 + $0xf0] sm:$0xff] %v1083_v9   ;;  %v1088_v1 = vpack.c.bf16 %v347_v10, %v346_v8 }
  0x4f   :  { %1151 = vst [vmem:[%s1505_s3 + $0xf8] sm:$0xff] %v1088_v1  }

// kernel: res_block_forward.5
= control target key start
LH: loop header
LB: loop body
LE: loop exit
PB: predicated region body
PF: predicated region fallthrough
CT: control target
= control target key end

     0   :  { %s1270_s12 = smov 0   ;;  %s1402_s0 = inlined_call_operand.vmem [shape: bf16[512,128], index: 0, kind: input, shape index: {}]   ;;  %s1403_s1 = inlined_call_operand.vmem [shape: bf16[128,128], index: 1, kind: input, shape index: {}]   ;;  %s1404_s2 = inlined_call_operand.vmem [shape: bf16[512,128], index: 2, kind: output, shape index: {0}]   ;;  %s1405_s3 = inlined_call_operand.vmem [shape: f32[2,2,128], index: 3, kind: output, shape index: {1}]  }
   0x1 LB: > { %s1276_s13 = sadd.s32 4294967295, %s1248_s12   ;;  %p931_p0 = scmp.ge.s32.totalorder %s1248_s12, 1  ;;  %s1248_s12 = sphi %s1270_s12, %s14_s12  }
   0x2   : > { %p141_p1 = scmp.lt.s32.totalorder %s1248_s12, 3 }
   0x4   : > { %p142_p2 = pnand %p931_p0, %p141_p1 }
   0x5   : > { %s932_s16 = sshll.u32 (!%p142_p2), %s1276_s13, 5  ;;  %p181_p4 = scmp.lt.s32.totalorder (!%p142_p2), %s1276_s13, 1 }
   0x6   : > { %145 = sbr.rel (%p142_p2) target bundleno = 327 (0x147), region = 28  ;;  %p170_p3 = scmp.lt.s32.totalorder (!%p142_p2), %s932_s16, 63 }
   0xb   : > { %v1218_v0 = vld [vmem:[%s1403_s1 + $0x38] sm:$0xff]   ;;  %v1219_v1 = vld [vmem:[%s1403_s1 + $0x30] sm:$0xff]   ;;  %s1407_s16 = smov (!%p170_p3, %s932_s16), 63  ;;  %v1220_v2 = vld [vmem:[%s1403_s1 + $0x28] sm:$0xff]   ;;  %s1409_s13 = smov (!%p181_p4, %s1276_s13), 1  ;;  %vm837_vm0 = vcmask 1040384  }
   0xc   : > { %1146 = vmatprep.subr.bf16.mxu0 %v1218_v0  ;;  %1194 = vmatprep.subr.bf16.mxu1 %v1218_v0  ;;  %s933_s21 = sshll.u32 %s1407_s16, 2  ;;  %v1221_v3 = vld [vmem:[%s1403_s1 + $0x20] sm:$0xff]   ;;  %v1222_v5 = vld [vmem:[%s1403_s1 + $0x18] sm:$0xff]   ;;  %v1223_v6 = vld [vmem:[%s1403_s1 + $0x10] sm:$0xff]   ;;  %s936_s11 = sshll.u32 %s1409_s13, 1 }
   0xd   : > { %1147 = vmatpush3.bf16.msra.mxu0 %v1218_v0  ;;  %1202 = vmatpush3.bf16.msra.mxu1 %v1218_v0  ;;  %s1298_s24 = scalar_lea.vmem %s1402_s0, %s933_s21  ;;  %v1224_v8 = vld [vmem:[%s1403_s1 + $0x8] sm:$0xff]   ;;  %v1225_v9 = vld [vmem:[%s1403_s1] sm:$0xff]   ;;  %s1336_s10 = scalar_lea.vmem %s1404_s2, %s933_s21 }
   0xe   : > { %1148 = vmatprep.subr.bf16.mxu0 %v1219_v1  ;;  %1195 = vmatprep.subr.bf16.mxu1 %v1219_v1  ;;  %v1226_v4 = vld [vmem:[%s1298_s24] sm:$0xff]   ;;  %v1227_v10 = vld [vmem:[%s1298_s24 + $0x8] sm:$0xff]   ;;  %v1228_v12 = vld [vmem:[%s1298_s24 + $0x10] sm:$0xff]   ;;  %s184_s16 = scalar_lea.vmem %s1405_s3, %s936_s11 }
   0xf   : > { %1162 = vmatprep.mubr.bf16.mxu0 %v1226_v4  ;;  %v1234_v7 = vld [vmem:[%s1298_s24 + $0x40] sm:$0xff]   ;;  %v1235_v11 = vld [vmem:[%s1298_s24 + $0x48] sm:$0xff]   ;;  %v1236_v13 = vld [vmem:[%s1298_s24 + $0x50] sm:$0xff]  }
  0x10   : > { %1178 = vmatprep.mubr.bf16.mxu1 %v1234_v7  ;;  %v1229_v14 = vld [vmem:[%s1298_s24 + $0x18] sm:$0xff]   ;;  %v1230_v16 = vld [vmem:[%s1298_s24 + $0x20] sm:$0xff]   ;;  %v1231_v18 = vld [vmem:[%s1298_s24 + $0x28] sm:$0xff]  }
  0x11   : > { %1149 = vmatpush3.bf16.msra.mxu0 %v1219_v1  ;;  %1203 = vmatpush3.bf16.msra.mxu1 %v1219_v1  ;;  %v1237_v15 = vld [vmem:[%s1298_s24 + $0x58] sm:$0xff]   ;;  %v1238_v17 = vld [vmem:[%s1298_s24 + $0x60] sm:$0xff]   ;;  %v1239_v19 = vld [vmem:[%s1298_s24 + $0x68] sm:$0xff]  }
  0x12   : > { %1150 = vmatprep.subr.bf16.mxu0 %v1220_v2  ;;  %1196 = vmatprep.subr.bf16.mxu1 %v1220_v2  ;;  %v1232_v20 = vld [vmem:[%s1298_s24 + $0x30] sm:$0xff]   ;;  %v1233_v22 = vld [vmem:[%s1298_s24 + $0x38] sm:$0xff]  }
  0x13   : > { %v1240_v21 = vld [vmem:[%s1298_s24 + $0x70] sm:$0xff]   ;;  %v1241_v23 = vld [vmem:[%s1298_s24 + $0x78] sm:$0xff]  }
  0x15   : > { %1151 = vmatpush3.bf16.msra.mxu0 %v1220_v2  ;;  %1204 = vmatpush3.bf16.msra.mxu1 %v1220_v2 }
  0x16   : > { %1152 = vmatprep.subr.bf16.mxu0 %v1221_v3  ;;  %1197 = vmatprep.subr.bf16.mxu1 %v1221_v3 }
  0x19   : > { %1153 = vmatpush3.bf16.msra.mxu0 %v1221_v3  ;;  %1205 = vmatpush3.bf16.msra.mxu1 %v1221_v3 }
  0x1a   : > { %1154 = vmatprep.subr.bf16.mxu0 %v1222_v5  ;;  %1198 = vmatprep.subr.bf16.mxu1 %v1222_v5 }
  0x1d   : > { %1155 = vmatpush3.bf16.msra.mxu0 %v1222_v5  ;;  %1206 = vmatpush3.bf16.msra.mxu1 %v1222_v5 }
  0x1e   : > { %1156 = vmatprep.subr.bf16.mxu0 %v1223_v6  ;;  %1199 = vmatprep.subr.bf16.mxu1 %v1223_v6 }
  0x21   : > { %1157 = vmatpush3.bf16.msra.mxu0 %v1223_v6  ;;  %1207 = vmatpush3.bf16.msra.mxu1 %v1223_v6 }
  0x22   : > { %1158 = vmatprep.subr.bf16.mxu0 %v1224_v8  ;;  %1200 = vmatprep.subr.bf16.mxu1 %v1224_v8 }
  0x25   : > { %1159 = vmatpush3.bf16.msra.mxu0 %v1224_v8  ;;  %1208 = vmatpush3.bf16.msra.mxu1 %v1224_v8 }
  0x26   : > { %1160 = vmatprep.subr.bf16.mxu0 %v1225_v9  ;;  %1201 = vmatprep.subr.bf16.mxu1 %v1225_v9 }
  0x29   : > { %1161 = vmatpush3.bf16.msra.mxu0 %v1225_v9  ;;  %1209 = vmatpush3.bf16.msra.mxu1 %v1225_v9 }
  0x2c   : > { %1163 = vmatmul.mubr.bf16.vlgmr.msra.gmra.mxu0 %v1227_v10  ;;  %1179 = vmatmul.mubr.bf16.vlgmr.msra.gmra.mxu1 %v1235_v11 }
  0x2d   : > { %1166 = vmatprep.mubr.bf16.mxu0 %v1228_v12  ;;  %1182 = vmatprep.mubr.bf16.mxu1 %v1236_v13 }
  0x34   : > { %1167 = vmatmul.mubr.bf16.gmra.mxu0 %v1229_v14  ;;  %1183 = vmatmul.mubr.bf16.gmra.mxu1 %v1237_v15 }
  0x35   : > { %1170 = vmatprep.mubr.bf16.mxu0 %v1230_v16  ;;  %1186 = vmatprep.mubr.bf16.mxu1 %v1238_v17 }
  0x3c   : > { %1171 = vmatmul.mubr.bf16.gmra.mxu0 %v1231_v18  ;;  %1187 = vmatmul.mubr.bf16.gmra.mxu1 %v1239_v19 }
  0x3d   : > { %1174 = vmatprep.mubr.bf16.mxu0 %v1232_v20  ;;  %1190 = vmatprep.mubr.bf16.mxu1 %v1240_v21 }
  0x44   : > { %1175 = vmatmul.mubr.bf16.gmra.mxu0 %v1233_v22  ;;  %1191 = vmatmul.mubr.bf16.gmra.mxu1 %v1241_v23 }
  0xec   : > { %v1164_v24 = vpop.f32.mrf.mxu0  ;;  %v1180_v25 = vpop.f32.mrf.mxu1 }
  0xee   : > { %v412_v26 = vpop.f32.mrf.mxu0  ;;  %v476_v27 = vpop.f32.mrf.mxu1 }
  0xf0   : > { %v1165_v28 = vpop.f32.mrf.mxu0  ;;  %v1181_v29 = vpop.f32.mrf.mxu1 }
  0xf1   : > { %v540_v30 = vpack.c.bf16 %v1165_v28, %v1164_v24  ;;  %v1338_v31 = vpack.c.bf16 %v1181_v29, %v1180_v25 }
  0xf2   : > { %v415_v32 = vpop.f32.mrf.mxu0  ;;  %v479_v33 = vpop.f32.mrf.mxu1 }
  0xf3   : > { %1107 = vst [vmem:[%s1336_s10 + $0x8] sm:$0xff] %v540_v30   ;;  %v539_v34 = vpack.c.bf16 %v415_v32, %v412_v26  ;;  %1115 = vst [vmem:[%s1336_s10 + $0x48] sm:$0xff] %v1338_v31   ;;  %v701_v35 = vunpack.c.l.bf16 %v540_v30  ;;  %v1343_v37 = vpack.c.bf16 %v479_v33, %v476_v27  ;;  %v702_v46 = vunpack.c.h.bf16 %v540_v30 }
  0xf4   : > { %v1168_v36 = vpop.f32.mrf.mxu0  ;;  %v1184_v38 = vpop.f32.mrf.mxu1 }
  0xf5   : > { %1031 = vst [vmem:[%s1336_s10] sm:$0xff] %v539_v34   ;;  %v699_v39 = vunpack.c.l.bf16 %v539_v34  ;;  %v700_v40 = vunpack.c.h.bf16 %v539_v34  ;;  %1114 = vst [vmem:[%s1336_s10 + $0x40] sm:$0xff] %v1343_v37   ;;  %v770_v47 = vmul.f32 %v701_v35, %v701_v35  ;;  %v771_v61 = vmul.f32 %v702_v46, %v702_v46 }
  0xf6   : > { %v428_v41 = vpop.f32.mrf.mxu0  ;;  %v492_v42 = vpop.f32.mrf.mxu1 }
  0xf7   : > { %v731_v43 = vadd.f32 %v700_v40, %v699_v39  ;;  %v768_v44 = vmul.f32 %v699_v39, %v699_v39  ;;  %v769_v45 = vmul.f32 %v700_v40, %v700_v40 }
  0xf8   : > { %v1169_v48 = vpop.f32.mrf.mxu0  ;;  %v1185_v49 = vpop.f32.mrf.mxu1 }
  0xf9   : > { %v732_v50 = vadd.f32 %v731_v43, %v701_v35  ;;  %v800_v51 = vadd.f32 %v769_v45, %v768_v44  ;;  %v542_v52 = vpack.c.bf16 %v1169_v48, %v1168_v36  ;;  %v1348_v53 = vpack.c.bf16 %v1185_v49, %v1184_v38 }
  0xfa   : > { %v431_v54 = vpop.f32.mrf.mxu0  ;;  %v495_v55 = vpop.f32.mrf.mxu1 }
  0xfb   : > { %v801_v56 = vadd.f32 %v800_v51, %v770_v47  ;;  %1109 = vst [vmem:[%s1336_s10 + $0x18] sm:$0xff] %v542_v52   ;;  %v541_v57 = vpack.c.bf16 %v431_v54, %v428_v41  ;;  %1117 = vst [vmem:[%s1336_s10 + $0x58] sm:$0xff] %v1348_v53   ;;  %v1353_v59 = vpack.c.bf16 %v495_v55, %v492_v42  ;;  %v705_v3 = vunpack.c.l.bf16 %v542_v52 }
  0xfc   : > { %v1172_v58 = vpop.f32.mrf.mxu0  ;;  %v1188_v60 = vpop.f32.mrf.mxu1  ;;  %v733_v0 = vadd.f32 %v732_v50, %v702_v46  ;;  %v706_v7 = vunpack.c.h.bf16 %v542_v52 }
  0xfd   : > { %1108 = vst [vmem:[%s1336_s10 + $0x10] sm:$0xff] %v541_v57   ;;  %v703_v62 = vunpack.c.l.bf16 %v541_v57  ;;  %v704_v63 = vunpack.c.h.bf16 %v541_v57  ;;  %1116 = vst [vmem:[%s1336_s10 + $0x50] sm:$0xff] %v1353_v59   ;;  %v802_v6 = vadd.f32 %v801_v56, %v771_v61  ;;  %v774_v17 = vmul.f32 %v705_v3, %v705_v3 }
  0xfe   : > { %v444_v1 = vpop.f32.mrf.mxu0  ;;  %v508_v2 = vpop.f32.mrf.mxu1  ;;  %v775_v24 = vmul.f32 %v706_v7, %v706_v7 }
  0xff   : > { %v734_v4 = vadd.f32 %v733_v0, %v703_v62  ;;  %v772_v5 = vmul.f32 %v703_v62, %v703_v62  ;;  %v773_v11 = vmul.f32 %v704_v63, %v704_v63 }
 0x100   : > { %v1173_v8 = vpop.f32.mrf.mxu0  ;;  %v1189_v9 = vpop.f32.mrf.mxu1 }
 0x101   : > { %v735_v10 = vadd.f32 %v734_v4, %v704_v63  ;;  %v803_v12 = vadd.f32 %v802_v6, %v772_v5  ;;  %v544_v13 = vpack.c.bf16 %v1173_v8, %v1172_v58  ;;  %v1358_v15 = vpack.c.bf16 %v1189_v9, %v1188_v60 }
 0x102   : > { %v447_v14 = vpop.f32.mrf.mxu0  ;;  %v511_v16 = vpop.f32.mrf.mxu1  ;;  %v715_v6 = vunpack.c.l.bf16 %v1343_v37  ;;  %v716_v9 = vunpack.c.h.bf16 %v1343_v37  ;;  %v720_v37 = vunpack.c.h.bf16 %v1353_v59 }
 0x103   : > { %v736_v18 = vadd.f32 %v735_v10, %v705_v3  ;;  %v804_v19 = vadd.f32 %v803_v12, %v773_v11  ;;  %1111 = vst [vmem:[%s1336_s10 + $0x28] sm:$0xff] %v544_v13   ;;  %v543_v20 = vpack.c.bf16 %v447_v14, %v444_v1  ;;  %1119 = vst [vmem:[%s1336_s10 + $0x68] sm:$0xff] %v1358_v15   ;;  %v709_v33 = vunpack.c.l.bf16 %v544_v13 }
 0x104   : > { %v1176_v21 = vpop.f32.mrf.mxu0  ;;  %v1363_v22 = vpack.c.bf16 %v511_v16, %v508_v2  ;;  %v1192_v23 = vpop.f32.mrf.mxu1  ;;  %v710_v41 = vunpack.c.h.bf16 %v544_v13  ;;  %v717_v11 = vunpack.c.l.bf16 %v1338_v31  ;;  %v784_v13 = vmul.f32 %v715_v6, %v715_v6 }
 0x105   : > { %v805_v25 = vadd.f32 %v804_v19, %v774_v17  ;;  %v737_v26 = vadd.f32 %v736_v18, %v706_v7  ;;  %1110 = vst [vmem:[%s1336_s10 + $0x20] sm:$0xff] %v543_v20   ;;  %v707_v27 = vunpack.c.l.bf16 %v543_v20  ;;  %v708_v28 = vunpack.c.h.bf16 %v543_v20 }
 0x106   : > { %v460_v29 = vpop.f32.mrf.mxu0  ;;  %1118 = vst [vmem:[%s1336_s10 + $0x60] sm:$0xff] %v1363_v22   ;;  %v524_v30 = vpop.f32.mrf.mxu1  ;;  %v778_v48 = vmul.f32 %v709_v33, %v709_v33  ;;  %v779_v54 = vmul.f32 %v710_v41, %v710_v41  ;;  %v718_v16 = vunpack.c.h.bf16 %v1338_v31  ;;  %v785_v18 = vmul.f32 %v716_v9, %v716_v9 }
 0x107   : > { %v806_v32 = vadd.f32 %v805_v25, %v775_v24  ;;  %v738_v34 = vadd.f32 %v737_v26, %v707_v27  ;;  %v776_v35 = vmul.f32 %v707_v27, %v707_v27  ;;  %v777_v43 = vmul.f32 %v708_v28, %v708_v28 }
 0x108   : > { %v1177_v36 = vpop.f32.mrf.mxu0  ;;  %v1193_v38 = vpop.f32.mrf.mxu1  ;;  %v786_v20 = vmul.f32 %v717_v11, %v717_v11  ;;  %v719_v24 = vunpack.c.l.bf16 %v1353_v59  ;;  %v787_v25 = vmul.f32 %v718_v16, %v718_v16  ;;  %v722_v31 = vunpack.c.h.bf16 %v1348_v53 }
 0x109   : > { %v546_v39 = vpack.c.bf16 %v1177_v36, %v1176_v21  ;;  %v1368_v40 = vpack.c.bf16 %v1193_v38, %v1192_v23  ;;  %v739_v42 = vadd.f32 %v738_v34, %v708_v28  ;;  %v807_v44 = vadd.f32 %v806_v32, %v776_v35 }
 0x10a   : > { %v463_v45 = vpop.f32.mrf.mxu0  ;;  %v527_v46 = vpop.f32.mrf.mxu1  ;;  %v721_v28 = vunpack.c.l.bf16 %v1348_v53  ;;  %v789_v34 = vmul.f32 %v720_v37, %v720_v37  ;;  %v724_v59 = vunpack.c.h.bf16 %v1363_v22  ;;  %v726_v53 = vunpack.c.h.bf16 %v1358_v15 }
 0x10b   : > { %1113 = vst [vmem:[%s1336_s10 + $0x38] sm:$0xff] %v546_v39   ;;  %v545_v47 = vpack.c.bf16 %v463_v45, %v460_v29  ;;  %1121 = vst [vmem:[%s1336_s10 + $0x78] sm:$0xff] %v1368_v40   ;;  %v740_v49 = vadd.f32 %v739_v42, %v709_v33  ;;  %v808_v50 = vadd.f32 %v807_v44, %v777_v43  ;;  %v713_v60 = vunpack.c.l.bf16 %v546_v39 }
 0x10c   : > { %v1373_v51 = vpack.c.bf16 %v527_v46, %v524_v30  ;;  %v714_v63 = vunpack.c.h.bf16 %v546_v39  ;;  %v788_v30 = vmul.f32 %v719_v24, %v719_v24  ;;  %v790_v36 = vmul.f32 %v721_v28, %v721_v28 }
 0x10d   : > { %1112 = vst [vmem:[%s1336_s10 + $0x30] sm:$0xff] %v545_v47   ;;  %v711_v52 = vunpack.c.l.bf16 %v545_v47  ;;  %v809_v55 = vadd.f32 %v808_v50, %v778_v48  ;;  %v712_v56 = vunpack.c.h.bf16 %v545_v47  ;;  %v741_v57 = vadd.f32 %v740_v49, %v710_v41 }
 0x10e   : > { %1120 = vst [vmem:[%s1336_s10 + $0x70] sm:$0xff] %v1373_v51   ;;  %v782_v3 = vmul.f32 %v713_v60, %v713_v60  ;;  %v783_v7 = vmul.f32 %v714_v63, %v714_v63  ;;  %v723_v41 = vunpack.c.l.bf16 %v1363_v22  ;;  %v791_v42 = vmul.f32 %v722_v31, %v722_v31 }
 0x10f   : > { %v780_v58 = vmul.f32 %v711_v52, %v711_v52  ;;  %v742_v61 = vadd.f32 %v741_v57, %v711_v52  ;;  %v810_v62 = vadd.f32 %v809_v55, %v779_v54  ;;  %v781_v1 = vmul.f32 %v712_v56, %v712_v56 }
 0x110   : > { %v725_v45 = vunpack.c.l.bf16 %v1358_v15  ;;  %v792_v47 = vmul.f32 %v723_v41, %v723_v41  ;;  %v793_v50 = vmul.f32 %v724_v59, %v724_v59  ;;  %v727_v57 = vunpack.c.l.bf16 %v1373_v51 }
 0x111   : > { %v743_v0 = vadd.f32 %v742_v61, %v712_v56  ;;  %v811_v2 = vadd.f32 %v810_v62, %v780_v58  ;;  %v795_v58 = vmul.f32 %v726_v53, %v726_v53  ;;  %v728_v22 = vunpack.c.h.bf16 %v1373_v51 }
 0x112   : > { %v794_v54 = vmul.f32 %v725_v45, %v725_v45  ;;  %v729_v62 = vunpack.c.l.bf16 %v1368_v40  ;;  %v730_v15 = vunpack.c.h.bf16 %v1368_v40 }
 0x113   : > { %v744_v4 = vadd.f32 %v743_v0, %v713_v60  ;;  %v812_v5 = vadd.f32 %v811_v2, %v781_v1  ;;  %v796_v0 = vmul.f32 %v727_v57, %v727_v57 }
 0x115   : > { %v813_v8 = vadd.f32 %v812_v5, %v782_v3  ;;  %v745_v10 = vadd.f32 %v744_v4, %v714_v63  ;;  %v797_v3 = vmul.f32 %v728_v22, %v728_v22  ;;  %v798_v5 = vmul.f32 %v729_v62, %v729_v62 }
 0x117   : > { %v746_v12 = vadd.f32 %v745_v10, %v715_v6  ;;  %v814_v14 = vadd.f32 %v813_v8, %v783_v7  ;;  %v799_v8 = vmul.f32 %v730_v15, %v730_v15 }
 0x119   : > { %v747_v17 = vadd.f32 %v746_v12, %v716_v9  ;;  %v815_v19 = vadd.f32 %v814_v14, %v784_v13 }
 0x11b   : > { %v748_v21 = vadd.f32 %v747_v17, %v717_v11  ;;  %v816_v23 = vadd.f32 %v815_v19, %v785_v18 }
 0x11d   : > { %v817_v26 = vadd.f32 %v816_v23, %v786_v20  ;;  %v749_v27 = vadd.f32 %v748_v21, %v718_v16 }
 0x11f   : > { %v750_v29 = vadd.f32 %v749_v27, %v719_v24  ;;  %v818_v32 = vadd.f32 %v817_v26, %v787_v25 }
 0x121   : > { %v751_v33 = vadd.f32 %v750_v29, %v720_v37  ;;  %v819_v35 = vadd.f32 %v818_v32, %v788_v30 }
 0x123   : > { %v752_v38 = vadd.f32 %v751_v33, %v721_v28  ;;  %v820_v39 = vadd.f32 %v819_v35, %v789_v34 }
 0x125   : > { %v821_v43 = vadd.f32 %v820_v39, %v790_v36  ;;  %v753_v44 = vadd.f32 %v752_v38, %v722_v31 }
 0x127   : > { %v754_v46 = vadd.f32 %v753_v44, %v723_v41  ;;  %v822_v48 = vadd.f32 %v821_v43, %v791_v42 }
 0x129   : > { %v755_v49 = vadd.f32 %v754_v46, %v724_v59  ;;  %v823_v52 = vadd.f32 %v822_v48, %v792_v47 }
 0x12b   : > { %v756_v55 = vadd.f32 %v755_v49, %v725_v45  ;;  %v824_v56 = vadd.f32 %v823_v52, %v793_v50 }
 0x12d   : > { %v825_v60 = vadd.f32 %v824_v56, %v794_v54  ;;  %v757_v61 = vadd.f32 %v756_v55, %v726_v53 }
 0x12f   : > { %v758_v63 = vadd.f32 %v757_v61, %v727_v57  ;;  %v826_v1 = vadd.f32 %v825_v60, %v795_v58 }
 0x131   : > { %v759_v2 = vadd.f32 %v758_v63, %v728_v22  ;;  %v827_v4 = vadd.f32 %v826_v1, %v796_v0 }
 0x133   : > { %v760_v6 = vadd.f32 %v759_v2, %v729_v62  ;;  %v828_v7 = vadd.f32 %v827_v4, %v797_v3 }
 0x135   : > { %v761_v9 = vadd.f32 %v760_v6, %v730_v15  ;;  %v829_v10 = vadd.f32 %v828_v7, %v798_v5 }
 0x137   : > { %v762_v51 = vrot.slane %v761_v9, 4  ;;  %v830_v11 = vadd.f32 %v829_v10, %v799_v8 }
 0x139   : > { %v763_v12 = vadd.f32 %v762_v51, %v761_v9  ;;  %v831_v13 = vrot.slane %v830_v11, 4 }
 0x13b   : > { %v764_v14 = vrot.slane %v763_v12, 2  ;;  %v832_v16 = vadd.f32 %v831_v13, %v830_v11 }
 0x13d   : > { %v765_v17 = vadd.f32 %v764_v14, %v763_v12  ;;  %v833_v40 = vrot.slane %v832_v16, 2 }
 0x13f   : > { %v766_v18 = vrot.slane %v765_v17, 1  ;;  %v834_v19 = vadd.f32 %v833_v40, %v832_v16 }
 0x141   : > { %v835_v20 = vrot.slane %v834_v19, 1  ;;  %v767_v21 = vadd.f32 %v766_v18, %v765_v17 }
 0x143   : > { %v836_v23 = vadd.f32 %v835_v20, %v834_v19 }
 0x145   : > { %v838_v24 = vsel %vm837_vm0, %v767_v21, %v836_v23 }
 0x146   : > { %839 = vst [vmem:[%s184_s16] sm:$0x3] %v838_v24 }
 0x147 PF: > { %s14_s12 = sadd.s32 1, %s1248_s12  }
 0x148   : > { %p11_p5 = scmp.ge.s32.totalorder %s14_s12, 4  }
 0x14a   :  { %13 = sbr.rel (!%p11_p5) target bundleno = 1 (0x1), region = 70 }

// kernel: res_block_forward.7
= control target key start
LH: loop header
LB: loop body
LE: loop exit
PB: predicated region body
PF: predicated region fallthrough
CT: control target
= control target key end

     0   :  { %s2515_s12 = smov 0   ;;  %s2517_s13 = smov 0   ;;  %s2935_s0 = inlined_call_operand.vmem [shape: bf16[8,9,9,128], index: 0, kind: input, shape index: {}]   ;;  %s2936_s1 = inlined_call_operand.vmem [shape: bf16[1152,128], index: 1, kind: input, shape index: {}]   ;;  %s2937_s2 = inlined_call_operand.vmem [shape: bf16[2,64,128], index: 2, kind: output, shape index: {0}]   ;;  %s2938_s3 = inlined_call_operand.vmem [shape: f32[2,1,2,128], index: 3, kind: output, shape index: {1}]  }
   0x1   :  { %s2519_s14 = smov 0  }
   0x2 LB: > { %s26_s15 = sadd.s32 1, %s2489_s13  ;;  %p1878_p0 = scmp.ge.s32.totalorder %s2493_s14, 1  ;;  %s2493_s14 = sphi %s2519_s14, %s14_s14   ;;  %s2489_s13 = sphi %s2517_s13, %s2952_s13   ;;  %s2485_s12 = sphi %s2515_s12, %s2951_s12  }
   0x3   : > { %p28_p1 = scmp.ge.s32.totalorder %s26_s15, 2  ;;  %p158_p2 = scmp.lt.s32.totalorder %s2493_s14, 3 }
   0x5   : > { %s2954_s15 = smov (%p28_p1, %s26_s15), 0  ;;  %p159_p3 = pnand %p1878_p0, %p158_p2 }
   0x7   : > { %162 = sbr.rel (%p159_p3) target bundleno = 345 (0x159), region = 28 }
   0xc   : > { %v2351_v0 = vld [vmem:[%s2936_s1 + $0x78] sm:$0xff]   ;;  %v2355_v4 = vld [vmem:[%s2936_s1 + $0x70] sm:$0xff]   ;;  %v2359_v8 = vld [vmem:[%s2936_s1 + $0x68] sm:$0xff]   ;;  %s1879_s27 = sshll.u32 %s2485_s12, 2  ;;  %p202_p5 = scmp.lt.s32.totalorder %s2485_s12, 1  ;;  %vm1726_vm0 = vcmask 1040384  }
   0xd   : > { %v2352_v1 = vld [vmem:[%s2936_s1 + $0xf8] sm:$0xff]   ;;  %2114 = vmatprep.subr.bf16.mxu0 %v2351_v0  ;;  %v2356_v5 = vld [vmem:[%s2936_s1 + $0xf0] sm:$0xff]   ;;  %v2360_v9 = vld [vmem:[%s2936_s1 + $0xe8] sm:$0xff]   ;;  %p195_p4 = scmp.lt.s32.totalorder %s1879_s27, 7 }
   0xe   : > { %v2353_v2 = vld [vmem:[%s2936_s1 + $0x38] sm:$0xff]   ;;  %2154 = vmatprep.subr.bf16.mxu1 %v2352_v1  ;;  %v2357_v6 = vld [vmem:[%s2936_s1 + $0x30] sm:$0xff]   ;;  %v2361_v10 = vld [vmem:[%s2936_s1 + $0x28] sm:$0xff]   ;;  %s2958_s12 = smov (!%p202_p5, %s2485_s12), 1 }
   0xf   : > { %v2354_v3 = vld [vmem:[%s2936_s1 + $0xb8] sm:$0xff]   ;;  %2115 = vmatpush3.bf16.msra.mxu0 %v2353_v2  ;;  %v2358_v7 = vld [vmem:[%s2936_s1 + $0xb0] sm:$0xff]   ;;  %v2362_v11 = vld [vmem:[%s2936_s1 + $0xa8] sm:$0xff]   ;;  %s2956_s27 = smov (!%p195_p4, %s1879_s27), 7  ;;  %s1883_s7 = sshll.u32 %s2958_s12, 1 }
  0x10   : > { %2155 = vmatpush3.bf16.msra.mxu1 %v2354_v3  ;;  %2116 = vmatprep.subr.bf16.mxu0 %v2355_v4  ;;  %v2363_v12 = vld [vmem:[%s2936_s1 + $0x60] sm:$0xff]   ;;  %v2367_v16 = vld [vmem:[%s2936_s1 + $0x58] sm:$0xff]   ;;  %v2371_v20 = vld [vmem:[%s2936_s1 + $0x50] sm:$0xff]   ;;  %s2326_s28 = smul.u32 72, %s2956_s27  ;;  %s217_s27 = scalar_lea.vmem %s2938_s3, %s1883_s7 }
  0x11   : > { %2156 = vmatprep.subr.bf16.mxu1 %v2356_v5  ;;  %v2364_v13 = vld [vmem:[%s2936_s1 + $0xe0] sm:$0xff]   ;;  %v2368_v17 = vld [vmem:[%s2936_s1 + $0xd8] sm:$0xff]   ;;  %v2372_v21 = vld [vmem:[%s2936_s1 + $0xd0] sm:$0xff]  }
  0x12   : > { %v2365_v14 = vld [vmem:[%s2936_s1 + $0x20] sm:$0xff]   ;;  %v2369_v18 = vld [vmem:[%s2936_s1 + $0x18] sm:$0xff]   ;;  %v2373_v22 = vld [vmem:[%s2936_s1 + $0x10] sm:$0xff]   ;;  %s2635_s11 = scalar_lea.vmem %s2935_s0, %s2326_s28 }
  0x13   : > { %2117 = vmatpush3.bf16.msra.mxu0 %v2357_v6  ;;  %v2366_v15 = vld [vmem:[%s2936_s1 + $0xa0] sm:$0xff]   ;;  %v2370_v19 = vld [vmem:[%s2936_s1 + $0x98] sm:$0xff]   ;;  %v2374_v23 = vld [vmem:[%s2936_s1 + $0x90] sm:$0xff]  }
  0x14   : > { %2157 = vmatpush3.bf16.msra.mxu1 %v2358_v7  ;;  %2118 = vmatprep.subr.bf16.mxu0 %v2359_v8  ;;  %v2375_v24 = vld [vmem:[%s2936_s1 + $0x48] sm:$0xff]   ;;  %v2379_v28 = vld [vmem:[%s2936_s1 + $0x40] sm:$0xff]   ;;  %v1892_v33 = vld [vmem:[%s2635_s11 + $0x90] sm:$0xf] }
  0x15   : > { %2158 = vmatprep.subr.bf16.mxu1 %v2360_v9  ;;  %v2376_v25 = vld [vmem:[%s2936_s1 + $0xc8] sm:$0xff]   ;;  %v2380_v29 = vld [vmem:[%s2936_s1 + $0xc0] sm:$0xff]   ;;  %v1893_v34 = vld [vmem:[%s2635_s11 + $0x98] sm:$0xf] }
  0x16   : > { %v2377_v26 = vld [vmem:[%s2936_s1 + $0x8] sm:$0xff]   ;;  %v2381_v30 = vld [vmem:[%s2936_s1] sm:$0xff]   ;;  %v1967_v35 = vcombine.low %v1892_v33, %v1893_v34  ;;  %v2390_v43 = vld [vmem:[%s2936_s1 + $0x178] sm:$0xff]  }
  0x17   : > { %2119 = vmatpush3.bf16.msra.mxu0 %v2361_v10  ;;  %v2378_v27 = vld [vmem:[%s2936_s1 + $0x88] sm:$0xff]   ;;  %v2382_v31 = vld [vmem:[%s2936_s1 + $0x80] sm:$0xff]   ;;  %v2391_v44 = vld [vmem:[%s2936_s1 + $0x1f8] sm:$0xff]  }
  0x18   : > { %2159 = vmatpush3.bf16.msra.mxu1 %v2362_v11  ;;  %2120 = vmatprep.subr.bf16.mxu0 %v2363_v12  ;;  %v2383_v32 = vld [vmem:[%s2635_s11 + $0x48] ss:$8 sps:$4 sm:$0xff]   ;;  %v223_v36 = vld [vmem:[%s2635_s11] sm:$0xf]  ;;  %v242_v38 = vld [vmem:[%s2635_s11 + $0x4] sm:$0x1] }
  0x19   : > { %2160 = vmatprep.subr.bf16.mxu1 %v2364_v13  ;;  %1351 = vmatprep.mubr.bf16.mxu0 %v2383_v32  ;;  %v224_v37 = vld [vmem:[%s2635_s11 + $0x8] sm:$0xf]  ;;  %v243_v39 = vld [vmem:[%s2635_s11 + $0xc] sm:$0x1]  ;;  %v1940_v41 = vcombine.low %v223_v36, %v242_v38  ;;  %v2392_v49 = vld [vmem:[%s2936_s1 + $0x138] sm:$0xff]  }
  0x1a   : > { %v1964_v40 = vcombine.low %v223_v36, %v224_v37  ;;  %1416 = vmatprep.mubr.bf16.mxu1 %v1967_v35  ;;  %v1941_v42 = vcombine.low %v224_v37, %v243_v39  ;;  %v2394_v52 = vld [vmem:[%s2936_s1 + $0x170] sm:$0xff]   ;;  %v2393_v55 = vld [vmem:[%s2936_s1 + $0x1b8] sm:$0xff]   ;;  %v1894_v62 = vld [vmem:[%s2635_s11 + $0xa0] sm:$0xf] }
  0x1b   : > { %2121 = vmatpush3.bf16.msra.mxu0 %v2365_v14  ;;  %v354_v45 = vshll.u32 %v1940_v41, 16  ;;  %v352_v47 = vshrl.u32 %v1940_v41, 16  ;;  %v1908_v56 = vld [vmem:[%s2635_s11 + $0x94] sm:$0x1]  ;;  %v2398_v60 = vld [vmem:[%s2635_s11 + $0x58] ss:$8 sps:$4 sm:$0xff]  }
  0x1c   : > { %2161 = vmatpush3.bf16.msra.mxu1 %v2366_v15  ;;  %2122 = vmatprep.subr.bf16.mxu0 %v2367_v16  ;;  %v361_v46 = vshll.u32 %v1941_v42, 16  ;;  %v359_v48 = vshrl.u32 %v1941_v42, 16  ;;  %v2396_v57 = vld [vmem:[%s2936_s1 + $0x130] sm:$0xff]   ;;  %v1909_v61 = vld [vmem:[%s2635_s11 + $0x9c] sm:$0x1]  ;;  %v2678_v4 = vcombine.low %v1892_v33, %v1908_v56  ;;  %v2405_v10 = vld [vmem:[%s2936_s1 + $0x168] sm:$0xff]  }
  0x1d   : > { %2162 = vmatprep.subr.bf16.mxu1 %v2368_v17  ;;  %v356_v50 = vrot.slane %v354_v45, 1  ;;  %v2395_v59 = vld [vmem:[%s2936_s1 + $0x1f0] sm:$0xff]   ;;  %v2670_v63 = vld [vmem:[%s2635_s11 + $0xa8] sm:$0xf]  ;;  %v226_v3 = vld [vmem:[%s2635_s11 + $0x18] sm:$0xf]  ;;  %v2685_v11 = vcombine.low %v1893_v34, %v1909_v61 }
  0x1e   : > { %v363_v51 = vrot.slane %v361_v46, 1  ;;  %v2397_v0 = vld [vmem:[%s2936_s1 + $0x1b0] sm:$0xff]   ;;  %v1976_v1 = vcombine.low %v1894_v62, %v2670_v63  ;;  %v245_v6 = vld [vmem:[%s2635_s11 + $0x1c] sm:$0x1]  ;;  %v2406_v12 = vld [vmem:[%s2936_s1 + $0x1e8] sm:$0xff]   ;;  %v450_v17 = vshll.u32 %v2678_v4, 16 }
  0x1f   : > { %2123 = vmatpush3.bf16.msra.mxu0 %v2369_v18  ;;  %v357_v53 = vor.u32 %v356_v50, %v352_v47  ;;  %v225_v2 = vld [vmem:[%s2635_s11 + $0x10] sm:$0xf]  ;;  %v244_v5 = vld [vmem:[%s2635_s11 + $0x14] sm:$0x1]  ;;  %v1943_v9 = vcombine.low %v226_v3, %v245_v6  ;;  %v1910_v18 = vld [vmem:[%s2635_s11 + $0xa4] sm:$0x1] }
  0x20   : > { %2163 = vmatpush3.bf16.msra.mxu1 %v2370_v19  ;;  %2124 = vmatprep.subr.bf16.mxu0 %v2371_v20  ;;  %v364_v54 = vor.u32 %v363_v51, %v359_v48  ;;  %v1973_v7 = vcombine.low %v225_v2, %v226_v3  ;;  %v1942_v8 = vcombine.low %v225_v2, %v244_v5  ;;  %v2407_v19 = vld [vmem:[%s2936_s1 + $0x128] sm:$0xff]   ;;  %v2412_v33 = vld [vmem:[%s2936_s1 + $0x1a0] sm:$0xff]   ;;  %v1896_v35 = vld [vmem:[%s2635_s11 + $0xb0] sm:$0xf]  ;;  %v452_v37 = vrot.slane %v450_v17, 1 }
  0x21   : > { %2164 = vmatprep.subr.bf16.mxu1 %v2372_v21  ;;  %v375_v14 = vshll.u32 %v1943_v9, 16  ;;  %v373_v16 = vshrl.u32 %v1943_v9, 16  ;;  %v2413_v34 = vld [vmem:[%s2635_s11 + $0x68] ss:$8 sps:$4 sm:$0xff]   ;;  %v1897_v36 = vld [vmem:[%s2635_s11 + $0xb8] sm:$0xf] }
  0x22   : > { %v1966_v58 = vcombine.low %v357_v53, %v364_v54  ;;  %v368_v13 = vshll.u32 %v1942_v8, 16  ;;  %v366_v15 = vshrl.u32 %v1942_v8, 16  ;;  %v1911_v39 = vld [vmem:[%s2635_s11 + $0xac] sm:$0x1]  ;;  %v227_v41 = vld [vmem:[%s2635_s11 + $0x20] sm:$0xf] }
  0x23   : > { %2125 = vmatpush3.bf16.msra.mxu0 %v2373_v22  ;;  %v377_v21 = vrot.slane %v375_v14, 1  ;;  %v2408_v22 = vld [vmem:[%s2936_s1 + $0x1a8] sm:$0xff]   ;;  %v1912_v42 = vld [vmem:[%s2635_s11 + $0xb4] sm:$0x1]  ;;  %v2420_v50 = vld [vmem:[%s2936_s1 + $0x158] sm:$0xff]   ;;  %v2729_v51 = vcombine.low %v2670_v63, %v1911_v39 }
  0x24   : > { %2165 = vmatpush3.bf16.msra.mxu1 %v2374_v23  ;;  %2126 = vmatprep.subr.bf16.mxu0 %v2375_v24  ;;  %v370_v20 = vrot.slane %v368_v13, 1  ;;  %v2409_v23 = vld [vmem:[%s2936_s1 + $0x160] sm:$0xff]   ;;  %v457_v24 = vshll.u32 %v2685_v11, 16  ;;  %v247_v45 = vld [vmem:[%s2635_s11 + $0x2c] sm:$0x1]  ;;  %v2424_v63 = vld [vmem:[%s2936_s1 + $0x150] sm:$0xff]  }
  0x25   : > { %2166 = vmatprep.subr.bf16.mxu1 %v2376_v25  ;;  %v2426_v5 = vld [vmem:[%s2936_s1 + $0x110] sm:$0xff]   ;;  %v1898_v13 = vld [vmem:[%s2635_s11 + $0xc0] sm:$0xf]  ;;  %v469_v17 = vshrl.u32 %v2729_v51, 16 }
  0x26   : > { %v371_v25 = vor.u32 %v370_v20, %v366_v15  ;;  %v459_v38 = vrot.slane %v457_v24, 1  ;;  %v2427_v9 = vld [vmem:[%s2936_s1 + $0x190] sm:$0xff]   ;;  %v1899_v15 = vld [vmem:[%s2635_s11 + $0xc8] sm:$0xf] }
  0x27   : > { %2127 = vmatpush3.bf16.msra.mxu0 %v2377_v26  ;;  %v378_v26 = vor.u32 %v377_v21, %v373_v16  ;;  %v229_v20 = vld [vmem:[%s2635_s11 + $0x30] sm:$0xf]  ;;  %v230_v21 = vld [vmem:[%s2635_s11 + $0x38] sm:$0xf] }
  0x28   : > { %2167 = vmatpush3.bf16.msra.mxu1 %v2378_v27  ;;  %2128 = vmatprep.subr.bf16.mxu0 %v2379_v28  ;;  %v2410_v27 = vld [vmem:[%s2936_s1 + $0x1e0] sm:$0xff]   ;;  %v448_v28 = vshrl.u32 %v2678_v4, 16  ;;  %v2425_v4 = vld [vmem:[%s2936_s1 + $0x1d0] sm:$0xff]  }
  0x29   : > { %2168 = vmatprep.subr.bf16.mxu1 %v2380_v29  ;;  %v2411_v29 = vld [vmem:[%s2936_s1 + $0x120] sm:$0xff]   ;;  %v1975_v32 = vcombine.low %v371_v25, %v378_v26  ;;  %v1991_v25 = vcombine.low %v229_v20, %v230_v21 }
  0x2b   : > { %2129 = vmatpush3.bf16.msra.mxu0 %v2381_v30  ;;  %v455_v30 = vshrl.u32 %v2685_v11, 16 }
  0x2c   : > { %2169 = vmatpush3.bf16.msra.mxu1 %v2382_v31  ;;  %2194 = vmatprep.subr.bf16.mxu0 %v2390_v43  ;;  %v2710_v31 = vcombine.low %v1894_v62, %v1910_v18  ;;  %v228_v43 = vld [vmem:[%s2635_s11 + $0x28] sm:$0xf]  ;;  %v2423_v62 = vld [vmem:[%s2936_s1 + $0x198] sm:$0xff]  }
  0x2d   : > { %2234 = vmatprep.subr.bf16.mxu1 %v2391_v44  ;;  %v246_v44 = vld [vmem:[%s2635_s11 + $0x24] sm:$0x1]  ;;  %v1945_v48 = vcombine.low %v228_v43, %v247_v45  ;;  %v460_v11 = vor.u32 %v459_v38, %v455_v30  ;;  %v2438_v38 = vld [vmem:[%s2936_s1 + $0x188] sm:$0xff]  }
  0x2e   : > { %1352 = vmatmul.mubr.bf16.vlgmr.msra.gmra.mxu0 %v1964_v40  ;;  %v1985_v40 = vcombine.low %v1896_v35, %v1897_v36  ;;  %v464_v46 = vshll.u32 %v2710_v31, 16  ;;  %v1944_v47 = vcombine.low %v227_v41, %v246_v44  ;;  %v462_v6 = vshrl.u32 %v2710_v31, 16 }
  0x2f   : > { %2195 = vmatpush3.bf16.msra.mxu0 %v2392_v49  ;;  %1417 = vmatmul.mubr.bf16.vlgmr.msra.gmra.mxu1 %v1966_v58  ;;  %v1982_v49 = vcombine.low %v227_v41, %v228_v43  ;;  %v389_v54 = vshll.u32 %v1945_v48, 16  ;;  %v387_v56 = vshrl.u32 %v1945_v48, 16  ;;  %v2422_v58 = vld [vmem:[%s2936_s1 + $0x118] sm:$0xff]   ;;  %v1915_v41 = vld [vmem:[%s2635_s11 + $0xcc] sm:$0x1]  ;;  %v2440_v43 = vld [vmem:[%s2936_s1 + $0x1c0] sm:$0xff]  }
  0x30   : > { %2196 = vmatprep.subr.bf16.mxu0 %v2394_v52  ;;  %2235 = vmatpush3.bf16.msra.mxu1 %v2393_v55  ;;  %v1913_v52 = vld [vmem:[%s2635_s11 + $0xbc] sm:$0x1]  ;;  %v382_v53 = vshll.u32 %v1944_v47, 16  ;;  %v380_v55 = vshrl.u32 %v1944_v47, 16  ;;  %v466_v16 = vrot.slane %v464_v46, 1  ;;  %v2441_v48 = vld [vmem:[%s2936_s1 + $0x100] sm:$0xff]  }
  0x31   : > { %1359 = vmatprep.mubr.bf16.mxu0 %v2398_v60  ;;  %2236 = vmatprep.subr.bf16.mxu1 %v2395_v59  ;;  %v2738_v59 = vcombine.low %v1896_v35, %v1912_v42  ;;  %v391_v61 = vrot.slane %v389_v54, 1  ;;  %v2443_v54 = vld [vmem:[%s2635_s11 + $0x50] ss:$8 sps:$4 sm:$0xff]  }
  0x32   : > { %1424 = vmatprep.mubr.bf16.mxu1 %v1976_v1  ;;  %v384_v60 = vrot.slane %v382_v53, 1  ;;  %v2747_v1 = vcombine.low %v1897_v36, %v1913_v52  ;;  %v467_v44 = vor.u32 %v466_v16, %v462_v6 }
  0x33   : > { %2197 = vmatpush3.bf16.msra.mxu0 %v2396_v57  ;;  %v2421_v57 = vld [vmem:[%s2936_s1 + $0x1d8] sm:$0xff]   ;;  %v392_v3 = vor.u32 %v391_v61, %v387_v56  ;;  %v476_v30 = vshrl.u32 %v2738_v59, 16  ;;  %v1955_v56 = vcombine.low %v1899_v15, %v1915_v41  ;;  %v1932_v41 = vld [vmem:[%s2635_s11 + $0xc] sm:$0x1] }
  0x34   : > { %2237 = vmatpush3.bf16.msra.mxu1 %v2397_v0  ;;  %2198 = vmatprep.subr.bf16.mxu0 %v2405_v10  ;;  %v471_v0 = vshll.u32 %v2729_v51, 16  ;;  %v385_v2 = vor.u32 %v384_v60, %v380_v55  ;;  %v453_v10 = vor.u32 %v452_v37, %v448_v28  ;;  %v485_v14 = vshll.u32 %v2747_v1, 16  ;;  %v2435_v28 = vld [vmem:[%s2936_s1 + $0x148] sm:$0xff]   ;;  %v2442_v51 = vld [vmem:[%s2936_s1 + $0x180] sm:$0xff]   ;;  %v2446_v61 = vld [vmem:[%s2936_s1 + $0x238] sm:$0xff]  }
  0x35   : > { %2238 = vmatprep.subr.bf16.mxu1 %v2406_v12  ;;  %v2428_v12 = vld [vmem:[%s2635_s11 + $0x78] ss:$8 sps:$4 sm:$0xff]   ;;  %v2437_v37 = vld [vmem:[%s2936_s1 + $0x108] sm:$0xff]   ;;  %v497_v6 = vshrl.u32 %v1955_v56, 16 }
  0x36   : > { %1360 = vmatmul.mubr.bf16.gmra.mxu0 %v1973_v7  ;;  %v478_v7 = vshll.u32 %v2738_v59, 16  ;;  %v1984_v8 = vcombine.low %v385_v2, %v392_v3  ;;  %v473_v18 = vrot.slane %v471_v0, 1  ;;  %v1969_v26 = vcombine.low %v453_v10, %v460_v11  ;;  %v2803_v59 = vld [vmem:[%s2635_s11 + $0x10] sm:$0xf] }
  0x37   : > { %2199 = vmatpush3.bf16.msra.mxu0 %v2407_v19  ;;  %1425 = vmatmul.mubr.bf16.gmra.mxu1 %v1975_v32  ;;  %v1994_v19 = vcombine.low %v1898_v13, %v1899_v15  ;;  %v487_v52 = vrot.slane %v485_v14, 1  ;;  %v2454_v14 = vld [vmem:[%s2936_s1 + $0x220] sm:$0xff]  }
  0x38   : > { %2239 = vmatpush3.bf16.msra.mxu1 %v2408_v22  ;;  %2200 = vmatprep.subr.bf16.mxu0 %v2409_v23  ;;  %v248_v22 = vld [vmem:[%s2635_s11 + $0x34] sm:$0x1]  ;;  %v249_v23 = vld [vmem:[%s2635_s11 + $0x3c] sm:$0x1]  ;;  %v480_v31 = vrot.slane %v478_v7, 1  ;;  %v474_v45 = vor.u32 %v473_v18, %v469_v17 }
  0x39   : > { %2240 = vmatprep.subr.bf16.mxu1 %v2410_v27  ;;  %1367 = vmatprep.mubr.bf16.mxu0 %v2413_v34  ;;  %v1946_v24 = vcombine.low %v229_v20, %v248_v22  ;;  %v1947_v27 = vcombine.low %v230_v21, %v249_v23  ;;  %v1914_v34 = vld [vmem:[%s2635_s11 + $0xc4] sm:$0x1]  ;;  %v2449_v7 = vld [vmem:[%s2635_s11 + $0xe8] ss:$8 sps:$4 sm:$0xff]   ;;  %v1936_v18 = vld [vmem:[%s2635_s11 + $0x2c] sm:$0x1] }
  0x3a   : > { %1432 = vmatprep.mubr.bf16.mxu1 %v1985_v40  ;;  %v2439_v40 = vld [vmem:[%s2936_s1 + $0x140] sm:$0xff]   ;;  %v1978_v55 = vcombine.low %v467_v44, %v474_v45  ;;  %v481_v0 = vor.u32 %v480_v31, %v476_v30  ;;  %v1920_v17 = vld [vmem:[%s2635_s11 + $0x28] sm:$0xf]  ;;  %v2455_v23 = vld [vmem:[%s2635_s11 + $0x70] ss:$8 sps:$4 sm:$0xff]  }
  0x3b   : > { %2201 = vmatpush3.bf16.msra.mxu0 %v2411_v29  ;;  %v2436_v29 = vld [vmem:[%s2936_s1 + $0x1c8] sm:$0xff]   ;;  %v396_v32 = vshll.u32 %v1946_v24, 16  ;;  %v403_v35 = vshll.u32 %v1947_v27, 16  ;;  %v401_v36 = vshrl.u32 %v1947_v27, 16  ;;  %v1935_v15 = vld [vmem:[%s2635_s11 + $0x24] sm:$0x1] }
  0x3c   : > { %2241 = vmatpush3.bf16.msra.mxu1 %v2412_v33  ;;  %2202 = vmatprep.subr.bf16.mxu0 %v2420_v50  ;;  %v394_v33 = vshrl.u32 %v1946_v24, 16  ;;  %v1954_v50 = vcombine.low %v1898_v13, %v1914_v34  ;;  %v1934_v13 = vld [vmem:[%s2635_s11 + $0x1c] sm:$0x1]  ;;  %v2831_v24 = vcombine.low %v1920_v17, %v1936_v18  ;;  %v2456_v27 = vld [vmem:[%s2635_s11 + $0xf8] ss:$8 sps:$4 sm:$0xff]  }
  0x3d   : > { %2242 = vmatprep.subr.bf16.mxu1 %v2421_v57  ;;  %v398_v39 = vrot.slane %v396_v32, 1  ;;  %v405_v42 = vrot.slane %v403_v35, 1  ;;  %v2444_v57 = vld [vmem:[%s2635_s11 + $0xd8] ss:$8 sps:$4 sm:$0xff]   ;;  %v1933_v45 = vld [vmem:[%s2635_s11 + $0x14] sm:$0x1] }
  0x3e   : > { %1368 = vmatmul.mubr.bf16.gmra.mxu0 %v1982_v49  ;;  %v483_v49 = vshrl.u32 %v2747_v1, 16  ;;  %v492_v60 = vshll.u32 %v1954_v50, 16  ;;  %v490_v3 = vshrl.u32 %v1954_v50, 16  ;;  %v2460_v30 = vld [vmem:[%s2936_s1 + $0x218] sm:$0xff]   ;;  %v574_v32 = vshll.u32 %v2831_v24, 16 }
  0x3f   : > { %2203 = vmatpush3.bf16.msra.mxu0 %v2422_v58  ;;  %1433 = vmatmul.mubr.bf16.gmra.mxu1 %v1984_v8  ;;  %v399_v46 = vor.u32 %v398_v39, %v394_v33  ;;  %v406_v47 = vor.u32 %v405_v42, %v401_v36  ;;  %v2800_v58 = vld [vmem:[%s2635_s11 + $0x8] sm:$0xf]  ;;  %v1918_v8 = vld [vmem:[%s2635_s11 + $0x18] sm:$0xf]  ;;  %v2461_v33 = vld [vmem:[%s2936_s1 + $0x210] sm:$0xff]  }
  0x40   : > { %2243 = vmatpush3.bf16.msra.mxu1 %v2423_v62  ;;  %2204 = vmatprep.subr.bf16.mxu0 %v2424_v63  ;;  %v2447_v62 = vld [vmem:[%s2936_s1 + $0x230] sm:$0xff]   ;;  %v499_v63 = vshll.u32 %v1955_v56, 16  ;;  %v488_v1 = vor.u32 %v487_v52, %v483_v49  ;;  %v1970_v2 = vcombine.low %v2800_v58, %v2803_v59  ;;  %v2825_v16 = vcombine.low %v1918_v8, %v1934_v13  ;;  %v2846_v34 = vld [vmem:[%s2635_s11 + $0x38] sm:$0xf]  ;;  %v2849_v35 = vld [vmem:[%s2635_s11 + $0x40] sm:$0xf] }
  0x41   : > { %2244 = vmatprep.subr.bf16.mxu1 %v2425_v4  ;;  %1375 = vmatprep.mubr.bf16.mxu0 %v2428_v12  ;;  %v1993_v53 = vcombine.low %v399_v46, %v406_v47  ;;  %v2448_v4 = vld [vmem:[%s2635_s11 + $0x60] ss:$8 sps:$4 sm:$0xff]   ;;  %v1938_v36 = vld [vmem:[%s2635_s11 + $0x3c] sm:$0x1]  ;;  %v572_v46 = vshrl.u32 %v2831_v24, 16  ;;  %v1957_v49 = vcombine.low %v2803_v59, %v1933_v45  ;;  %v576_v50 = vrot.slane %v574_v32, 1 }
  0x42   : > { %1440 = vmatprep.mubr.bf16.mxu1 %v1994_v19  ;;  %v1987_v10 = vcombine.low %v481_v0, %v488_v1  ;;  %v501_v11 = vrot.slane %v499_v63, 1  ;;  %v1919_v12 = vld [vmem:[%s2635_s11 + $0x20] sm:$0xf]  ;;  %v1937_v19 = vld [vmem:[%s2635_s11 + $0x34] sm:$0x1] }
  0x43   : > { %2205 = vmatpush3.bf16.msra.mxu0 %v2426_v5  ;;  %v494_v5 = vrot.slane %v492_v60, 1  ;;  %v1979_v22 = vcombine.low %v1918_v8, %v1919_v12  ;;  %v2462_v47 = vld [vmem:[%s2635_s11 + $0x80] ss:$8 sps:$4 sm:$0xff]   ;;  %v553_v63 = vshll.u32 %v1957_v49, 16 }
  0x44   : > { %2245 = vmatpush3.bf16.msra.mxu1 %v2427_v9  ;;  %2206 = vmatprep.subr.bf16.mxu0 %v2435_v28  ;;  %v2453_v9 = vld [vmem:[%s2936_s1 + $0x228] sm:$0xff]   ;;  %v502_v21 = vor.u32 %v501_v11, %v497_v6  ;;  %v2468_v0 = vld [vmem:[%s2936_s1 + $0x200] sm:$0xff]  }
  0x45   : > { %2246 = vmatprep.subr.bf16.mxu1 %v2436_v29  ;;  %v495_v20 = vor.u32 %v494_v5, %v490_v3  ;;  %v560_v29 = vshll.u32 %v2825_v16, 16  ;;  %v577_v3 = vor.u32 %v576_v50, %v572_v46 }
  0x46   : > { %1376 = vmatmul.mubr.bf16.gmra.mxu0 %v1991_v25  ;;  %v1921_v25 = vld [vmem:[%s2635_s11 + $0x30] sm:$0xf] }
  0x47   : > { %1481 = vmatprep.mubr.bf16.mxu0 %v1969_v26  ;;  %2207 = vmatpush3.bf16.msra.mxu0 %v2437_v37  ;;  %v2834_v26 = vcombine.low %v1919_v12, %v1935_v15  ;;  %v1961_v28 = vcombine.low %v1921_v25, %v1937_v19  ;;  %v1996_v31 = vcombine.low %v495_v20, %v502_v21  ;;  %v1939_v37 = vld [vmem:[%s2635_s11 + $0x44] sm:$0x1]  ;;  %v562_v52 = vrot.slane %v560_v29, 1 }
  0x48   : > { %2247 = vmatpush3.bf16.msra.mxu1 %v2438_v38  ;;  %2208 = vmatprep.subr.bf16.mxu0 %v2439_v40  ;;  %v558_v40 = vshrl.u32 %v2825_v16, 16  ;;  %v1988_v42 = vcombine.low %v1920_v17, %v1921_v25  ;;  %v1963_v44 = vcombine.low %v2849_v35, %v1939_v37 }
  0x49   : > { %2248 = vmatprep.subr.bf16.mxu1 %v2440_v43  ;;  %1441 = vmatmul.mubr.bf16.gmra.mxu1 %v1993_v53  ;;  %v567_v38 = vshll.u32 %v2834_v26, 16  ;;  %v581_v39 = vshll.u32 %v1961_v28, 16  ;;  %v1962_v43 = vcombine.low %v2846_v34, %v1938_v36  ;;  %v565_v53 = vshrl.u32 %v2834_v26, 16 }
  0x4a   : > { %1546 = vmatprep.mubr.bf16.mxu1 %v2443_v54  ;;  %v595_v59 = vshll.u32 %v1963_v44, 16  ;;  %v563_v5 = vor.u32 %v562_v52, %v558_v40  ;;  %v593_v12 = vshrl.u32 %v1963_v44, 16 }
  0x4b   : > { %2209 = vmatpush3.bf16.msra.mxu0 %v2441_v48  ;;  %v1956_v48 = vcombine.low %v2800_v58, %v1932_v41  ;;  %v569_v54 = vrot.slane %v567_v38, 1  ;;  %v583_v56 = vrot.slane %v581_v39, 1  ;;  %v588_v58 = vshll.u32 %v1962_v43, 16 }
  0x4c   : > { %2249 = vmatpush3.bf16.msra.mxu1 %v2442_v51  ;;  %2286 = vmatprep.subr.bf16.mxu0 %v2446_v61  ;;  %v579_v51 = vshrl.u32 %v1961_v28, 16  ;;  %v597_v13 = vrot.slane %v595_v59, 1 }
  0x4d   : > { %2310 = vmatprep.subr.bf16.mxu1 %v2446_v61  ;;  %v544_v60 = vshrl.u32 %v1956_v48, 16  ;;  %v570_v6 = vor.u32 %v569_v54, %v565_v53  ;;  %v590_v11 = vrot.slane %v588_v58, 1 }
  0x4e   : > { %1482 = vmatmul.mubr.bf16.vlgmr.msra.gmra.mxu0 %v2444_v57  ;;  %v2467_v57 = vld [vmem:[%s2936_s1 + $0x208] sm:$0xff]   ;;  %v598_v18 = vor.u32 %v597_v13, %v593_v12 }
  0x4f   : > { %1489 = vmatprep.mubr.bf16.mxu0 %v1978_v55  ;;  %2287 = vmatpush3.bf16.msra.mxu0 %v2446_v61  ;;  %v2463_v55 = vld [vmem:[%s2635_s11 + $0x108] ss:$8 sps:$4 sm:$0xff]   ;;  %v1981_v16 = vcombine.low %v563_v5, %v570_v6  ;;  %s2082_s11 = sshll.u32 %s2958_s12, 5 }
  0x50   : > { %2288 = vmatprep.subr.bf16.mxu0 %v2447_v62  ;;  %s2915_s6 = scalar_lea.vmem %s2937_s2, %s2082_s11 }
  0x51   : > { %1547 = vmatmul.mubr.bf16.vlgmr.msra.gmra.mxu1 %v1970_v2  ;;  %v555_v2 = vrot.slane %v553_v63, 1 }
  0x52   : > { %2318 = vmatpush3.bf16.msra.mxu1 %v2446_v61  ;;  %1554 = vmatprep.mubr.bf16.mxu1 %v2448_v4  ;;  %v546_v61 = vshll.u32 %v1956_v48, 16  ;;  %v584_v4 = vor.u32 %v583_v56, %v579_v51 }
  0x53   : > { %2289 = vmatpush3.bf16.msra.mxu0 %v2447_v62  ;;  %2311 = vmatprep.subr.bf16.mxu1 %v2447_v62 }
  0x54   : > { %2290 = vmatprep.subr.bf16.mxu0 %v2453_v9  ;;  %v548_v1 = vrot.slane %v546_v61, 1  ;;  %v1990_v15 = vcombine.low %v577_v3, %v584_v4 }
  0x56   : > { %1490 = vmatmul.mubr.bf16.gmra.mxu0 %v2449_v7  ;;  %2319 = vmatpush3.bf16.msra.mxu1 %v2447_v62  ;;  %v551_v62 = vshrl.u32 %v1957_v49, 16  ;;  %v1997_v7 = vcombine.low %v2846_v34, %v2849_v35  ;;  %v549_v8 = vor.u32 %v548_v1, %v544_v60 }
  0x57   : > { %1497 = vmatprep.mubr.bf16.mxu0 %v1987_v10  ;;  %2291 = vmatpush3.bf16.msra.mxu0 %v2453_v9  ;;  %v586_v10 = vshrl.u32 %v1962_v43, 16 }
  0x58   : > { %2292 = vmatprep.subr.bf16.mxu0 %v2454_v14  ;;  %2312 = vmatprep.subr.bf16.mxu1 %v2453_v9 }
  0x59   : > { %1555 = vmatmul.mubr.bf16.gmra.mxu1 %v1979_v22  ;;  %v591_v17 = vor.u32 %v590_v11, %v586_v10 }
  0x5a   : > { %2320 = vmatpush3.bf16.msra.mxu1 %v2453_v9  ;;  %1562 = vmatprep.mubr.bf16.mxu1 %v2455_v23  ;;  %v556_v9 = vor.u32 %v555_v2, %v551_v62 }
  0x5b   : > { %2293 = vmatpush3.bf16.msra.mxu0 %v2454_v14  ;;  %2313 = vmatprep.subr.bf16.mxu1 %v2454_v14  ;;  %v1999_v19 = vcombine.low %v591_v17, %v598_v18 }
  0x5c   : > { %2294 = vmatprep.subr.bf16.mxu0 %v2460_v30 }
  0x5e   : > { %1498 = vmatmul.mubr.bf16.gmra.mxu0 %v2456_v27  ;;  %2321 = vmatpush3.bf16.msra.mxu1 %v2454_v14  ;;  %v1972_v14 = vcombine.low %v549_v8, %v556_v9 }
  0x5f   : > { %1505 = vmatprep.mubr.bf16.mxu0 %v1996_v31  ;;  %2295 = vmatpush3.bf16.msra.mxu0 %v2460_v30 }
  0x60   : > { %2296 = vmatprep.subr.bf16.mxu0 %v2461_v33  ;;  %2314 = vmatprep.subr.bf16.mxu1 %v2460_v30 }
  0x61   : > { %1563 = vmatmul.mubr.bf16.gmra.mxu1 %v1988_v42 }
  0x62   : > { %2322 = vmatpush3.bf16.msra.mxu1 %v2460_v30  ;;  %1570 = vmatprep.mubr.bf16.mxu1 %v2462_v47 }
  0x63   : > { %2297 = vmatpush3.bf16.msra.mxu0 %v2461_v33  ;;  %2315 = vmatprep.subr.bf16.mxu1 %v2461_v33 }
  0x64   : > { %2298 = vmatprep.subr.bf16.mxu0 %v2467_v57 }
  0x66   : > { %1506 = vmatmul.mubr.bf16.gmra.mxu0 %v2463_v55  ;;  %2323 = vmatpush3.bf16.msra.mxu1 %v2461_v33 }
  0x67   : > { %2299 = vmatpush3.bf16.msra.mxu0 %v2467_v57  ;;  %2316 = vmatprep.subr.bf16.mxu1 %v2467_v57 }
  0x68   : > { %2300 = vmatprep.subr.bf16.mxu0 %v2468_v0  ;;  %2302 = vmatprep.mubr.bf16.mxu0 %v1972_v14 }
  0x69   : > { %1571 = vmatmul.mubr.bf16.gmra.mxu1 %v1997_v7 }
  0x6a   : > { %2324 = vmatpush3.bf16.msra.mxu1 %v2467_v57  ;;  %2306 = vmatprep.mubr.bf16.mxu1 %v1990_v15 }
  0x6b   : > { %2301 = vmatpush3.bf16.msra.mxu0 %v2468_v0  ;;  %2317 = vmatprep.subr.bf16.mxu1 %v2468_v0 }
  0x6e   : > { %2303 = vmatmul.mubr.bf16.vlgmr.msra.gmra.mxu0 %v1981_v16  ;;  %2325 = vmatpush3.bf16.msra.mxu1 %v2468_v0 }
  0x71   : > { %2307 = vmatmul.mubr.bf16.vlgmr.msra.gmra.mxu1 %v1999_v19 }
  0xee   : > { %v2130_v20 = vpop.f32.mrf.mxu0 }
  0xef   : > { %v2170_v23 = vpop.f32.mrf.mxu1 }
  0xf0   : > { %v2131_v21 = vpop.f32.mrf.mxu0 }
  0xf1   : > { %v2171_v25 = vpop.f32.mrf.mxu1  ;;  %v2132_v9 = vadd.f32 %v2131_v21, %v2130_v20 }
  0xf2   : > { %v2133_v22 = vpop.f32.mrf.mxu0  ;;  %v2172_v10 = vadd.f32 %v2171_v25, %v2170_v23 }
  0xf3   : > { %v2173_v27 = vpop.f32.mrf.mxu1 }
  0xf4   : > { %v2134_v24 = vpop.f32.mrf.mxu0 }
  0xf5   : > { %v2174_v29 = vpop.f32.mrf.mxu1  ;;  %v2135_v11 = vadd.f32 %v2134_v24, %v2133_v22 }
  0xf6   : > { %v2136_v26 = vpop.f32.mrf.mxu0  ;;  %v2175_v12 = vadd.f32 %v2174_v29, %v2173_v27 }
  0xf7   : > { %v2176_v31 = vpop.f32.mrf.mxu1 }
  0xf8   : > { %v2137_v28 = vpop.f32.mrf.mxu0 }
  0xf9   : > { %v2177_v33 = vpop.f32.mrf.mxu1  ;;  %v2138_v15 = vadd.f32 %v2137_v28, %v2136_v26 }
  0xfa   : > { %v2139_v30 = vpop.f32.mrf.mxu0  ;;  %v2178_v16 = vadd.f32 %v2177_v33, %v2176_v31 }
  0xfb   : > { %v2179_v34 = vpop.f32.mrf.mxu1 }
  0xfc   : > { %v2140_v32 = vpop.f32.mrf.mxu0  ;;  %v1427_v26 = vadd.f32 %v2178_v16, %v2138_v15 }
  0xfd   : > { %v2180_v37 = vpop.f32.mrf.mxu1  ;;  %v2141_v17 = vadd.f32 %v2140_v32, %v2139_v30 }
  0xfe   : > { %v2873_v35 = vpop.f32.mrf.mxu0  ;;  %v2181_v18 = vadd.f32 %v2180_v37, %v2179_v34 }
  0xff   : > { %v2879_v39 = vpop.f32.mrf.mxu1 }
 0x100   : > { %v2875_v36 = vpop.f32.mrf.mxu0  ;;  %v1430_v27 = vadd.f32 %v2181_v18, %v2141_v17 }
 0x101   : > { %v2183_v41 = vpop.f32.mrf.mxu1  ;;  %v2144_v28 = vadd.f32 %v2875_v36, %v2873_v35 }
 0x102   : > { %v2877_v38 = vpop.f32.mrf.mxu0  ;;  %v2184_v32 = vadd.f32 %v2183_v41, %v2879_v39 }
 0x103   : > { %2939 = vst [vmem:[#allocation2_spill] sm:$0xff] %v2877_v38  ;;  %v2883_v43 = vpop.f32.mrf.mxu1 }
 0x104   : > { %v2881_v40 = vpop.f32.mrf.mxu0  ;;  %2941 = vst [vmem:[#allocation4_spill] sm:$0xff] %v2883_v43  ;;  %v1422_v43 = vadd.f32 %v2175_v12, %v2135_v11 }
 0x105   : > { %2940 = vst [vmem:[#allocation3_spill] sm:$0xff] %v2881_v40  ;;  %v2186_v46 = vpop.f32.mrf.mxu1 }
 0x106   : > { %v2148_v42 = vpop.f32.mrf.mxu0 }
 0x108   : > { %v2149_v44 = vpop.f32.mrf.mxu0 }
 0x109   : > { %v2188_v48 = vpop.f32.mrf.mxu1  ;;  %v2150_v40 = vadd.f32 %v2149_v44, %v2148_v42 }
 0x10a   : > { %v2151_v45 = vpop.f32.mrf.mxu0  ;;  %v2945_v33 = vld [vmem:[#allocation2_spill] sm:$0xff] }
 0x10b   : > { %v2189_v50 = vpop.f32.mrf.mxu1 }
 0x10c   : > { %v2152_v47 = vpop.f32.mrf.mxu0  ;;  %v2190_v22 = vadd.f32 %v2189_v50, %v2188_v48  ;;  %v2946_v34 = vld [vmem:[#allocation3_spill] sm:$0xff] }
 0x10d   : > { %v2191_v52 = vpop.f32.mrf.mxu1  ;;  %v2153_v23 = vadd.f32 %v2152_v47, %v2151_v45  ;;  %v2147_v37 = vadd.f32 %v2946_v34, %v2945_v33  ;;  %v2947_v45 = vld [vmem:[#allocation4_spill] sm:$0xff] }
 0x10e   : > { %v2210_v49 = vpop.f32.mrf.mxu0  ;;  %v2187_v47 = vadd.f32 %v2186_v46, %v2947_v45  ;;  %v1443_v35 = vadd.f32 %v2190_v22, %v2150_v40 }
 0x10f   : > { %v2192_v54 = vpop.f32.mrf.mxu1 }
 0x110   : > { %v2211_v51 = vpop.f32.mrf.mxu0  ;;  %v2193_v24 = vadd.f32 %v2192_v54, %v2191_v52 }
 0x111   : > { %v2250_v56 = vpop.f32.mrf.mxu1  ;;  %v2212_v25 = vadd.f32 %v2211_v51, %v2210_v49 }
 0x112   : > { %v2213_v53 = vpop.f32.mrf.mxu0  ;;  %v1446_v36 = vadd.f32 %v2193_v24, %v2153_v23 }
 0x113   : > { %v2251_v57 = vpop.f32.mrf.mxu1 }
 0x114   : > { %v2214_v55 = vpop.f32.mrf.mxu0 }
 0x115   : > { %v2885_v61 = vpop.f32.mrf.mxu1  ;;  %v2215_v29 = vadd.f32 %v2214_v55, %v2213_v53  ;;  %v2252_v53 = vadd.f32 %v2251_v57, %v2250_v56 }
 0x116   : > { %v2216_v60 = vpop.f32.mrf.mxu0  ;;  %2942 = vst [vmem:[#allocation5_spill] sm:$0xff] %v2885_v61  ;;  %v1419_v61 = vadd.f32 %v2172_v10, %v2132_v9  ;;  %v1438_v10 = vadd.f32 %v2187_v47, %v2147_v37 }
 0x117   : > { %v2887_v63 = vpop.f32.mrf.mxu1  ;;  %v1487_v41 = vadd.f32 %v2215_v29, %v1422_v43 }
 0x118   : > { %v2217_v62 = vpop.f32.mrf.mxu0  ;;  %2943 = vst [vmem:[#allocation6_spill] sm:$0xff] %v2887_v63  ;;  %v1484_v52 = vadd.f32 %v2212_v25, %v1419_v61 }
 0x119   : > { %v2256_v59 = vpop.f32.mrf.mxu1 }
 0x11a   : > { %v2219_v58 = vpop.f32.mrf.mxu0  ;;  %v1549_v57 = vadd.f32 %v2252_v53, %v1484_v52 }
 0x11b   : > { %v2257_v1 = vpop.f32.mrf.mxu1 }
 0x11c   : > { %v2220_v0 = vpop.f32.mrf.mxu0  ;;  %v2258_v49 = vadd.f32 %v2257_v1, %v2256_v59 }
 0x11d   : > { %v2259_v3 = vpop.f32.mrf.mxu1  ;;  %v2221_v38 = vadd.f32 %v2220_v0, %v2219_v58  ;;  %v2948_v0 = vld [vmem:[#allocation5_spill] sm:$0xff] }
 0x11e   : > { %v2222_v2 = vpop.f32.mrf.mxu0 }
 0x11f   : > { %v2260_v5 = vpop.f32.mrf.mxu1  ;;  %v1495_v50 = vadd.f32 %v2221_v38, %v1430_v27  ;;  %v1435_v38 = vadd.f32 %v2184_v32, %v2144_v28  ;;  %v2949_v1 = vld [vmem:[#allocation6_spill] sm:$0xff] }
 0x120   : > { %v2223_v4 = vpop.f32.mrf.mxu0  ;;  %v2261_v54 = vadd.f32 %v2260_v5, %v2259_v3 }
 0x121   : > { %v2889_v7 = vpop.f32.mrf.mxu1  ;;  %v2224_v55 = vadd.f32 %v2223_v4, %v2222_v2 }
 0x122   : > { %v2225_v6 = vpop.f32.mrf.mxu0  ;;  %2944 = vst [vmem:[#allocation7_spill] sm:$0xff] %v2889_v7  ;;  %v2218_v7 = vadd.f32 %v2217_v62, %v2216_v60  ;;  %v1560_v61 = vadd.f32 %v2261_v54, %v1495_v50 }
 0x123   : > { %v2891_v13 = vpop.f32.mrf.mxu1  ;;  %v1500_v3 = vadd.f32 %v2224_v55, %v1435_v38 }
 0x124   : > { %v2226_v8 = vpop.f32.mrf.mxu0  ;;  %v1492_v48 = vadd.f32 %v2218_v7, %v1427_v26  ;;  %v2255_v7 = vadd.f32 %v2949_v1, %v2948_v0 }
 0x125   : > { %v2893_v19 = vpop.f32.mrf.mxu1  ;;  %v2227_v62 = vadd.f32 %v2226_v8, %v2225_v6 }
 0x126   : > { %v2228_v14 = vpop.f32.mrf.mxu0  ;;  %v1557_v40 = vadd.f32 %v2258_v49, %v1492_v48  ;;  %v1552_v6 = vadd.f32 %v2255_v7, %v1487_v41 }
 0x127   : > { %v2266_v20 = vpop.f32.mrf.mxu1  ;;  %v1503_v12 = vadd.f32 %v2227_v62, %v1438_v10 }
 0x128   : > { %v2229_v63 = vpop.f32.mrf.mxu0  ;;  %v2267_v23 = vadd.f32 %v2266_v20, %v2893_v19 }
 0x129   : > { %v2268_v30 = vpop.f32.mrf.mxu1  ;;  %v2230_v42 = vadd.f32 %v2229_v63, %v2228_v14  ;;  %v2950_v8 = vld [vmem:[#allocation7_spill] sm:$0xff] }
 0x12a   : > { %v2231_v21 = vpop.f32.mrf.mxu0  ;;  %v2264_v11 = vadd.f32 %v2891_v13, %v2950_v8  ;;  %v1568_v28 = vadd.f32 %v2267_v23, %v1503_v12 }
 0x12b   : > { %v2269_v51 = vpop.f32.mrf.mxu1  ;;  %v1508_v63 = vadd.f32 %v2230_v42, %v1443_v35 }
 0x12c   : > { %v2232_v31 = vpop.f32.mrf.mxu0  ;;  %v2270_v46 = vadd.f32 %v2269_v51, %v2268_v30  ;;  %v1565_v26 = vadd.f32 %v2264_v11, %v1500_v3 }
 0x12d   : > { %v2233_v44 = vadd.f32 %v2232_v31, %v2231_v21  ;;  %v2271_v60 = vpop.f32.mrf.mxu1 }
 0x12e   : > { %v2304_v39 = vpop.f32.mrf.mxu0  ;;  %v1573_v14 = vadd.f32 %v2270_v46, %v1508_v63 }
 0x12f   : > { %v1511_v58 = vadd.f32 %v2233_v44, %v1446_v36  ;;  %v2272_v9 = vpop.f32.mrf.mxu1  ;;  %v1622_v2 = vadd.f32 %v2304_v39, %v1557_v40 }
 0x130   : > { %v1613_v59 = vpop.f32.mrf.mxu0  ;;  %v2273_v56 = vadd.f32 %v2272_v9, %v2271_v60 }
 0x131   : > { %v2308_v4 = vpop.f32.mrf.mxu1  ;;  %v1614_v17 = vadd.f32 %v1613_v59, %v1549_v57 }
 0x132   : > { %v2305_v43 = vpop.f32.mrf.mxu0  ;;  %v1576_v15 = vadd.f32 %v2273_v56, %v1511_v58  ;;  %v1638_v25 = vadd.f32 %v2308_v4, %v1573_v14 }
 0x133   : > { %v1625_v5 = vadd.f32 %v2305_v43, %v1560_v61  ;;  %v1629_v18 = vpop.f32.mrf.mxu1 }
 0x134   : > { %v1616_v16 = vpop.f32.mrf.mxu0  ;;  %v1630_v33 = vadd.f32 %v1629_v18, %v1565_v26 }
 0x135   : > { %v1645_v21 = vpack.c.bf16 %v1625_v5, %v1622_v2  ;;  %v1617_v22 = vadd.f32 %v1616_v16, %v1552_v6  ;;  %v2309_v24 = vpop.f32.mrf.mxu1 }
 0x136   : > { %v1641_v27 = vadd.f32 %v2309_v24, %v1576_v15 }
 0x137   : > { %2111 = vst [vmem:[%s2915_s6 + $0x8] sm:$0xff] %v1645_v21   ;;  %v1644_v13 = vpack.c.bf16 %v1617_v22, %v1614_v17  ;;  %v1686_v29 = vunpack.c.l.bf16 %v1645_v21  ;;  %v1632_v32 = vpop.f32.mrf.mxu1  ;;  %v1687_v42 = vunpack.c.h.bf16 %v1645_v21 }
 0x138   : > { %v1647_v34 = vpack.c.bf16 %v1641_v27, %v1638_v25  ;;  %v1633_v37 = vadd.f32 %v1632_v32, %v1568_v28 }
 0x139   : > { %2095 = vst [vmem:[%s2915_s6] sm:$0xff] %v1644_v13   ;;  %v1684_v30 = vunpack.c.l.bf16 %v1644_v13  ;;  %v1685_v31 = vunpack.c.h.bf16 %v1644_v13  ;;  %v1707_v47 = vmul.f32 %v1686_v29, %v1686_v29  ;;  %v1708_v51 = vmul.f32 %v1687_v42, %v1687_v42 }
 0x13a   : > { %2113 = vst [vmem:[%s2915_s6 + $0x18] sm:$0xff] %v1647_v34   ;;  %v1646_v45 = vpack.c.bf16 %v1633_v37, %v1630_v33  ;;  %v1690_v53 = vunpack.c.l.bf16 %v1647_v34  ;;  %v1691_v55 = vunpack.c.h.bf16 %v1647_v34 }
 0x13b   : > { %v1692_v44 = vadd.f32 %v1685_v31, %v1684_v30  ;;  %v1705_v19 = vmul.f32 %v1684_v30, %v1684_v30  ;;  %v1706_v20 = vmul.f32 %v1685_v31, %v1685_v31 }
 0x13c   : > { %2112 = vst [vmem:[%s2915_s6 + $0x10] sm:$0xff] %v1646_v45   ;;  %v1688_v50 = vunpack.c.l.bf16 %v1646_v45  ;;  %v1689_v36 = vunpack.c.h.bf16 %v1646_v45  ;;  %v1711_v46 = vmul.f32 %v1690_v53, %v1690_v53  ;;  %v1712_v38 = vmul.f32 %v1691_v55, %v1691_v55 }
 0x13d   : > { %v1693_v48 = vadd.f32 %v1692_v44, %v1686_v29  ;;  %v1713_v49 = vadd.f32 %v1706_v20, %v1705_v19 }
 0x13e   : > { %v1709_v41 = vmul.f32 %v1688_v50, %v1688_v50  ;;  %v1710_v62 = vmul.f32 %v1689_v36, %v1689_v36 }
 0x13f   : > { %v1714_v35 = vadd.f32 %v1713_v49, %v1707_v47  ;;  %v1694_v52 = vadd.f32 %v1693_v48, %v1687_v42 }
 0x141   : > { %v1695_v39 = vadd.f32 %v1694_v52, %v1688_v50  ;;  %v1715_v54 = vadd.f32 %v1714_v35, %v1708_v51 }
 0x143   : > { %v1696_v60 = vadd.f32 %v1695_v39, %v1689_v36  ;;  %v1716_v63 = vadd.f32 %v1715_v54, %v1709_v41 }
 0x145   : > { %v1697_v58 = vadd.f32 %v1696_v60, %v1690_v53  ;;  %v1717_v59 = vadd.f32 %v1716_v63, %v1710_v62 }
 0x147   : > { %v1698_v0 = vadd.f32 %v1697_v58, %v1691_v55  ;;  %v1718_v1 = vadd.f32 %v1717_v59, %v1711_v46 }
 0x149   : > { %v1699_v7 = vrot.slane %v1698_v0, 4  ;;  %v1719_v9 = vadd.f32 %v1718_v1, %v1712_v38 }
 0x14b   : > { %v1700_v40 = vadd.f32 %v1699_v7, %v1698_v0  ;;  %v1720_v61 = vrot.slane %v1719_v9, 4 }
 0x14d   : > { %v1701_v10 = vrot.slane %v1700_v40, 2  ;;  %v1721_v56 = vadd.f32 %v1720_v61, %v1719_v9 }
 0x14f   : > { %v1702_v57 = vadd.f32 %v1701_v10, %v1700_v40  ;;  %v1722_v43 = vrot.slane %v1721_v56, 2 }
 0x151   : > { %v1703_v3 = vrot.slane %v1702_v57, 1  ;;  %v1723_v2 = vadd.f32 %v1722_v43, %v1721_v56 }
 0x153   : > { %v1724_v4 = vrot.slane %v1723_v2, 1  ;;  %v1704_v5 = vadd.f32 %v1703_v3, %v1702_v57 }
 0x155   : > { %v1725_v6 = vadd.f32 %v1724_v4, %v1723_v2 }
 0x157   : > { %v1727_v8 = vsel %vm1726_vm0, %v1704_v5, %v1725_v6 }
 0x158   : > { %1728 = vst [vmem:[%s217_s27] sm:$0x3] %v1727_v8 }
 0x159 PF: > { %s14_s14 = sadd.s32 1, %s2493_s14   ;;  %s2951_s12 = smov %s2489_s13 }
 0x15a   : > { %p11_p6 = scmp.ge.s32.totalorder %s14_s14, 4   ;;  %s2952_s13 = smov %s2954_s15 }
 0x15c   :  { %13 = sbr.rel (!%p11_p6) target bundleno = 2 (0x2), region = 76 }

// kernel: res_block_forward.9
= control target key start
LH: loop header
LB: loop body
LE: loop exit
PB: predicated region body
PF: predicated region fallthrough
CT: control target
= control target key end

     0   :  { %s647_s0 = inlined_call_operand.vmem [shape: bf16[128,128], index: 0, kind: input, shape index: {}]   ;;  %s648_s1 = inlined_call_operand.vmem [shape: f32[1,128], index: 1, kind: input, shape index: {}]   ;;  %s649_s2 = inlined_call_operand.vmem [shape: f32[1,128], index: 2, kind: input, shape index: {}]   ;;  %s650_s3 = inlined_call_operand.vmem [shape: bf16[128,128], index: 3, kind: input, shape index: {}]   ;;  %s651_s4 = inlined_call_operand.vmem [shape: f32[1,128], index: 4, kind: input, shape index: {}]   ;;  %s652_s5 = inlined_call_operand.vmem [shape: f32[1,128], index: 5, kind: input, shape index: {}]   ;;  %s653_s6 = inlined_call_operand.vmem [shape: bf16[128,128], index: 6, kind: output, shape index: {}]  }
   0x1   :  { %v332_v0 = vld [vmem:[%s647_s0] sm:$0xff]   ;;  %v435_v9 = vld [vmem:[%s647_s0 + $0x8] sm:$0xff]   ;;  %v436_v20 = vld [vmem:[%s647_s0 + $0x10] sm:$0xff]  }
   0x2   :  { %v497_v1 = vld [vmem:[%s648_s1] ss:$0 sm:$0xff]  ;;  %v333_v2 = vunpack.c.l.bf16 %v332_v0  ;;  %v334_v3 = vunpack.c.h.bf16 %v332_v0  ;;  %v442_v10 = vld [vmem:[%s650_s3 + $0x8] sm:$0xff]   ;;  %v337_v14 = vunpack.c.l.bf16 %v435_v9  ;;  %v338_v15 = vunpack.c.h.bf16 %v435_v9  ;;  %v443_v29 = vld [vmem:[%s650_s3 + $0x10] sm:$0xff]  }
   0x3   :  { %v364_v4 = vld [vmem:[%s650_s3] sm:$0xff]   ;;  %v369_v18 = vunpack.c.l.bf16 %v442_v10  ;;  %v370_v19 = vunpack.c.h.bf16 %v442_v10  ;;  %v341_v32 = vunpack.c.l.bf16 %v436_v20  ;;  %v342_v33 = vunpack.c.h.bf16 %v436_v20  ;;  %v437_v42 = vld [vmem:[%s647_s0 + $0x18] sm:$0xff]  }
   0x4   :  { %v505_v5 = vld [vmem:[%s651_s4] ss:$0 sm:$0xff]  ;;  %v365_v7 = vunpack.c.l.bf16 %v364_v4  ;;  %v366_v8 = vunpack.c.h.bf16 %v364_v4  ;;  %v62_v11 = vmul.f32 %v333_v2, %v497_v1  ;;  %v63_v12 = vmul.f32 %v334_v3, %v497_v1  ;;  %v444_v47 = vld [vmem:[%s650_s3 + $0x18] sm:$0xff]  }
   0x5   :  { %v510_v6 = vld [vmem:[%s649_s2] ss:$0 sm:$0xff]  ;;  %v64_v23 = vmul.f32 %v337_v14, %v497_v1  ;;  %v65_v24 = vmul.f32 %v338_v15, %v497_v1  ;;  %v142_v27 = vmul.f32 %v369_v18, %v505_v5  ;;  %v143_v28 = vmul.f32 %v370_v19, %v505_v5  ;;  %v439_v14 = vld [vmem:[%s647_s0 + $0x28] sm:$0xff]  }
   0x6   :  { %v523_v13 = vld [vmem:[%s652_s5] ss:$0 sm:$0xff]  ;;  %v140_v16 = vmul.f32 %v365_v7, %v505_v5  ;;  %v141_v17 = vmul.f32 %v366_v8, %v505_v5  ;;  %v85_v21 = vadd.f32 %v510_v6, %v62_v11  ;;  %v86_v22 = vadd.f32 %v510_v6, %v63_v12 }
   0x7   :  { %v87_v30 = vadd.f32 %v510_v6, %v64_v23  ;;  %v88_v31 = vadd.f32 %v510_v6, %v65_v24  ;;  %v165_v36 = vadd.f32 %v523_v13, %v142_v27  ;;  %v166_v37 = vadd.f32 %v523_v13, %v143_v28  ;;  %v438_v52 = vld [vmem:[%s647_s0 + $0x20] sm:$0xff]   ;;  %v446_v23 = vld [vmem:[%s650_s3 + $0x28] sm:$0xff]  }
   0x8   :  { %v163_v25 = vadd.f32 %v523_v13, %v140_v16  ;;  %v164_v26 = vadd.f32 %v523_v13, %v141_v17  ;;  %v66_v38 = vmul.f32 %v341_v32, %v497_v1  ;;  %v67_v39 = vmul.f32 %v342_v33, %v497_v1  ;;  %v445_v8 = vld [vmem:[%s650_s3 + $0x20] sm:$0xff]   ;;  %v440_v32 = vld [vmem:[%s647_s0 + $0x30] sm:$0xff]  }
   0x9   :  { %v373_v40 = vunpack.c.l.bf16 %v443_v29  ;;  %v374_v41 = vunpack.c.h.bf16 %v443_v29  ;;  %v181_v45 = vadd.f32 %v165_v36, %v87_v30  ;;  %v182_v46 = vadd.f32 %v166_v37, %v88_v31 }
   0xa   :  { %v179_v34 = vadd.f32 %v163_v25, %v85_v21  ;;  %v180_v35 = vadd.f32 %v164_v26, %v86_v22  ;;  %v89_v48 = vadd.f32 %v510_v6, %v66_v38  ;;  %v90_v49 = vadd.f32 %v510_v6, %v67_v39 }
   0xb   :  { %v144_v50 = vmul.f32 %v373_v40, %v505_v5  ;;  %v145_v51 = vmul.f32 %v374_v41, %v505_v5  ;;  %v197_v54 = vmax.f32 %v181_v45, 0.0  ;;  %v198_v55 = vmax.f32 %v182_v46, 0.0  ;;  %v447_v45 = vld [vmem:[%s650_s3 + $0x30] sm:$0xff]  }
   0xc   :  { %v195_v43 = vmax.f32 %v179_v34, 0.0  ;;  %v196_v44 = vmax.f32 %v180_v35, 0.0  ;;  %v345_v56 = vunpack.c.l.bf16 %v437_v42  ;;  %v346_v59 = vunpack.c.h.bf16 %v437_v42 }
   0xd   :  { %v167_v57 = vadd.f32 %v523_v13, %v144_v50  ;;  %v168_v58 = vadd.f32 %v523_v13, %v145_v51  ;;  %v377_v60 = vunpack.c.l.bf16 %v444_v47  ;;  %v403_v61 = vpack.c.bf16 %v198_v55, %v197_v54  ;;  %v441_v54 = vld [vmem:[%s647_s0 + $0x38] sm:$0xff]  }
   0xe   :  { %v398_v53 = vpack.c.bf16 %v196_v44, %v195_v43  ;;  %v68_v62 = vmul.f32 %v345_v56, %v497_v1  ;;  %v378_v63 = vunpack.c.h.bf16 %v444_v47  ;;  %v349_v0 = vunpack.c.l.bf16 %v438_v52 }
   0xf   :  { %v183_v2 = vadd.f32 %v167_v57, %v89_v48  ;;  %v184_v3 = vadd.f32 %v168_v58, %v90_v49  ;;  %v69_v4 = vmul.f32 %v346_v59, %v497_v1  ;;  %v146_v7 = vmul.f32 %v377_v60, %v505_v5  ;;  %449 = vst [vmem:[%s653_s6 + $0x8] sm:$0xff] %v403_v61  }
  0x10   :  { %399 = vst [vmem:[%s653_s6] sm:$0xff] %v398_v53   ;;  %v91_v9 = vadd.f32 %v510_v6, %v68_v62  ;;  %v147_v10 = vmul.f32 %v378_v63, %v505_v5  ;;  %v350_v11 = vunpack.c.h.bf16 %v438_v52  ;;  %v70_v12 = vmul.f32 %v349_v0, %v497_v1 }
  0x11   :  { %v199_v15 = vmax.f32 %v183_v2, 0.0  ;;  %v200_v16 = vmax.f32 %v184_v3, 0.0  ;;  %v92_v17 = vadd.f32 %v510_v6, %v69_v4  ;;  %v169_v18 = vadd.f32 %v523_v13, %v146_v7  ;;  %v448_v4 = vld [vmem:[%s650_s3 + $0x38] sm:$0xff]  }
  0x12   :  { %v170_v19 = vadd.f32 %v523_v13, %v147_v10  ;;  %v71_v20 = vmul.f32 %v350_v11, %v497_v1  ;;  %v93_v21 = vadd.f32 %v510_v6, %v70_v12  ;;  %v381_v22 = vunpack.c.l.bf16 %v445_v8 }
  0x13   :  { %v408_v24 = vpack.c.bf16 %v200_v16, %v199_v15  ;;  %v185_v25 = vadd.f32 %v169_v18, %v91_v9  ;;  %v382_v26 = vunpack.c.h.bf16 %v445_v8  ;;  %v353_v27 = vunpack.c.l.bf16 %v439_v14 }
  0x14   :  { %v186_v28 = vadd.f32 %v170_v19, %v92_v17  ;;  %v94_v29 = vadd.f32 %v510_v6, %v71_v20  ;;  %v148_v30 = vmul.f32 %v381_v22, %v505_v5  ;;  %v354_v31 = vunpack.c.h.bf16 %v439_v14 }
  0x15   :  { %450 = vst [vmem:[%s653_s6 + $0x10] sm:$0xff] %v408_v24   ;;  %v201_v33 = vmax.f32 %v185_v25, 0.0  ;;  %v149_v34 = vmul.f32 %v382_v26, %v505_v5  ;;  %v72_v35 = vmul.f32 %v353_v27, %v497_v1  ;;  %v385_v36 = vunpack.c.l.bf16 %v446_v23 }
  0x16   :  { %v202_v37 = vmax.f32 %v186_v28, 0.0  ;;  %v171_v38 = vadd.f32 %v523_v13, %v148_v30  ;;  %v73_v39 = vmul.f32 %v354_v31, %v497_v1  ;;  %v386_v40 = vunpack.c.h.bf16 %v446_v23 }
  0x17   :  { %v172_v41 = vadd.f32 %v523_v13, %v149_v34  ;;  %v95_v42 = vadd.f32 %v510_v6, %v72_v35  ;;  %v150_v43 = vmul.f32 %v385_v36, %v505_v5  ;;  %v357_v44 = vunpack.c.l.bf16 %v440_v32 }
  0x18   :  { %v413_v46 = vpack.c.bf16 %v202_v37, %v201_v33  ;;  %v187_v47 = vadd.f32 %v171_v38, %v93_v21  ;;  %v96_v48 = vadd.f32 %v510_v6, %v73_v39  ;;  %v151_v49 = vmul.f32 %v386_v40, %v505_v5 }
  0x19   :  { %v188_v50 = vadd.f32 %v172_v41, %v94_v29  ;;  %v173_v51 = vadd.f32 %v523_v13, %v150_v43  ;;  %v358_v52 = vunpack.c.h.bf16 %v440_v32  ;;  %v74_v53 = vmul.f32 %v357_v44, %v497_v1 }
  0x1a   :  { %451 = vst [vmem:[%s653_s6 + $0x18] sm:$0xff] %v413_v46   ;;  %v203_v55 = vmax.f32 %v187_v47, 0.0  ;;  %v174_v56 = vadd.f32 %v523_v13, %v151_v49  ;;  %v389_v57 = vunpack.c.l.bf16 %v447_v45  ;;  %v390_v58 = vunpack.c.h.bf16 %v447_v45 }
  0x1b   :  { %v204_v59 = vmax.f32 %v188_v50, 0.0  ;;  %v189_v60 = vadd.f32 %v173_v51, %v95_v42  ;;  %v75_v61 = vmul.f32 %v358_v52, %v497_v1  ;;  %v97_v62 = vadd.f32 %v510_v6, %v74_v53 }
  0x1c   :  { %v190_v63 = vadd.f32 %v174_v56, %v96_v48  ;;  %v152_v0 = vmul.f32 %v389_v57, %v505_v5  ;;  %v153_v2 = vmul.f32 %v390_v58, %v505_v5  ;;  %v361_v3 = vunpack.c.l.bf16 %v441_v54 }
  0x1d   :  { %v418_v7 = vpack.c.bf16 %v204_v59, %v203_v55  ;;  %v205_v8 = vmax.f32 %v189_v60, 0.0  ;;  %v98_v9 = vadd.f32 %v510_v6, %v75_v61  ;;  %v362_v10 = vunpack.c.h.bf16 %v441_v54 }
  0x1e   :  { %v206_v11 = vmax.f32 %v190_v63, 0.0  ;;  %v175_v12 = vadd.f32 %v523_v13, %v152_v0  ;;  %v176_v14 = vadd.f32 %v523_v13, %v153_v2  ;;  %v76_v15 = vmul.f32 %v361_v3, %v497_v1 }
  0x1f   :  { %452 = vst [vmem:[%s653_s6 + $0x20] sm:$0xff] %v418_v7   ;;  %v77_v16 = vmul.f32 %v362_v10, %v497_v1  ;;  %v393_v17 = vunpack.c.l.bf16 %v448_v4  ;;  %v394_v18 = vunpack.c.h.bf16 %v448_v4 }
  0x20   :  { %v423_v19 = vpack.c.bf16 %v206_v11, %v205_v8  ;;  %v191_v20 = vadd.f32 %v175_v12, %v97_v62  ;;  %v192_v21 = vadd.f32 %v176_v14, %v98_v9  ;;  %v99_v22 = vadd.f32 %v510_v6, %v76_v15 }
  0x21   :  { %v100_v23 = vadd.f32 %v510_v6, %v77_v16  ;;  %v154_v24 = vmul.f32 %v393_v17, %v505_v5  ;;  %v155_v25 = vmul.f32 %v394_v18, %v505_v5 }
  0x22   :  { %453 = vst [vmem:[%s653_s6 + $0x28] sm:$0xff] %v423_v19   ;;  %v207_v26 = vmax.f32 %v191_v20, 0.0  ;;  %v208_v27 = vmax.f32 %v192_v21, 0.0 }
  0x23   :  { %v177_v1 = vadd.f32 %v523_v13, %v154_v24  ;;  %v178_v28 = vadd.f32 %v523_v13, %v155_v25 }
  0x24   :  { %v428_v29 = vpack.c.bf16 %v208_v27, %v207_v26 }
  0x25   :  { %v193_v30 = vadd.f32 %v177_v1, %v99_v22  ;;  %v194_v31 = vadd.f32 %v178_v28, %v100_v23 }
  0x26   :  { %454 = vst [vmem:[%s653_s6 + $0x30] sm:$0xff] %v428_v29  }
  0x27   :  { %v209_v6 = vmax.f32 %v193_v30, 0.0  ;;  %v210_v32 = vmax.f32 %v194_v31, 0.0 }
  0x29   :  { %v433_v5 = vpack.c.bf16 %v210_v32, %v209_v6 }
  0x2b   :  { %455 = vst [vmem:[%s653_s6 + $0x38] sm:$0xff] %v433_v5  }

// kernel: res_block_forward.8
= control target key start
LH: loop header
LB: loop body
LE: loop exit
PB: predicated region body
PF: predicated region fallthrough
CT: control target
= control target key end

     0   :  { %vm750_vm0 = vcmask 1040384   ;;  %s1430_s3 = inlined_call_operand.vmem [shape: bf16[128,128], index: 3, kind: input, shape index: {}]   ;;  %s1431_s5 = inlined_call_operand.vmem [shape: bf16[128,128], index: 5, kind: input, shape index: {}]   ;;  %s1432_s0 = inlined_call_operand.vmem [shape: bf16[128,128], index: 0, kind: input, shape index: {}]   ;;  %s1433_s1 = inlined_call_operand.vmem [shape: f32[1,128], index: 1, kind: input, shape index: {}]   ;;  %s1434_s2 = inlined_call_operand.vmem [shape: f32[1,128], index: 2, kind: input, shape index: {}]   ;;  %s1435_s4 = inlined_call_operand.vmem [shape: bf16[128,128], index: 4, kind: input, shape index: {}]   ;;  %s1436_s6 = inlined_call_operand.vmem [shape: bf16[128,128], index: 6, kind: output, shape index: {0}]   ;;  %s1437_s7 = inlined_call_operand.vmem [shape: bf16[128,128], index: 7, kind: output, shape index: {1}]   ;;  %s1438_s8 = inlined_call_operand.vmem [shape: f32[1,2,128], index: 8, kind: output, shape index: {2}]   ;;  %s1439_s9 = inlined_call_operand.vmem [shape: f32[1,2,128], index: 9, kind: output, shape index: {3}]  }
   0x1   :  { %v1164_v0 = vld [vmem:[%s1430_s3 + $0x38] sm:$0xff]   ;;  %v1166_v2 = vld [vmem:[%s1430_s3 + $0x30] sm:$0xff]   ;;  %v1168_v4 = vld [vmem:[%s1430_s3 + $0x28] sm:$0xff]  }
   0x2   :  { %v1165_v1 = vld [vmem:[%s1431_s5 + $0x38] sm:$0xff]   ;;  %1100 = vmatprep.subr.bf16.mxu0 %v1164_v0  ;;  %v1167_v3 = vld [vmem:[%s1431_s5 + $0x30] sm:$0xff]   ;;  %v1169_v5 = vld [vmem:[%s1431_s5 + $0x28] sm:$0xff]  }
   0x3   :  { %1132 = vmatprep.subr.bf16.mxu1 %v1165_v1  ;;  %1101 = vmatpush3.bf16.msra.mxu0 %v1164_v0  ;;  %v1170_v6 = vld [vmem:[%s1430_s3 + $0x20] sm:$0xff]   ;;  %v1172_v8 = vld [vmem:[%s1430_s3 + $0x18] sm:$0xff]   ;;  %v1174_v10 = vld [vmem:[%s1430_s3 + $0x10] sm:$0xff]  }
   0x4   :  { %1133 = vmatpush3.bf16.msra.mxu1 %v1165_v1  ;;  %1102 = vmatprep.subr.bf16.mxu0 %v1166_v2  ;;  %v1171_v7 = vld [vmem:[%s1431_s5 + $0x20] sm:$0xff]   ;;  %v1173_v9 = vld [vmem:[%s1431_s5 + $0x18] sm:$0xff]   ;;  %v1175_v11 = vld [vmem:[%s1431_s5 + $0x10] sm:$0xff]  }
   0x5   :  { %1134 = vmatprep.subr.bf16.mxu1 %v1167_v3  ;;  %v936_v12 = vld [vmem:[%s1432_s0] sm:$0xff]   ;;  %v1047_v18 = vld [vmem:[%s1432_s0 + $0x8] sm:$0xff]   ;;  %v1048_v23 = vld [vmem:[%s1432_s0 + $0x10] sm:$0xff]  }
   0x6   :  { %v1280_v13 = vld [vmem:[%s1433_s1] ss:$0 sm:$0xff]  ;;  %v937_v15 = vunpack.c.l.bf16 %v936_v12  ;;  %v938_v16 = vunpack.c.h.bf16 %v936_v12  ;;  %v941_v21 = vunpack.c.l.bf16 %v1047_v18  ;;  %v942_v22 = vunpack.c.h.bf16 %v1047_v18  ;;  %v1176_v24 = vld [vmem:[%s1430_s3 + $0x8] sm:$0xff]   ;;  %v1049_v27 = vld [vmem:[%s1432_s0 + $0x18] sm:$0xff]  }
   0x7   :  { %1103 = vmatpush3.bf16.msra.mxu0 %v1166_v2  ;;  %v1285_v14 = vld [vmem:[%s1434_s2] ss:$0 sm:$0xff]  ;;  %v945_v25 = vunpack.c.l.bf16 %v1048_v23  ;;  %v946_v26 = vunpack.c.h.bf16 %v1048_v23  ;;  %v1177_v28 = vld [vmem:[%s1431_s5 + $0x8] sm:$0xff]   ;;  %v949_v35 = vunpack.c.l.bf16 %v1049_v27  ;;  %v950_v36 = vunpack.c.h.bf16 %v1049_v27  ;;  %v1052_v58 = vld [vmem:[%s1432_s0 + $0x30] sm:$0xff]  }
   0x8   :  { %1135 = vmatpush3.bf16.msra.mxu1 %v1167_v3  ;;  %1104 = vmatprep.subr.bf16.mxu0 %v1168_v4  ;;  %v1180_v17 = vld [vmem:[%s1435_s4] sm:$0xff]   ;;  %v67_v19 = vmul.f32 %v937_v15, %v1280_v13  ;;  %v68_v20 = vmul.f32 %v938_v16, %v1280_v13  ;;  %v69_v31 = vmul.f32 %v941_v21, %v1280_v13  ;;  %v1051_v56 = vld [vmem:[%s1432_s0 + $0x28] sm:$0xff]   ;;  %v1183_v23 = vld [vmem:[%s1435_s4 + $0x18] sm:$0xff]  }
   0x9   :  { %1136 = vmatprep.subr.bf16.mxu1 %v1169_v5  ;;  %1148 = vmatprep.mubr.bf16.mxu1 %v1180_v17  ;;  %v70_v32 = vmul.f32 %v942_v22, %v1280_v13  ;;  %v71_v33 = vmul.f32 %v945_v25, %v1280_v13  ;;  %v72_v34 = vmul.f32 %v946_v26, %v1280_v13  ;;  %v1050_v37 = vld [vmem:[%s1432_s0 + $0x20] sm:$0xff]   ;;  %v957_v63 = vunpack.c.l.bf16 %v1051_v56  ;;  %v1181_v1 = vld [vmem:[%s1435_s4 + $0x8] sm:$0xff]  }
   0xa   :  { %v90_v29 = vadd.f32 %v1285_v14, %v67_v19  ;;  %v91_v30 = vadd.f32 %v1285_v14, %v68_v20  ;;  %v92_v40 = vadd.f32 %v1285_v14, %v69_v31  ;;  %v1178_v42 = vld [vmem:[%s1430_s3] sm:$0xff]   ;;  %v953_v46 = vunpack.c.l.bf16 %v1050_v37 }
   0xb   :  { %1105 = vmatpush3.bf16.msra.mxu0 %v1168_v4  ;;  %v93_v41 = vadd.f32 %v1285_v14, %v70_v32  ;;  %v1179_v43 = vld [vmem:[%s1431_s5] sm:$0xff]   ;;  %v94_v44 = vadd.f32 %v1285_v14, %v71_v33  ;;  %v95_v45 = vadd.f32 %v1285_v14, %v72_v34  ;;  %v73_v50 = vmul.f32 %v949_v35, %v1280_v13 }
   0xc   :  { %1137 = vmatpush3.bf16.msra.mxu1 %v1169_v5  ;;  %1106 = vmatprep.subr.bf16.mxu0 %v1170_v6  ;;  %v106_v38 = vmax.f32 %v90_v29, 0.0  ;;  %v107_v39 = vmax.f32 %v91_v30, 0.0  ;;  %v108_v48 = vmax.f32 %v92_v40, 0.0  ;;  %v74_v53 = vmul.f32 %v950_v36, %v1280_v13  ;;  %v1184_v27 = vld [vmem:[%s1435_s4 + $0x20] sm:$0xff]  }
   0xd   :  { %1138 = vmatprep.subr.bf16.mxu1 %v1171_v7  ;;  %v109_v49 = vmax.f32 %v93_v41, 0.0  ;;  %v110_v51 = vmax.f32 %v94_v44, 0.0  ;;  %v111_v52 = vmax.f32 %v95_v45, 0.0  ;;  %v954_v54 = vunpack.c.h.bf16 %v1050_v37  ;;  %v1185_v37 = vld [vmem:[%s1435_s4 + $0x28] sm:$0xff]  }
   0xe   :  { %v122_v47 = vpack.c.bf16 %v107_v39, %v106_v38  ;;  %v75_v55 = vmul.f32 %v953_v46, %v1280_v13  ;;  %v96_v60 = vadd.f32 %v1285_v14, %v73_v50  ;;  %v97_v62 = vadd.f32 %v1285_v14, %v74_v53  ;;  %v1186_v39 = vld [vmem:[%s1435_s4 + $0x30] sm:$0xff]  }
   0xf   :  { %1107 = vmatpush3.bf16.msra.mxu0 %v1170_v6  ;;  %v76_v57 = vmul.f32 %v954_v54, %v1280_v13  ;;  %v123_v59 = vpack.c.bf16 %v109_v49, %v108_v48  ;;  %v124_v61 = vpack.c.bf16 %v111_v52, %v110_v51  ;;  %v958_v0 = vunpack.c.h.bf16 %v1051_v56  ;;  %v1182_v6 = vld [vmem:[%s1435_s4 + $0x10] sm:$0xff]  }
  0x10   :  { %1139 = vmatpush3.bf16.msra.mxu1 %v1171_v7  ;;  %1108 = vmatprep.subr.bf16.mxu0 %v1172_v8  ;;  %v98_v2 = vadd.f32 %v1285_v14, %v75_v55  ;;  %v961_v4 = vunpack.c.l.bf16 %v1052_v58  ;;  %v962_v5 = vunpack.c.h.bf16 %v1052_v58  ;;  %v112_v7 = vmax.f32 %v96_v60, 0.0 }
  0x11   :  { %1140 = vmatprep.subr.bf16.mxu1 %v1173_v9  ;;  %1116 = vmatprep.mubr.bf16.mxu0 %v122_v47  ;;  %v99_v3 = vadd.f32 %v1285_v14, %v76_v57 }
  0x12   :  { %v114_v12 = vmax.f32 %v98_v2, 0.0  ;;  %v79_v16 = vmul.f32 %v961_v4, %v1280_v13  ;;  %v80_v17 = vmul.f32 %v962_v5, %v1280_v13 }
  0x13   :  { %1109 = vmatpush3.bf16.msra.mxu0 %v1172_v8  ;;  %v113_v8 = vmax.f32 %v97_v62, 0.0  ;;  %v115_v15 = vmax.f32 %v99_v3, 0.0 }
  0x14   :  { %1141 = vmatpush3.bf16.msra.mxu1 %v1173_v9  ;;  %1110 = vmatprep.subr.bf16.mxu0 %v1174_v10  ;;  %v77_v9 = vmul.f32 %v957_v63, %v1280_v13  ;;  %v102_v25 = vadd.f32 %v1285_v14, %v79_v16  ;;  %v103_v26 = vadd.f32 %v1285_v14, %v80_v17 }
  0x15   :  { %1142 = vmatprep.subr.bf16.mxu1 %v1175_v11  ;;  %v125_v19 = vpack.c.bf16 %v113_v8, %v112_v7 }
  0x16   :  { %v100_v20 = vadd.f32 %v1285_v14, %v77_v9  ;;  %v118_v32 = vmax.f32 %v102_v25, 0.0  ;;  %v119_v33 = vmax.f32 %v103_v26, 0.0 }
  0x17   :  { %1111 = vmatpush3.bf16.msra.mxu0 %v1174_v10  ;;  %v78_v10 = vmul.f32 %v958_v0, %v1280_v13 }
  0x18   :  { %1143 = vmatpush3.bf16.msra.mxu1 %v1175_v11  ;;  %1112 = vmatprep.subr.bf16.mxu0 %v1176_v24  ;;  %v1053_v11 = vld [vmem:[%s1432_s0 + $0x38] sm:$0xff]   ;;  %v128_v38 = vpack.c.bf16 %v119_v33, %v118_v32 }
  0x19   :  { %1144 = vmatprep.subr.bf16.mxu1 %v1177_v28  ;;  %v965_v18 = vunpack.c.l.bf16 %v1053_v11  ;;  %v101_v21 = vadd.f32 %v1285_v14, %v78_v10  ;;  %v966_v22 = vunpack.c.h.bf16 %v1053_v11 }
  0x1b   :  { %1113 = vmatpush3.bf16.msra.mxu0 %v1176_v24  ;;  %v126_v24 = vpack.c.bf16 %v115_v15, %v114_v12  ;;  %v117_v29 = vmax.f32 %v101_v21, 0.0  ;;  %v81_v30 = vmul.f32 %v965_v18, %v1280_v13  ;;  %v82_v31 = vmul.f32 %v966_v22, %v1280_v13 }
  0x1c   :  { %1145 = vmatpush3.bf16.msra.mxu1 %v1177_v28  ;;  %1114 = vmatprep.subr.bf16.mxu0 %v1178_v42  ;;  %v116_v28 = vmax.f32 %v100_v20, 0.0 }
  0x1d   :  { %1146 = vmatprep.subr.bf16.mxu1 %v1179_v43  ;;  %v104_v35 = vadd.f32 %v1285_v14, %v81_v30  ;;  %v105_v36 = vadd.f32 %v1285_v14, %v82_v31  ;;  %v1187_v14 = vld [vmem:[%s1435_s4 + $0x38] sm:$0xff]  }
  0x1e   :  { %v127_v34 = vpack.c.bf16 %v117_v29, %v116_v28 }
  0x1f   :  { %1115 = vmatpush3.bf16.msra.mxu0 %v1178_v42  ;;  %v120_v13 = vmax.f32 %v104_v35, 0.0  ;;  %v121_v40 = vmax.f32 %v105_v36, 0.0 }
  0x20   :  { %1147 = vmatpush3.bf16.msra.mxu1 %v1179_v43 }
  0x21   :  { %v129_v41 = vpack.c.bf16 %v121_v40, %v120_v13 }
  0x22   :  { %1117 = vmatmul.mubr.bf16.vlgmr.msra.gmra.mxu0 %v123_v59 }
  0x23   :  { %1149 = vmatmul.mubr.bf16.vlgmr.msra.gmra.mxu1 %v1181_v1  ;;  %1120 = vmatprep.mubr.bf16.mxu0 %v124_v61 }
  0x24   :  { %1152 = vmatprep.mubr.bf16.mxu1 %v1182_v6 }
  0x2a   :  { %1121 = vmatmul.mubr.bf16.gmra.mxu0 %v125_v19 }
  0x2b   :  { %1153 = vmatmul.mubr.bf16.gmra.mxu1 %v1183_v23  ;;  %1124 = vmatprep.mubr.bf16.mxu0 %v126_v24 }
  0x2c   :  { %1156 = vmatprep.mubr.bf16.mxu1 %v1184_v27 }
  0x32   :  { %1125 = vmatmul.mubr.bf16.gmra.mxu0 %v127_v34 }
  0x33   :  { %1157 = vmatmul.mubr.bf16.gmra.mxu1 %v1185_v37  ;;  %1128 = vmatprep.mubr.bf16.mxu0 %v128_v38 }
  0x34   :  { %1160 = vmatprep.mubr.bf16.mxu1 %v1186_v39 }
  0x3a   :  { %1129 = vmatmul.mubr.bf16.gmra.mxu0 %v129_v41 }
  0x3b   :  { %1161 = vmatmul.mubr.bf16.gmra.mxu1 %v1187_v14 }
  0xe2   :  { %v1118_v42 = vpop.f32.mrf.mxu0 }
  0xe3   :  { %v1150_v43 = vpop.f32.mrf.mxu1 }
  0xe4   :  { %v228_v44 = vpop.f32.mrf.mxu0 }
  0xe5   :  { %v453_v45 = vpop.f32.mrf.mxu1 }
  0xe6   :  { %v1119_v46 = vpop.f32.mrf.mxu0 }
  0xe7   :  { %v517_v47 = vpack.c.bf16 %v1119_v46, %v1118_v42  ;;  %v1151_v48 = vpop.f32.mrf.mxu1 }
  0xe8   :  { %v525_v49 = vpack.c.bf16 %v1151_v48, %v1150_v43  ;;  %v231_v50 = vpop.f32.mrf.mxu0 }
  0xe9   :  { %1054 = vst [vmem:[%s1436_s6 + $0x8] sm:$0xff] %v517_v47   ;;  %v516_v51 = vpack.c.bf16 %v231_v50, %v228_v44  ;;  %v456_v52 = vpop.f32.mrf.mxu1  ;;  %v678_v55 = vunpack.c.l.bf16 %v517_v47  ;;  %v679_v59 = vunpack.c.h.bf16 %v517_v47 }
  0xea   :  { %1061 = vst [vmem:[%s1437_s7 + $0x8] sm:$0xff] %v525_v49   ;;  %v524_v53 = vpack.c.bf16 %v456_v52, %v453_v45  ;;  %v1122_v54 = vpop.f32.mrf.mxu0  ;;  %v755_v63 = vunpack.c.l.bf16 %v525_v49  ;;  %v756_v4 = vunpack.c.h.bf16 %v525_v49 }
  0xeb   :  { %971 = vst [vmem:[%s1436_s6] sm:$0xff] %v516_v51   ;;  %v676_v56 = vunpack.c.l.bf16 %v516_v51  ;;  %v677_v57 = vunpack.c.h.bf16 %v516_v51  ;;  %v1154_v58 = vpop.f32.mrf.mxu1  ;;  %v715_v9 = vmul.f32 %v678_v55, %v678_v55  ;;  %v716_v22 = vmul.f32 %v679_v59, %v679_v59 }
  0xec   :  { %1011 = vst [vmem:[%s1437_s7] sm:$0xff] %v524_v53   ;;  %v753_v60 = vunpack.c.l.bf16 %v524_v53  ;;  %v754_v61 = vunpack.c.h.bf16 %v524_v53  ;;  %v244_v62 = vpop.f32.mrf.mxu0  ;;  %v792_v23 = vmul.f32 %v755_v63, %v755_v63  ;;  %v793_v26 = vmul.f32 %v756_v4, %v756_v4 }
  0xed   :  { %v692_v0 = vadd.f32 %v677_v57, %v676_v56  ;;  %v713_v1 = vmul.f32 %v676_v56, %v676_v56  ;;  %v714_v2 = vmul.f32 %v677_v57, %v677_v57  ;;  %v469_v3 = vpop.f32.mrf.mxu1 }
  0xee   :  { %v769_v5 = vadd.f32 %v754_v61, %v753_v60  ;;  %v790_v6 = vmul.f32 %v753_v60, %v753_v60  ;;  %v791_v7 = vmul.f32 %v754_v61, %v754_v61  ;;  %v1123_v8 = vpop.f32.mrf.mxu0 }
  0xef   :  { %v693_v10 = vadd.f32 %v692_v0, %v678_v55  ;;  %v729_v11 = vadd.f32 %v714_v2, %v713_v1  ;;  %v519_v12 = vpack.c.bf16 %v1123_v8, %v1122_v54  ;;  %v1155_v15 = vpop.f32.mrf.mxu1 }
  0xf0   :  { %v806_v16 = vadd.f32 %v791_v7, %v790_v6  ;;  %v527_v17 = vpack.c.bf16 %v1155_v15, %v1154_v58  ;;  %v247_v18 = vpop.f32.mrf.mxu0  ;;  %v770_v24 = vadd.f32 %v769_v5, %v755_v63 }
  0xf1   :  { %v730_v19 = vadd.f32 %v729_v11, %v715_v9  ;;  %1056 = vst [vmem:[%s1436_s6 + $0x18] sm:$0xff] %v519_v12   ;;  %v518_v20 = vpack.c.bf16 %v247_v18, %v244_v62  ;;  %v472_v21 = vpop.f32.mrf.mxu1  ;;  %v694_v29 = vadd.f32 %v693_v10, %v679_v59  ;;  %v682_v32 = vunpack.c.l.bf16 %v519_v12 }
  0xf2   :  { %1063 = vst [vmem:[%s1437_s7 + $0x18] sm:$0xff] %v527_v17   ;;  %v1126_v25 = vpop.f32.mrf.mxu0  ;;  %v807_v31 = vadd.f32 %v806_v16, %v792_v23  ;;  %v683_v33 = vunpack.c.h.bf16 %v519_v12  ;;  %v526_v34 = vpack.c.bf16 %v472_v21, %v469_v3  ;;  %v759_v36 = vunpack.c.l.bf16 %v527_v17 }
  0xf3   :  { %1055 = vst [vmem:[%s1436_s6 + $0x10] sm:$0xff] %v518_v20   ;;  %v680_v27 = vunpack.c.l.bf16 %v518_v20  ;;  %v681_v28 = vunpack.c.h.bf16 %v518_v20  ;;  %v1158_v30 = vpop.f32.mrf.mxu1  ;;  %v731_v39 = vadd.f32 %v730_v19, %v716_v22  ;;  %v760_v40 = vunpack.c.h.bf16 %v527_v17 }
  0xf4   :  { %v260_v35 = vpop.f32.mrf.mxu0  ;;  %1062 = vst [vmem:[%s1437_s7 + $0x10] sm:$0xff] %v526_v34   ;;  %v757_v41 = vunpack.c.l.bf16 %v526_v34  ;;  %v758_v14 = vunpack.c.h.bf16 %v526_v34  ;;  %v771_v42 = vadd.f32 %v770_v24, %v756_v4  ;;  %v808_v51 = vadd.f32 %v807_v31, %v793_v26 }
  0xf5   :  { %v695_v37 = vadd.f32 %v694_v29, %v680_v27  ;;  %v717_v38 = vmul.f32 %v680_v27, %v680_v27  ;;  %v485_v13 = vpop.f32.mrf.mxu1  ;;  %v718_v45 = vmul.f32 %v681_v28, %v681_v28  ;;  %v719_v54 = vmul.f32 %v682_v32, %v682_v32 }
  0xf6   :  { %v1127_v43 = vpop.f32.mrf.mxu0  ;;  %v772_v49 = vadd.f32 %v771_v42, %v757_v41  ;;  %v794_v50 = vmul.f32 %v757_v41, %v757_v41  ;;  %v795_v59 = vmul.f32 %v758_v14, %v758_v14  ;;  %v720_v62 = vmul.f32 %v683_v33, %v683_v33 }
  0xf7   :  { %v696_v44 = vadd.f32 %v695_v37, %v681_v28  ;;  %v732_v46 = vadd.f32 %v731_v39, %v717_v38  ;;  %v521_v47 = vpack.c.bf16 %v1127_v43, %v1126_v25  ;;  %v1159_v48 = vpop.f32.mrf.mxu1  ;;  %v796_v2 = vmul.f32 %v759_v36, %v759_v36 }
  0xf8   :  { %v529_v52 = vpack.c.bf16 %v1159_v48, %v1158_v30  ;;  %v263_v53 = vpop.f32.mrf.mxu0  ;;  %v773_v58 = vadd.f32 %v772_v49, %v758_v14  ;;  %v809_v60 = vadd.f32 %v808_v51, %v794_v50  ;;  %v797_v3 = vmul.f32 %v760_v40, %v760_v40 }
  0xf9   :  { %v697_v55 = vadd.f32 %v696_v44, %v682_v32  ;;  %v733_v56 = vadd.f32 %v732_v46, %v718_v45  ;;  %1058 = vst [vmem:[%s1436_s6 + $0x28] sm:$0xff] %v521_v47   ;;  %v488_v57 = vpop.f32.mrf.mxu1  ;;  %v520_v0 = vpack.c.bf16 %v263_v53, %v260_v35  ;;  %v686_v15 = vunpack.c.l.bf16 %v521_v47 }
  0xfa   :  { %1065 = vst [vmem:[%s1437_s7 + $0x28] sm:$0xff] %v529_v52   ;;  %v1130_v61 = vpop.f32.mrf.mxu0  ;;  %v774_v4 = vadd.f32 %v773_v58, %v759_v36  ;;  %v810_v5 = vadd.f32 %v809_v60, %v795_v59  ;;  %v528_v16 = vpack.c.bf16 %v488_v57, %v485_v13  ;;  %v687_v19 = vunpack.c.h.bf16 %v521_v47 }
  0xfb   :  { %v734_v63 = vadd.f32 %v733_v56, %v719_v54  ;;  %v1162_v1 = vpop.f32.mrf.mxu1  ;;  %1057 = vst [vmem:[%s1436_s6 + $0x20] sm:$0xff] %v520_v0   ;;  %v684_v7 = vunpack.c.l.bf16 %v520_v0  ;;  %v685_v8 = vunpack.c.h.bf16 %v520_v0  ;;  %v698_v9 = vadd.f32 %v697_v55, %v683_v33 }
  0xfc   :  { %v276_v6 = vpop.f32.mrf.mxu0  ;;  %v811_v12 = vadd.f32 %v810_v5, %v796_v2  ;;  %v775_v17 = vadd.f32 %v774_v4, %v760_v40  ;;  %1064 = vst [vmem:[%s1437_s7 + $0x20] sm:$0xff] %v528_v16   ;;  %v761_v24 = vunpack.c.l.bf16 %v528_v16  ;;  %v762_v25 = vunpack.c.h.bf16 %v528_v16 }
  0xfd   :  { %v735_v10 = vadd.f32 %v734_v63, %v720_v62  ;;  %v501_v11 = vpop.f32.mrf.mxu1  ;;  %v699_v20 = vadd.f32 %v698_v9, %v684_v7  ;;  %v721_v21 = vmul.f32 %v684_v7, %v684_v7  ;;  %v722_v29 = vmul.f32 %v685_v8, %v685_v8 }
  0xfe   :  { %v1131_v18 = vpop.f32.mrf.mxu0  ;;  %v812_v26 = vadd.f32 %v811_v12, %v797_v3  ;;  %v763_v31 = vunpack.c.l.bf16 %v529_v52  ;;  %v776_v32 = vadd.f32 %v775_v17, %v761_v24  ;;  %v798_v33 = vmul.f32 %v761_v24, %v761_v24 }
  0xff   :  { %v523_v22 = vpack.c.bf16 %v1131_v18, %v1130_v61  ;;  %v1163_v23 = vpop.f32.mrf.mxu1  ;;  %v700_v28 = vadd.f32 %v699_v20, %v685_v8  ;;  %v736_v30 = vadd.f32 %v735_v10, %v721_v21  ;;  %v723_v36 = vmul.f32 %v686_v15, %v686_v15 }
 0x100   :  { %v531_v27 = vpack.c.bf16 %v1163_v23, %v1162_v1  ;;  %v279_v34 = vpop.f32.mrf.mxu0  ;;  %v764_v37 = vunpack.c.h.bf16 %v529_v52  ;;  %v724_v13 = vmul.f32 %v687_v19, %v687_v19  ;;  %v777_v40 = vadd.f32 %v776_v32, %v762_v25 }
 0x101   :  { %1060 = vst [vmem:[%s1436_s6 + $0x38] sm:$0xff] %v523_v22   ;;  %v504_v35 = vpop.f32.mrf.mxu1  ;;  %v701_v38 = vadd.f32 %v700_v28, %v686_v15  ;;  %v737_v39 = vadd.f32 %v736_v30, %v722_v29  ;;  %v799_v41 = vmul.f32 %v762_v25, %v762_v25  ;;  %v813_v14 = vadd.f32 %v812_v26, %v798_v33 }
 0x102   :  { %1067 = vst [vmem:[%s1437_s7 + $0x38] sm:$0xff] %v531_v27   ;;  %v522_v43 = vpack.c.bf16 %v279_v34, %v276_v6  ;;  %v530_v45 = vpack.c.bf16 %v504_v35, %v501_v11  ;;  %v800_v46 = vmul.f32 %v763_v31, %v763_v31  ;;  %v778_v47 = vadd.f32 %v777_v40, %v763_v31 }
 0x103   :  { %v738_v42 = vadd.f32 %v737_v39, %v723_v36  ;;  %v702_v44 = vadd.f32 %v701_v38, %v687_v19  ;;  %v814_v48 = vadd.f32 %v813_v14, %v799_v41  ;;  %v801_v53 = vmul.f32 %v764_v37, %v764_v37 }
 0x104   :  { %1059 = vst [vmem:[%s1436_s6 + $0x30] sm:$0xff] %v522_v43   ;;  %v688_v49 = vunpack.c.l.bf16 %v522_v43  ;;  %v689_v50 = vunpack.c.h.bf16 %v522_v43  ;;  %1066 = vst [vmem:[%s1437_s7 + $0x30] sm:$0xff] %v530_v45   ;;  %v765_v52 = vunpack.c.l.bf16 %v530_v45  ;;  %v766_v55 = vunpack.c.h.bf16 %v530_v45 }
 0x105   :  { %v739_v51 = vadd.f32 %v738_v42, %v724_v13  ;;  %v815_v54 = vadd.f32 %v814_v48, %v800_v46  ;;  %v779_v56 = vadd.f32 %v778_v47, %v764_v37  ;;  %v690_v57 = vunpack.c.l.bf16 %v523_v22 }
 0x106   :  { %v703_v58 = vadd.f32 %v702_v44, %v688_v49  ;;  %v725_v59 = vmul.f32 %v688_v49, %v688_v49  ;;  %v802_v60 = vmul.f32 %v765_v52, %v765_v52  ;;  %v767_v61 = vunpack.c.l.bf16 %v531_v27 }
 0x107   :  { %v780_v62 = vadd.f32 %v779_v56, %v765_v52  ;;  %v816_v63 = vadd.f32 %v815_v54, %v801_v53  ;;  %v691_v0 = vunpack.c.h.bf16 %v523_v22  ;;  %v726_v2 = vmul.f32 %v689_v50, %v689_v50 }
 0x108   :  { %v704_v1 = vadd.f32 %v703_v58, %v689_v50  ;;  %v740_v3 = vadd.f32 %v739_v51, %v725_v59  ;;  %v768_v4 = vunpack.c.h.bf16 %v531_v27  ;;  %v803_v6 = vmul.f32 %v766_v55, %v766_v55 }
 0x109   :  { %v781_v5 = vadd.f32 %v780_v62, %v766_v55  ;;  %v817_v7 = vadd.f32 %v816_v63, %v802_v60  ;;  %v727_v8 = vmul.f32 %v690_v57, %v690_v57  ;;  %v804_v11 = vmul.f32 %v767_v61, %v767_v61 }
 0x10a   :  { %v705_v9 = vadd.f32 %v704_v1, %v690_v57  ;;  %v741_v10 = vadd.f32 %v740_v3, %v726_v2  ;;  %v728_v16 = vmul.f32 %v691_v0, %v691_v0  ;;  %v805_v19 = vmul.f32 %v768_v4, %v768_v4 }
 0x10b   :  { %v782_v12 = vadd.f32 %v781_v5, %v767_v61  ;;  %v818_v15 = vadd.f32 %v817_v7, %v803_v6 }
 0x10c   :  { %v706_v17 = vadd.f32 %v705_v9, %v691_v0  ;;  %v742_v18 = vadd.f32 %v741_v10, %v727_v8 }
 0x10d   :  { %v783_v20 = vadd.f32 %v782_v12, %v768_v4  ;;  %v819_v21 = vadd.f32 %v818_v15, %v804_v11 }
 0x10e   :  { %v707_v22 = vrot.slane %v706_v17, 4  ;;  %v743_v23 = vadd.f32 %v742_v18, %v728_v16 }
 0x10f   :  { %v784_v24 = vrot.slane %v783_v20, 4  ;;  %v820_v25 = vadd.f32 %v819_v21, %v805_v19 }
 0x110   :  { %v708_v26 = vadd.f32 %v707_v22, %v706_v17  ;;  %v744_v27 = vrot.slane %v743_v23, 4 }
 0x111   :  { %v785_v28 = vadd.f32 %v784_v24, %v783_v20  ;;  %v821_v29 = vrot.slane %v820_v25, 4 }
 0x112   :  { %v709_v30 = vrot.slane %v708_v26, 2  ;;  %v745_v31 = vadd.f32 %v744_v27, %v743_v23 }
 0x113   :  { %v786_v32 = vrot.slane %v785_v28, 2  ;;  %v822_v33 = vadd.f32 %v821_v29, %v820_v25 }
 0x114   :  { %v710_v34 = vadd.f32 %v709_v30, %v708_v26  ;;  %v746_v35 = vrot.slane %v745_v31, 2 }
 0x115   :  { %v787_v36 = vadd.f32 %v786_v32, %v785_v28  ;;  %v823_v37 = vrot.slane %v822_v33, 2 }
 0x116   :  { %v711_v38 = vrot.slane %v710_v34, 1  ;;  %v747_v39 = vadd.f32 %v746_v35, %v745_v31 }
 0x117   :  { %v788_v13 = vrot.slane %v787_v36, 1  ;;  %v824_v40 = vadd.f32 %v823_v37, %v822_v33 }
 0x118   :  { %v748_v41 = vrot.slane %v747_v39, 1  ;;  %v712_v42 = vadd.f32 %v711_v38, %v710_v34 }
 0x119   :  { %v825_v14 = vrot.slane %v824_v40, 1  ;;  %v789_v44 = vadd.f32 %v788_v13, %v787_v36 }
 0x11a   :  { %v749_v43 = vadd.f32 %v748_v41, %v747_v39 }
 0x11b   :  { %v826_v45 = vadd.f32 %v825_v14, %v824_v40 }
 0x11c   :  { %v751_v46 = vsel %vm750_vm0, %v712_v42, %v749_v43 }
 0x11d   :  { %752 = vst [vmem:[%s1438_s8] sm:$0x3] %v751_v46  ;;  %v827_v47 = vsel %vm750_vm0, %v789_v44, %v826_v45 }
 0x11e   :  { %828 = vst [vmem:[%s1439_s9] sm:$0x3] %v827_v47 }

</bundles_post_ra>
